<compile_context>
chip_gen: v5e
topology: v5e:2x2
jax: 0.10.0
libtpu: 0.0.40
codegen_flags: <defaults>
</compile_context>

<pallas_src>
import jax
import jax.numpy as jnp
import numpy as np
from jax.experimental import pallas as pl
from jax.experimental.pallas import tpu as pltpu

# ----------------------------- model dims -----------------------------------
C = 4            # EEG channels
T = 128          # timepoints per epoch (exactly one 128-lane group)
H = 8            # hidden conv channels
DEMB = 16        # sinusoidal timestep-embedding dim
HT = 32          # time-MLP hidden dim
E_TILE_MAX = 256  # epochs per grid step; a few MiB of live VMEM -> safe on v5e/v6e/v7x

assert T == 128, "epoch length must be exactly one 128-lane group"


# ----------------------------- Pallas kernel ---------------------------------
def unet_block_kernel(x_ref, tb_ref, w1_ref, w2_ref, b2_ref, out_ref):
    """One grid step: a block of epochs laid out as [channels, e_tile, T]."""
    e_tile = x_ref.shape[1]

    # Epoch-boundary masks, hoisted once per grid step (single lane-iota,
    # reused by both convs).
    t_pos = jax.lax.broadcasted_iota(jnp.int32, (e_tile, T), 1)
    not_first = t_pos != 0
    not_last = t_pos != (T - 1)

    def taps(v):
        # v: [e_tile, T] -> (v[t-1], v[t], v[t+1]) with zero padding at epoch
        # edges.  T == 128, so each roll is a within-vreg lane rotation.
        prev = jnp.where(not_first, pltpu.roll(v, shift=1, axis=1), 0.0)
        nxt = jnp.where(not_last, pltpu.roll(v, shift=T - 1, axis=1), 0.0)
        return prev, v, nxt

    # ---- conv1: C -> H, k=3, pad=1; + per-epoch time bias; SiLU ------------
    h_acc = [None] * H
    for c in range(C):
        xk = taps(x_ref[c])
        for o in range(H):
            base = (o * C + c) * 3
            term = (w1_ref[base + 0] * xk[0]
                    + w1_ref[base + 1] * xk[1]
                    + w1_ref[base + 2] * xk[2])
            h_acc[o] = term if h_acc[o] is None else h_acc[o] + term

    h = []
    for o in range(H):
        # compact per-epoch bias (b1 + time MLP) broadcast across the T lanes
        a = h_acc[o] + jnp.broadcast_to(tb_ref[:, o:o + 1], (e_tile, T))
        h.append(a * jax.nn.sigmoid(a))                       # SiLU

    # ---- conv2: H -> C, k=3, pad=1; + bias; residual ------------------------
    y_acc = [None] * C
    for c in range(H):
        hk = taps(h[c])
        for o in range(C):
            base = (o * H + c) * 3
            term = (w2_ref[base + 0] * hk[0]
                    + w2_ref[base + 1] * hk[1]
                    + w2_ref[base + 2] * hk[2])
            y_acc[o] = term if y_acc[o] is None else y_acc[o] + term

    for o in range(C):
        out_ref[o] = (x_ref[o] + y_acc[o] + b2_ref[o]).astype(out_ref.dtype)


# ----------------------------- wrapper ---------------------------------------
def _sinusoidal_embedding(t, dim):
    half = dim // 2
    freqs = jnp.exp(-jnp.log(10000.0) * jnp.arange(half, dtype=jnp.float32) / half)
    args = t[:, None].astype(jnp.float32) * freqs[None, :]
    return jnp.concatenate([jnp.sin(args), jnp.cos(args)], axis=-1)


def _round_up(v, m):
    return ((v + m - 1) // m) * m


def _cdiv(a, b):
    return -(-a // b)


@jax.jit
def unet_forward(x, t, params):
    """x: [E, C, T] float32, t: [E] float32  ->  [E, C, T] float32."""
    E = x.shape[0]
    p = params

    # --- timestep MLP in plain JAX (hoisted out of the kernel) ---
    temb = _sinusoidal_embedding(t, DEMB)                       # [E, DEMB]
    ht = temb @ p['wt1'].T + p['bt1']
    ht = ht * jax.nn.sigmoid(ht)                                # SiLU
    tbias = ht @ p['wt2'].T + p['bt2'] + p['b1']                # [E, H]; conv1 bias folded

    # --- channel-major layout [C, E, T]; pad epochs to a multiple of 8 ---
    # TODO(synk): this transpose is a separate XLA copy around the kernel; it
    # could be removed by producing/consuming x in channel-major layout upstream.
    x_cet = jnp.transpose(x.astype(jnp.float32), (1, 0, 2))     # [C, E, T]
    E_pad = _round_up(max(E, 1), 8)
    if E_pad != E:
        x_cet = jnp.pad(x_cet, ((0, 0), (0, E_pad - E), (0, 0)))
        tbias = jnp.pad(tbias, ((0, E_pad - E), (0, 0)))

    # --- epoch tile: >= 2 blocks when possible (v7x megacore), capped by VMEM ---
    n_blk = max(2, _cdiv(E_pad, E_TILE_MAX))
    e_tile = min(E_pad, _round_up(_cdiv(E_pad, n_blk), 8))
    num_blocks = _cdiv(E_pad, e_tile)

    # Conv weights are tiny (96 + 96 + 4 scalars) -> flat f32 arrays in SMEM.
    w1_flat = p['w1'].astype(jnp.float32).reshape(-1)           # [H*C*3]
    w2_flat = p['w2'].astype(jnp.float32).reshape(-1)           # [C*H*3]
    b2 = p['b2'].astype(jnp.float32)                            # [C]

    out_cet = pl.pallas_call(
        unet_block_kernel,
        out_shape=jax.ShapeDtypeStruct((C, E_pad, T), jnp.float32),
        grid=(num_blocks,),
        in_specs=[
            pl.BlockSpec((C, e_tile, T), lambda i: (0, i, 0)),    # x block
            pl.BlockSpec((e_tile, H), lambda i: (i, 0)),          # compact time bias
            pl.BlockSpec(memory_space=pltpu.MemorySpace.SMEM),    # conv1 weights
            pl.BlockSpec(memory_space=pltpu.MemorySpace.SMEM),    # conv2 weights
            pl.BlockSpec(memory_space=pltpu.MemorySpace.SMEM),    # conv2 bias
        ],
        out_specs=pl.BlockSpec((C, e_tile, T), lambda i: (0, i, 0)),
        compiler_params=pltpu.CompilerParams(
            dimension_semantics=("parallel",),
            vmem_limit_bytes=48 * 1024 * 1024,
        ),
    )(x_cet, tbias, w1_flat, w2_flat, b2)

    return jnp.transpose(out_cet[:, :E, :], (1, 0, 2))           # back to [E, C, T]


def batched_patient_diffusion_forward(patient_batch, params, timesteps=None,
                                      context=None, y=None, **kwargs):
    """Mirror of BatchedPatientDiffusionWrapper.forward."""
    # TODO(synk): `context` / `y` conditioning are unused by this synthetic UNet.
    epoch_counts = [pd['eeg'].shape[0] for pd in patient_batch]
    xs = [pd['eeg'].astype(jnp.float32) for pd in patient_batch]
    ts = []
    for i, num_epochs in enumerate(epoch_counts):
        if timesteps is not None:
            t_i = timesteps[0] if timesteps.shape[0] == 1 else timesteps[i]
            ts.append(jnp.full((num_epochs,), t_i, jnp.float32))
        else:
            # TODO(synk): PyTorch would pass t=None to the UNet; we use t=0 instead.
            ts.append(jnp.zeros((num_epochs,), jnp.float32))

    # Single fused call over all patients' epochs (no per-patient/per-epoch launches).
    x_all = jnp.concatenate(xs, axis=0)          # [E_total, C, T]
    t_all = jnp.concatenate(ts, axis=0)          # [E_total]
    out_all = unet_forward(x_all, t_all, params)

    results = []
    off = 0
    for pd, num_epochs in zip(patient_batch, epoch_counts):
        r = dict(pd)
        r['processed_eeg'] = out_all[off:off + num_epochs]
        off += num_epochs
        results.append(r)
    return results


# ----------------------------- params & pure-JAX reference -------------------
def init_params(key):
    ks = jax.random.split(key, 8)
    s = 0.1
    return {
        'wt1': s * jax.random.normal(ks[0], (HT, DEMB), jnp.float32),
        'bt1': s * jax.random.normal(ks[1], (HT,), jnp.float32),
        'wt2': s * jax.random.normal(ks[2], (H, HT), jnp.float32),
        'bt2': s * jax.random.normal(ks[3], (H,), jnp.float32),
        'w1':  s * jax.random.normal(ks[4], (H, C, 3), jnp.float32),   # Conv1d [out, in, k]
        'b1':  s * jax.random.normal(ks[5], (H,), jnp.float32),
        'w2':  s * jax.random.normal(ks[6], (C, H, 3), jnp.float32),
        'b2':  s * jax.random.normal(ks[7], (C,), jnp.float32),
    }


def unet_ref(x, t, params):
    p = params
    temb = _sinusoidal_embedding(t, DEMB)
    ht = jax.nn.silu(temb @ p['wt1'].T + p['bt1'])
    tbias = ht @ p['wt2'].T + p['bt2']                           # [E, H]

    def conv3(v, w, b):
        vl = jnp.pad(v, ((0, 0), (0, 0), (1, 0)))[:, :, :T]      # v[t-1]
        vr = jnp.pad(v, ((0, 0), (0, 0), (0, 1)))[:, :, 1:]      # v[t+1]
        return (jnp.einsum('oc,ect->eot', w[:, :, 0], vl)
                + jnp.einsum('oc,ect->eot', w[:, :, 1], v)
                + jnp.einsum('oc,ect->eot', w[:, :, 2], vr)
                + b[None, :, None])

    h = jax.nn.silu(conv3(x, p['w1'], p['b1']) + tbias[:, :, None])
    y = conv3(h, p['w2'], p['b2'])
    return x + y


# --------------------------------- main --------------------------------------
if __name__ == "__main__":
    key = jax.random.PRNGKey(0)
    kp, k0, k1 = jax.random.split(key, 3)
    params = init_params(kp)

    # Two patients with different numbers of epochs (ragged list, like PyTorch).
    patient_batch = [
        {'eeg': jax.random.normal(k0, (3, C, T), jnp.float32), 'patient_id': 0},
        {'eeg': jax.random.normal(k1, (2, C, T), jnp.float32), 'patient_id': 1},
    ]
    timesteps = jnp.array([5.0, 9.0], dtype=jnp.float32)   # one timestep per patient

    results = batched_patient_diffusion_forward(patient_batch, params,
                                                timesteps=timesteps)
    for r in results:
        jax.block_until_ready(r['processed_eeg'])

    # Correctness check against the pure-JAX reference.
    ok = True
    for i, (inp, res) in enumerate(zip(patient_batch, results)):
        E = inp['eeg'].shape[0]
        pt = jnp.repeat(timesteps[i:i + 1], E)
        ref = unet_ref(inp['eeg'], pt, params)
        got = res['processed_eeg']
        if got.shape != inp['eeg'].shape:
            ok = False
        if not np.allclose(np.asarray(got), np.asarray(ref), atol=1e-4, rtol=1e-4):
            ok = False

    if not ok:
        raise SystemExit("mismatch between Pallas kernel and JAX reference")
    print("KERNEL_OK")
</pallas_src>

<mosaic_0001>
module attributes {stable_mosaic.version = 11 : i64} {
  func.func @unet_block_kernel(%arg0: i32, %arg1: memref<4x8x128xf32, #tpu.memory_space<vmem>>, %arg2: memref<8x8xf32, #tpu.memory_space<vmem>>, %arg3: memref<96xf32, #tpu.memory_space<smem>>, %arg4: memref<96xf32, #tpu.memory_space<smem>>, %arg5: memref<4xf32, #tpu.memory_space<smem>>, %arg6: memref<4x8x128xf32, #tpu.memory_space<vmem>>) attributes {dimension_semantics = [#tpu.dimension_semantics<parallel>], iteration_bounds = array<i64: 1>, scalar_prefetch = 0 : i64, scratch_operands = 0 : i64, tpu.core_type = #tpu.core_type<tc>, window_params = [{transform_indices = @transform_0, window_bounds = array<i64: 4, 8, 128>}, {transform_indices = @transform_1, window_bounds = array<i64: 8, 8>}, {transform_indices = @transform_2, window_bounds = array<i64: 96>}, {transform_indices = @transform_3, window_bounds = array<i64: 96>}, {transform_indices = @transform_4, window_bounds = array<i64: 4>}, {transform_indices = @transform_5, window_bounds = array<i64: 4, 8, 128>}]} {
    %0 = tpu.iota {dimensions = array<i32: 1>} : vector<8x128xi32>
    %c0_i32 = arith.constant 0 : i32
    %1 = vector.broadcast %c0_i32 : i32 to vector<8x128xi32>
    %2 = arith.cmpi ne, %0, %1 : vector<8x128xi32>
    %c127_i32 = arith.constant 127 : i32
    %3 = vector.broadcast %c127_i32 : i32 to vector<8x128xi32>
    %4 = arith.cmpi ne, %0, %3 : vector<8x128xi32>
    %c0 = arith.constant 0 : index
    %c0_0 = arith.constant 0 : index
    %c0_1 = arith.constant 0 : index
    %5 = vector.load %arg1[%c0, %c0_0, %c0_1] : memref<4x8x128xf32, #tpu.memory_space<vmem>>, vector<1x8x128xf32>
    %6 = vector.shape_cast %5 : vector<1x8x128xf32> to vector<8x128xf32>
    %c1_i32 = arith.constant 1 : i32
    %7 = tpu.dynamic_rotate %6 by %c1_i32 dim 1 : vector<8x128xf32>, i32 -> vector<8x128xf32>
    %cst = arith.constant 0.000000e+00 : f32
    %8 = vector.broadcast %cst : f32 to vector<8x128xf32>
    %9 = arith.select %2, %7, %8 : vector<8x128xi1>, vector<8x128xf32>
    %c127_i32_2 = arith.constant 127 : i32
    %10 = tpu.dynamic_rotate %6 by %c127_i32_2 dim 1 : vector<8x128xf32>, i32 -> vector<8x128xf32>
    %cst_3 = arith.constant 0.000000e+00 : f32
    %11 = vector.broadcast %cst_3 : f32 to vector<8x128xf32>
    %12 = arith.select %4, %10, %11 : vector<8x128xi1>, vector<8x128xf32>
    %c0_4 = arith.constant 0 : index
    %13 = memref.load %arg3[%c0_4] : memref<96xf32, #tpu.memory_space<smem>>
    %14 = vector.broadcast %13 : f32 to vector<8x128xf32>
    %15 = arith.mulf %14, %9 : vector<8x128xf32>
    %c1 = arith.constant 1 : index
    %16 = memref.load %arg3[%c1] : memref<96xf32, #tpu.memory_space<smem>>
    %17 = vector.broadcast %16 : f32 to vector<8x128xf32>
    %18 = arith.mulf %17, %6 : vector<8x128xf32>
    %19 = arith.addf %15, %18 : vector<8x128xf32>
    %c2 = arith.constant 2 : index
    %20 = memref.load %arg3[%c2] : memref<96xf32, #tpu.memory_space<smem>>
    %21 = vector.broadcast %20 : f32 to vector<8x128xf32>
    %22 = arith.mulf %21, %12 : vector<8x128xf32>
    %23 = arith.addf %19, %22 : vector<8x128xf32>
    %c12 = arith.constant 12 : index
    %24 = memref.load %arg3[%c12] : memref<96xf32, #tpu.memory_space<smem>>
    %25 = vector.broadcast %24 : f32 to vector<8x128xf32>
    %26 = arith.mulf %25, %9 : vector<8x128xf32>
    %c13 = arith.constant 13 : index
    %27 = memref.load %arg3[%c13] : memref<96xf32, #tpu.memory_space<smem>>
    %28 = vector.broadcast %27 : f32 to vector<8x128xf32>
    %29 = arith.mulf %28, %6 : vector<8x128xf32>
    %30 = arith.addf %26, %29 : vector<8x128xf32>
    %c14 = arith.constant 14 : index
    %31 = memref.load %arg3[%c14] : memref<96xf32, #tpu.memory_space<smem>>
    %32 = vector.broadcast %31 : f32 to vector<8x128xf32>
    %33 = arith.mulf %32, %12 : vector<8x128xf32>
    %34 = arith.addf %30, %33 : vector<8x128xf32>
    %c24 = arith.constant 24 : index
    %35 = memref.load %arg3[%c24] : memref<96xf32, #tpu.memory_space<smem>>
    %36 = vector.broadcast %35 : f32 to vector<8x128xf32>
    %37 = arith.mulf %36, %9 : vector<8x128xf32>
    %c25 = arith.constant 25 : index
    %38 = memref.load %arg3[%c25] : memref<96xf32, #tpu.memory_space<smem>>
    %39 = vector.broadcast %38 : f32 to vector<8x128xf32>
    %40 = arith.mulf %39, %6 : vector<8x128xf32>
    %41 = arith.addf %37, %40 : vector<8x128xf32>
    %c26 = arith.constant 26 : index
    %42 = memref.load %arg3[%c26] : memref<96xf32, #tpu.memory_space<smem>>
    %43 = vector.broadcast %42 : f32 to vector<8x128xf32>
    %44 = arith.mulf %43, %12 : vector<8x128xf32>
    %45 = arith.addf %41, %44 : vector<8x128xf32>
    %c36 = arith.constant 36 : index
    %46 = memref.load %arg3[%c36] : memref<96xf32, #tpu.memory_space<smem>>
    %47 = vector.broadcast %46 : f32 to vector<8x128xf32>
    %48 = arith.mulf %47, %9 : vector<8x128xf32>
    %c37 = arith.constant 37 : index
    %49 = memref.load %arg3[%c37] : memref<96xf32, #tpu.memory_space<smem>>
    %50 = vector.broadcast %49 : f32 to vector<8x128xf32>
    %51 = arith.mulf %50, %6 : vector<8x128xf32>
    %52 = arith.addf %48, %51 : vector<8x128xf32>
    %c38 = arith.constant 38 : index
    %53 = memref.load %arg3[%c38] : memref<96xf32, #tpu.memory_space<smem>>
    %54 = vector.broadcast %53 : f32 to vector<8x128xf32>
    %55 = arith.mulf %54, %12 : vector<8x128xf32>
    %56 = arith.addf %52, %55 : vector<8x128xf32>
    %c48 = arith.constant 48 : index
    %57 = memref.load %arg3[%c48] : memref<96xf32, #tpu.memory_space<smem>>
    %58 = vector.broadcast %57 : f32 to vector<8x128xf32>
    %59 = arith.mulf %58, %9 : vector<8x128xf32>
    %c49 = arith.constant 49 : index
    %60 = memref.load %arg3[%c49] : memref<96xf32, #tpu.memory_space<smem>>
    %61 = vector.broadcast %60 : f32 to vector<8x128xf32>
    %62 = arith.mulf %61, %6 : vector<8x128xf32>
    %63 = arith.addf %59, %62 : vector<8x128xf32>
    %c50 = arith.constant 50 : index
    %64 = memref.load %arg3[%c50] : memref<96xf32, #tpu.memory_space<smem>>
    %65 = vector.broadcast %64 : f32 to vector<8x128xf32>
    %66 = arith.mulf %65, %12 : vector<8x128xf32>
    %67 = arith.addf %63, %66 : vector<8x128xf32>
    %c60 = arith.constant 60 : index
    %68 = memref.load %arg3[%c60] : memref<96xf32, #tpu.memory_space<smem>>
    %69 = vector.broadcast %68 : f32 to vector<8x128xf32>
    %70 = arith.mulf %69, %9 : vector<8x128xf32>
    %c61 = arith.constant 61 : index
    %71 = memref.load %arg3[%c61] : memref<96xf32, #tpu.memory_space<smem>>
    %72 = vector.broadcast %71 : f32 to vector<8x128xf32>
    %73 = arith.mulf %72, %6 : vector<8x128xf32>
    %74 = arith.addf %70, %73 : vector<8x128xf32>
    %c62 = arith.constant 62 : index
    %75 = memref.load %arg3[%c62] : memref<96xf32, #tpu.memory_space<smem>>
    %76 = vector.broadcast %75 : f32 to vector<8x128xf32>
    %77 = arith.mulf %76, %12 : vector<8x128xf32>
    %78 = arith.addf %74, %77 : vector<8x128xf32>
    %c72 = arith.constant 72 : index
    %79 = memref.load %arg3[%c72] : memref<96xf32, #tpu.memory_space<smem>>
    %80 = vector.broadcast %79 : f32 to vector<8x128xf32>
    %81 = arith.mulf %80, %9 : vector<8x128xf32>
    %c73 = arith.constant 73 : index
    %82 = memref.load %arg3[%c73] : memref<96xf32, #tpu.memory_space<smem>>
    %83 = vector.broadcast %82 : f32 to vector<8x128xf32>
    %84 = arith.mulf %83, %6 : vector<8x128xf32>
    %85 = arith.addf %81, %84 : vector<8x128xf32>
    %c74 = arith.constant 74 : index
    %86 = memref.load %arg3[%c74] : memref<96xf32, #tpu.memory_space<smem>>
    %87 = vector.broadcast %86 : f32 to vector<8x128xf32>
    %88 = arith.mulf %87, %12 : vector<8x128xf32>
    %89 = arith.addf %85, %88 : vector<8x128xf32>
    %c84 = arith.constant 84 : index
    %90 = memref.load %arg3[%c84] : memref<96xf32, #tpu.memory_space<smem>>
    %91 = vector.broadcast %90 : f32 to vector<8x128xf32>
    %92 = arith.mulf %91, %9 : vector<8x128xf32>
    %c85 = arith.constant 85 : index
    %93 = memref.load %arg3[%c85] : memref<96xf32, #tpu.memory_space<smem>>
    %94 = vector.broadcast %93 : f32 to vector<8x128xf32>
    %95 = arith.mulf %94, %6 : vector<8x128xf32>
    %96 = arith.addf %92, %95 : vector<8x128xf32>
    %c86 = arith.constant 86 : index
    %97 = memref.load %arg3[%c86] : memref<96xf32, #tpu.memory_space<smem>>
    %98 = vector.broadcast %97 : f32 to vector<8x128xf32>
    %99 = arith.mulf %98, %12 : vector<8x128xf32>
    %100 = arith.addf %96, %99 : vector<8x128xf32>
    %c1_5 = arith.constant 1 : index
    %c0_6 = arith.constant 0 : index
    %c0_7 = arith.constant 0 : index
    %101 = vector.load %arg1[%c1_5, %c0_6, %c0_7] : memref<4x8x128xf32, #tpu.memory_space<vmem>>, vector<1x8x128xf32>
    %102 = vector.shape_cast %101 : vector<1x8x128xf32> to vector<8x128xf32>
    %c1_i32_8 = arith.constant 1 : i32
    %103 = tpu.dynamic_rotate %102 by %c1_i32_8 dim 1 : vector<8x128xf32>, i32 -> vector<8x128xf32>
    %cst_9 = arith.constant 0.000000e+00 : f32
    %104 = vector.broadcast %cst_9 : f32 to vector<8x128xf32>
    %105 = arith.select %2, %103, %104 : vector<8x128xi1>, vector<8x128xf32>
    %c127_i32_10 = arith.constant 127 : i32
    %106 = tpu.dynamic_rotate %102 by %c127_i32_10 dim 1 : vector<8x128xf32>, i32 -> vector<8x128xf32>
    %cst_11 = arith.constant 0.000000e+00 : f32
    %107 = vector.broadcast %cst_11 : f32 to vector<8x128xf32>
    %108 = arith.select %4, %106, %107 : vector<8x128xi1>, vector<8x128xf32>
    %c3 = arith.constant 3 : index
    %109 = memref.load %arg3[%c3] : memref<96xf32, #tpu.memory_space<smem>>
    %110 = vector.broadcast %109 : f32 to vector<8x128xf32>
    %111 = arith.mulf %110, %105 : vector<8x128xf32>
    %c4 = arith.constant 4 : index
    %112 = memref.load %arg3[%c4] : memref<96xf32, #tpu.memory_space<smem>>
    %113 = vector.broadcast %112 : f32 to vector<8x128xf32>
    %114 = arith.mulf %113, %102 : vector<8x128xf32>
    %115 = arith.addf %111, %114 : vector<8x128xf32>
    %c5 = arith.constant 5 : index
    %116 = memref.load %arg3[%c5] : memref<96xf32, #tpu.memory_space<smem>>
    %117 = vector.broadcast %116 : f32 to vector<8x128xf32>
    %118 = arith.mulf %117, %108 : vector<8x128xf32>
    %119 = arith.addf %115, %118 : vector<8x128xf32>
    %120 = arith.addf %23, %119 : vector<8x128xf32>
    %c15 = arith.constant 15 : index
    %121 = memref.load %arg3[%c15] : memref<96xf32, #tpu.memory_space<smem>>
    %122 = vector.broadcast %121 : f32 to vector<8x128xf32>
    %123 = arith.mulf %122, %105 : vector<8x128xf32>
    %c16 = arith.constant 16 : index
    %124 = memref.load %arg3[%c16] : memref<96xf32, #tpu.memory_space<smem>>
    %125 = vector.broadcast %124 : f32 to vector<8x128xf32>
    %126 = arith.mulf %125, %102 : vector<8x128xf32>
    %127 = arith.addf %123, %126 : vector<8x128xf32>
    %c17 = arith.constant 17 : index
    %128 = memref.load %arg3[%c17] : memref<96xf32, #tpu.memory_space<smem>>
    %129 = vector.broadcast %128 : f32 to vector<8x128xf32>
    %130 = arith.mulf %129, %108 : vector<8x128xf32>
    %131 = arith.addf %127, %130 : vector<8x128xf32>
    %132 = arith.addf %34, %131 : vector<8x128xf32>
    %c27 = arith.constant 27 : index
    %133 = memref.load %arg3[%c27] : memref<96xf32, #tpu.memory_space<smem>>
    %134 = vector.broadcast %133 : f32 to vector<8x128xf32>
    %135 = arith.mulf %134, %105 : vector<8x128xf32>
    %c28 = arith.constant 28 : index
    %136 = memref.load %arg3[%c28] : memref<96xf32, #tpu.memory_space<smem>>
    %137 = vector.broadcast %136 : f32 to vector<8x128xf32>
    %138 = arith.mulf %137, %102 : vector<8x128xf32>
    %139 = arith.addf %135, %138 : vector<8x128xf32>
    %c29 = arith.constant 29 : index
    %140 = memref.load %arg3[%c29] : memref<96xf32, #tpu.memory_space<smem>>
    %141 = vector.broadcast %140 : f32 to vector<8x128xf32>
    %142 = arith.mulf %141, %108 : vector<8x128xf32>
    %143 = arith.addf %139, %142 : vector<8x128xf32>
    %144 = arith.addf %45, %143 : vector<8x128xf32>
    %c39 = arith.constant 39 : index
    %145 = memref.load %arg3[%c39] : memref<96xf32, #tpu.memory_space<smem>>
    %146 = vector.broadcast %145 : f32 to vector<8x128xf32>
    %147 = arith.mulf %146, %105 : vector<8x128xf32>
    %c40 = arith.constant 40 : index
    %148 = memref.load %arg3[%c40] : memref<96xf32, #tpu.memory_space<smem>>
    %149 = vector.broadcast %148 : f32 to vector<8x128xf32>
    %150 = arith.mulf %149, %102 : vector<8x128xf32>
    %151 = arith.addf %147, %150 : vector<8x128xf32>
    %c41 = arith.constant 41 : index
    %152 = memref.load %arg3[%c41] : memref<96xf32, #tpu.memory_space<smem>>
    %153 = vector.broadcast %152 : f32 to vector<8x128xf32>
    %154 = arith.mulf %153, %108 : vector<8x128xf32>
    %155 = arith.addf %151, %154 : vector<8x128xf32>
    %156 = arith.addf %56, %155 : vector<8x128xf32>
    %c51 = arith.constant 51 : index
    %157 = memref.load %arg3[%c51] : memref<96xf32, #tpu.memory_space<smem>>
    %158 = vector.broadcast %157 : f32 to vector<8x128xf32>
    %159 = arith.mulf %158, %105 : vector<8x128xf32>
    %c52 = arith.constant 52 : index
    %160 = memref.load %arg3[%c52] : memref<96xf32, #tpu.memory_space<smem>>
    %161 = vector.broadcast %160 : f32 to vector<8x128xf32>
    %162 = arith.mulf %161, %102 : vector<8x128xf32>
    %163 = arith.addf %159, %162 : vector<8x128xf32>
    %c53 = arith.constant 53 : index
    %164 = memref.load %arg3[%c53] : memref<96xf32, #tpu.memory_space<smem>>
    %165 = vector.broadcast %164 : f32 to vector<8x128xf32>
    %166 = arith.mulf %165, %108 : vector<8x128xf32>
    %167 = arith.addf %163, %166 : vector<8x128xf32>
    %168 = arith.addf %67, %167 : vector<8x128xf32>
    %c63 = arith.constant 63 : index
    %169 = memref.load %arg3[%c63] : memref<96xf32, #tpu.memory_space<smem>>
    %170 = vector.broadcast %169 : f32 to vector<8x128xf32>
    %171 = arith.mulf %170, %105 : vector<8x128xf32>
    %c64 = arith.constant 64 : index
    %172 = memref.load %arg3[%c64] : memref<96xf32, #tpu.memory_space<smem>>
    %173 = vector.broadcast %172 : f32 to vector<8x128xf32>
    %174 = arith.mulf %173, %102 : vector<8x128xf32>
    %175 = arith.addf %171, %174 : vector<8x128xf32>
    %c65 = arith.constant 65 : index
    %176 = memref.load %arg3[%c65] : memref<96xf32, #tpu.memory_space<smem>>
    %177 = vector.broadcast %176 : f32 to vector<8x128xf32>
    %178 = arith.mulf %177, %108 : vector<8x128xf32>
    %179 = arith.addf %175, %178 : vector<8x128xf32>
    %180 = arith.addf %78, %179 : vector<8x128xf32>
    %c75 = arith.constant 75 : index
    %181 = memref.load %arg3[%c75] : memref<96xf32, #tpu.memory_space<smem>>
    %182 = vector.broadcast %181 : f32 to vector<8x128xf32>
    %183 = arith.mulf %182, %105 : vector<8x128xf32>
    %c76 = arith.constant 76 : index
    %184 = memref.load %arg3[%c76] : memref<96xf32, #tpu.memory_space<smem>>
    %185 = vector.broadcast %184 : f32 to vector<8x128xf32>
    %186 = arith.mulf %185, %102 : vector<8x128xf32>
    %187 = arith.addf %183, %186 : vector<8x128xf32>
    %c77 = arith.constant 77 : index
    %188 = memref.load %arg3[%c77] : memref<96xf32, #tpu.memory_space<smem>>
    %189 = vector.broadcast %188 : f32 to vector<8x128xf32>
    %190 = arith.mulf %189, %108 : vector<8x128xf32>
    %191 = arith.addf %187, %190 : vector<8x128xf32>
    %192 = arith.addf %89, %191 : vector<8x128xf32>
    %c87 = arith.constant 87 : index
    %193 = memref.load %arg3[%c87] : memref<96xf32, #tpu.memory_space<smem>>
    %194 = vector.broadcast %193 : f32 to vector<8x128xf32>
    %195 = arith.mulf %194, %105 : vector<8x128xf32>
    %c88 = arith.constant 88 : index
    %196 = memref.load %arg3[%c88] : memref<96xf32, #tpu.memory_space<smem>>
    %197 = vector.broadcast %196 : f32 to vector<8x128xf32>
    %198 = arith.mulf %197, %102 : vector<8x128xf32>
    %199 = arith.addf %195, %198 : vector<8x128xf32>
    %c89 = arith.constant 89 : index
    %200 = memref.load %arg3[%c89] : memref<96xf32, #tpu.memory_space<smem>>
    %201 = vector.broadcast %200 : f32 to vector<8x128xf32>
    %202 = arith.mulf %201, %108 : vector<8x128xf32>
    %203 = arith.addf %199, %202 : vector<8x128xf32>
    %204 = arith.addf %100, %203 : vector<8x128xf32>
    %c2_12 = arith.constant 2 : index
    %c0_13 = arith.constant 0 : index
    %c0_14 = arith.constant 0 : index
    %205 = vector.load %arg1[%c2_12, %c0_13, %c0_14] : memref<4x8x128xf32, #tpu.memory_space<vmem>>, vector<1x8x128xf32>
    %206 = vector.shape_cast %205 : vector<1x8x128xf32> to vector<8x128xf32>
    %c1_i32_15 = arith.constant 1 : i32
    %207 = tpu.dynamic_rotate %206 by %c1_i32_15 dim 1 : vector<8x128xf32>, i32 -> vector<8x128xf32>
    %cst_16 = arith.constant 0.000000e+00 : f32
    %208 = vector.broadcast %cst_16 : f32 to vector<8x128xf32>
    %209 = arith.select %2, %207, %208 : vector<8x128xi1>, vector<8x128xf32>
    %c127_i32_17 = arith.constant 127 : i32
    %210 = tpu.dynamic_rotate %206 by %c127_i32_17 dim 1 : vector<8x128xf32>, i32 -> vector<8x128xf32>
    %cst_18 = arith.constant 0.000000e+00 : f32
    %211 = vector.broadcast %cst_18 : f32 to vector<8x128xf32>
    %212 = arith.select %4, %210, %211 : vector<8x128xi1>, vector<8x128xf32>
    %c6 = arith.constant 6 : index
    %213 = memref.load %arg3[%c6] : memref<96xf32, #tpu.memory_space<smem>>
    %214 = vector.broadcast %213 : f32 to vector<8x128xf32>
    %215 = arith.mulf %214, %209 : vector<8x128xf32>
    %c7 = arith.constant 7 : index
    %216 = memref.load %arg3[%c7] : memref<96xf32, #tpu.memory_space<smem>>
    %217 = vector.broadcast %216 : f32 to vector<8x128xf32>
    %218 = arith.mulf %217, %206 : vector<8x128xf32>
    %219 = arith.addf %215, %218 : vector<8x128xf32>
    %c8 = arith.constant 8 : index
    %220 = memref.load %arg3[%c8] : memref<96xf32, #tpu.memory_space<smem>>
    %221 = vector.broadcast %220 : f32 to vector<8x128xf32>
    %222 = arith.mulf %221, %212 : vector<8x128xf32>
    %223 = arith.addf %219, %222 : vector<8x128xf32>
    %224 = arith.addf %120, %223 : vector<8x128xf32>
    %c18 = arith.constant 18 : index
    %225 = memref.load %arg3[%c18] : memref<96xf32, #tpu.memory_space<smem>>
    %226 = vector.broadcast %225 : f32 to vector<8x128xf32>
    %227 = arith.mulf %226, %209 : vector<8x128xf32>
    %c19 = arith.constant 19 : index
    %228 = memref.load %arg3[%c19] : memref<96xf32, #tpu.memory_space<smem>>
    %229 = vector.broadcast %228 : f32 to vector<8x128xf32>
    %230 = arith.mulf %229, %206 : vector<8x128xf32>
    %231 = arith.addf %227, %230 : vector<8x128xf32>
    %c20 = arith.constant 20 : index
    %232 = memref.load %arg3[%c20] : memref<96xf32, #tpu.memory_space<smem>>
    %233 = vector.broadcast %232 : f32 to vector<8x128xf32>
    %234 = arith.mulf %233, %212 : vector<8x128xf32>
    %235 = arith.addf %231, %234 : vector<8x128xf32>
    %236 = arith.addf %132, %235 : vector<8x128xf32>
    %c30 = arith.constant 30 : index
    %237 = memref.load %arg3[%c30] : memref<96xf32, #tpu.memory_space<smem>>
    %238 = vector.broadcast %237 : f32 to vector<8x128xf32>
    %239 = arith.mulf %238, %209 : vector<8x128xf32>
    %c31 = arith.constant 31 : index
    %240 = memref.load %arg3[%c31] : memref<96xf32, #tpu.memory_space<smem>>
    %241 = vector.broadcast %240 : f32 to vector<8x128xf32>
    %242 = arith.mulf %241, %206 : vector<8x128xf32>
    %243 = arith.addf %239, %242 : vector<8x128xf32>
    %c32 = arith.constant 32 : index
    %244 = memref.load %arg3[%c32] : memref<96xf32, #tpu.memory_space<smem>>
    %245 = vector.broadcast %244 : f32 to vector<8x128xf32>
    %246 = arith.mulf %245, %212 : vector<8x128xf32>
    %247 = arith.addf %243, %246 : vector<8x128xf32>
    %248 = arith.addf %144, %247 : vector<8x128xf32>
    %c42 = arith.constant 42 : index
    %249 = memref.load %arg3[%c42] : memref<96xf32, #tpu.memory_space<smem>>
    %250 = vector.broadcast %249 : f32 to vector<8x128xf32>
    %251 = arith.mulf %250, %209 : vector<8x128xf32>
    %c43 = arith.constant 43 : index
    %252 = memref.load %arg3[%c43] : memref<96xf32, #tpu.memory_space<smem>>
    %253 = vector.broadcast %252 : f32 to vector<8x128xf32>
    %254 = arith.mulf %253, %206 : vector<8x128xf32>
    %255 = arith.addf %251, %254 : vector<8x128xf32>
    %c44 = arith.constant 44 : index
    %256 = memref.load %arg3[%c44] : memref<96xf32, #tpu.memory_space<smem>>
    %257 = vector.broadcast %256 : f32 to vector<8x128xf32>
    %258 = arith.mulf %257, %212 : vector<8x128xf32>
    %259 = arith.addf %255, %258 : vector<8x128xf32>
    %260 = arith.addf %156, %259 : vector<8x128xf32>
    %c54 = arith.constant 54 : index
    %261 = memref.load %arg3[%c54] : memref<96xf32, #tpu.memory_space<smem>>
    %262 = vector.broadcast %261 : f32 to vector<8x128xf32>
    %263 = arith.mulf %262, %209 : vector<8x128xf32>
    %c55 = arith.constant 55 : index
    %264 = memref.load %arg3[%c55] : memref<96xf32, #tpu.memory_space<smem>>
    %265 = vector.broadcast %264 : f32 to vector<8x128xf32>
    %266 = arith.mulf %265, %206 : vector<8x128xf32>
    %267 = arith.addf %263, %266 : vector<8x128xf32>
    %c56 = arith.constant 56 : index
    %268 = memref.load %arg3[%c56] : memref<96xf32, #tpu.memory_space<smem>>
    %269 = vector.broadcast %268 : f32 to vector<8x128xf32>
    %270 = arith.mulf %269, %212 : vector<8x128xf32>
    %271 = arith.addf %267, %270 : vector<8x128xf32>
    %272 = arith.addf %168, %271 : vector<8x128xf32>
    %c66 = arith.constant 66 : index
    %273 = memref.load %arg3[%c66] : memref<96xf32, #tpu.memory_space<smem>>
    %274 = vector.broadcast %273 : f32 to vector<8x128xf32>
    %275 = arith.mulf %274, %209 : vector<8x128xf32>
    %c67 = arith.constant 67 : index
    %276 = memref.load %arg3[%c67] : memref<96xf32, #tpu.memory_space<smem>>
    %277 = vector.broadcast %276 : f32 to vector<8x128xf32>
    %278 = arith.mulf %277, %206 : vector<8x128xf32>
    %279 = arith.addf %275, %278 : vector<8x128xf32>
    %c68 = arith.constant 68 : index
    %280 = memref.load %arg3[%c68] : memref<96xf32, #tpu.memory_space<smem>>
    %281 = vector.broadcast %280 : f32 to vector<8x128xf32>
    %282 = arith.mulf %281, %212 : vector<8x128xf32>
    %283 = arith.addf %279, %282 : vector<8x128xf32>
    %284 = arith.addf %180, %283 : vector<8x128xf32>
    %c78 = arith.constant 78 : index
    %285 = memref.load %arg3[%c78] : memref<96xf32, #tpu.memory_space<smem>>
    %286 = vector.broadcast %285 : f32 to vector<8x128xf32>
    %287 = arith.mulf %286, %209 : vector<8x128xf32>
    %c79 = arith.constant 79 : index
    %288 = memref.load %arg3[%c79] : memref<96xf32, #tpu.memory_space<smem>>
    %289 = vector.broadcast %288 : f32 to vector<8x128xf32>
    %290 = arith.mulf %289, %206 : vector<8x128xf32>
    %291 = arith.addf %287, %290 : vector<8x128xf32>
    %c80 = arith.constant 80 : index
    %292 = memref.load %arg3[%c80] : memref<96xf32, #tpu.memory_space<smem>>
    %293 = vector.broadcast %292 : f32 to vector<8x128xf32>
    %294 = arith.mulf %293, %212 : vector<8x128xf32>
    %295 = arith.addf %291, %294 : vector<8x128xf32>
    %296 = arith.addf %192, %295 : vector<8x128xf32>
    %c90 = arith.constant 90 : index
    %297 = memref.load %arg3[%c90] : memref<96xf32, #tpu.memory_space<smem>>
    %298 = vector.broadcast %297 : f32 to vector<8x128xf32>
    %299 = arith.mulf %298, %209 : vector<8x128xf32>
    %c91 = arith.constant 91 : index
    %300 = memref.load %arg3[%c91] : memref<96xf32, #tpu.memory_space<smem>>
    %301 = vector.broadcast %300 : f32 to vector<8x128xf32>
    %302 = arith.mulf %301, %206 : vector<8x128xf32>
    %303 = arith.addf %299, %302 : vector<8x128xf32>
    %c92 = arith.constant 92 : index
    %304 = memref.load %arg3[%c92] : memref<96xf32, #tpu.memory_space<smem>>
    %305 = vector.broadcast %304 : f32 to vector<8x128xf32>
    %306 = arith.mulf %305, %212 : vector<8x128xf32>
    %307 = arith.addf %303, %306 : vector<8x128xf32>
    %308 = arith.addf %204, %307 : vector<8x128xf32>
    %c3_19 = arith.constant 3 : index
    %c0_20 = arith.constant 0 : index
    %c0_21 = arith.constant 0 : index
    %309 = vector.load %arg1[%c3_19, %c0_20, %c0_21] : memref<4x8x128xf32, #tpu.memory_space<vmem>>, vector<1x8x128xf32>
    %310 = vector.shape_cast %309 : vector<1x8x128xf32> to vector<8x128xf32>
    %c1_i32_22 = arith.constant 1 : i32
    %311 = tpu.dynamic_rotate %310 by %c1_i32_22 dim 1 : vector<8x128xf32>, i32 -> vector<8x128xf32>
    %cst_23 = arith.constant 0.000000e+00 : f32
    %312 = vector.broadcast %cst_23 : f32 to vector<8x128xf32>
    %313 = arith.select %2, %311, %312 : vector<8x128xi1>, vector<8x128xf32>
    %c127_i32_24 = arith.constant 127 : i32
    %314 = tpu.dynamic_rotate %310 by %c127_i32_24 dim 1 : vector<8x128xf32>, i32 -> vector<8x128xf32>
    %cst_25 = arith.constant 0.000000e+00 : f32
    %315 = vector.broadcast %cst_25 : f32 to vector<8x128xf32>
    %316 = arith.select %4, %314, %315 : vector<8x128xi1>, vector<8x128xf32>
    %c9 = arith.constant 9 : index
    %317 = memref.load %arg3[%c9] : memref<96xf32, #tpu.memory_space<smem>>
    %318 = vector.broadcast %317 : f32 to vector<8x128xf32>
    %319 = arith.mulf %318, %313 : vector<8x128xf32>
    %c10 = arith.constant 10 : index
    %320 = memref.load %arg3[%c10] : memref<96xf32, #tpu.memory_space<smem>>
    %321 = vector.broadcast %320 : f32 to vector<8x128xf32>
    %322 = arith.mulf %321, %310 : vector<8x128xf32>
    %323 = arith.addf %319, %322 : vector<8x128xf32>
    %c11 = arith.constant 11 : index
    %324 = memref.load %arg3[%c11] : memref<96xf32, #tpu.memory_space<smem>>
    %325 = vector.broadcast %324 : f32 to vector<8x128xf32>
    %326 = arith.mulf %325, %316 : vector<8x128xf32>
    %327 = arith.addf %323, %326 : vector<8x128xf32>
    %328 = arith.addf %224, %327 : vector<8x128xf32>
    %c21 = arith.constant 21 : index
    %329 = memref.load %arg3[%c21] : memref<96xf32, #tpu.memory_space<smem>>
    %330 = vector.broadcast %329 : f32 to vector<8x128xf32>
    %331 = arith.mulf %330, %313 : vector<8x128xf32>
    %c22 = arith.constant 22 : index
    %332 = memref.load %arg3[%c22] : memref<96xf32, #tpu.memory_space<smem>>
    %333 = vector.broadcast %332 : f32 to vector<8x128xf32>
    %334 = arith.mulf %333, %310 : vector<8x128xf32>
    %335 = arith.addf %331, %334 : vector<8x128xf32>
    %c23 = arith.constant 23 : index
    %336 = memref.load %arg3[%c23] : memref<96xf32, #tpu.memory_space<smem>>
    %337 = vector.broadcast %336 : f32 to vector<8x128xf32>
    %338 = arith.mulf %337, %316 : vector<8x128xf32>
    %339 = arith.addf %335, %338 : vector<8x128xf32>
    %340 = arith.addf %236, %339 : vector<8x128xf32>
    %c33 = arith.constant 33 : index
    %341 = memref.load %arg3[%c33] : memref<96xf32, #tpu.memory_space<smem>>
    %342 = vector.broadcast %341 : f32 to vector<8x128xf32>
    %343 = arith.mulf %342, %313 : vector<8x128xf32>
    %c34 = arith.constant 34 : index
    %344 = memref.load %arg3[%c34] : memref<96xf32, #tpu.memory_space<smem>>
    %345 = vector.broadcast %344 : f32 to vector<8x128xf32>
    %346 = arith.mulf %345, %310 : vector<8x128xf32>
    %347 = arith.addf %343, %346 : vector<8x128xf32>
    %c35 = arith.constant 35 : index
    %348 = memref.load %arg3[%c35] : memref<96xf32, #tpu.memory_space<smem>>
    %349 = vector.broadcast %348 : f32 to vector<8x128xf32>
    %350 = arith.mulf %349, %316 : vector<8x128xf32>
    %351 = arith.addf %347, %350 : vector<8x128xf32>
    %352 = arith.addf %248, %351 : vector<8x128xf32>
    %c45 = arith.constant 45 : index
    %353 = memref.load %arg3[%c45] : memref<96xf32, #tpu.memory_space<smem>>
    %354 = vector.broadcast %353 : f32 to vector<8x128xf32>
    %355 = arith.mulf %354, %313 : vector<8x128xf32>
    %c46 = arith.constant 46 : index
    %356 = memref.load %arg3[%c46] : memref<96xf32, #tpu.memory_space<smem>>
    %357 = vector.broadcast %356 : f32 to vector<8x128xf32>
    %358 = arith.mulf %357, %310 : vector<8x128xf32>
    %359 = arith.addf %355, %358 : vector<8x128xf32>
    %c47 = arith.constant 47 : index
    %360 = memref.load %arg3[%c47] : memref<96xf32, #tpu.memory_space<smem>>
    %361 = vector.broadcast %360 : f32 to vector<8x128xf32>
    %362 = arith.mulf %361, %316 : vector<8x128xf32>
    %363 = arith.addf %359, %362 : vector<8x128xf32>
    %364 = arith.addf %260, %363 : vector<8x128xf32>
    %c57 = arith.constant 57 : index
    %365 = memref.load %arg3[%c57] : memref<96xf32, #tpu.memory_space<smem>>
    %366 = vector.broadcast %365 : f32 to vector<8x128xf32>
    %367 = arith.mulf %366, %313 : vector<8x128xf32>
    %c58 = arith.constant 58 : index
    %368 = memref.load %arg3[%c58] : memref<96xf32, #tpu.memory_space<smem>>
    %369 = vector.broadcast %368 : f32 to vector<8x128xf32>
    %370 = arith.mulf %369, %310 : vector<8x128xf32>
    %371 = arith.addf %367, %370 : vector<8x128xf32>
    %c59 = arith.constant 59 : index
    %372 = memref.load %arg3[%c59] : memref<96xf32, #tpu.memory_space<smem>>
    %373 = vector.broadcast %372 : f32 to vector<8x128xf32>
    %374 = arith.mulf %373, %316 : vector<8x128xf32>
    %375 = arith.addf %371, %374 : vector<8x128xf32>
    %376 = arith.addf %272, %375 : vector<8x128xf32>
    %c69 = arith.constant 69 : index
    %377 = memref.load %arg3[%c69] : memref<96xf32, #tpu.memory_space<smem>>
    %378 = vector.broadcast %377 : f32 to vector<8x128xf32>
    %379 = arith.mulf %378, %313 : vector<8x128xf32>
    %c70 = arith.constant 70 : index
    %380 = memref.load %arg3[%c70] : memref<96xf32, #tpu.memory_space<smem>>
    %381 = vector.broadcast %380 : f32 to vector<8x128xf32>
    %382 = arith.mulf %381, %310 : vector<8x128xf32>
    %383 = arith.addf %379, %382 : vector<8x128xf32>
    %c71 = arith.constant 71 : index
    %384 = memref.load %arg3[%c71] : memref<96xf32, #tpu.memory_space<smem>>
    %385 = vector.broadcast %384 : f32 to vector<8x128xf32>
    %386 = arith.mulf %385, %316 : vector<8x128xf32>
    %387 = arith.addf %383, %386 : vector<8x128xf32>
    %388 = arith.addf %284, %387 : vector<8x128xf32>
    %c81 = arith.constant 81 : index
    %389 = memref.load %arg3[%c81] : memref<96xf32, #tpu.memory_space<smem>>
    %390 = vector.broadcast %389 : f32 to vector<8x128xf32>
    %391 = arith.mulf %390, %313 : vector<8x128xf32>
    %c82 = arith.constant 82 : index
    %392 = memref.load %arg3[%c82] : memref<96xf32, #tpu.memory_space<smem>>
    %393 = vector.broadcast %392 : f32 to vector<8x128xf32>
    %394 = arith.mulf %393, %310 : vector<8x128xf32>
    %395 = arith.addf %391, %394 : vector<8x128xf32>
    %c83 = arith.constant 83 : index
    %396 = memref.load %arg3[%c83] : memref<96xf32, #tpu.memory_space<smem>>
    %397 = vector.broadcast %396 : f32 to vector<8x128xf32>
    %398 = arith.mulf %397, %316 : vector<8x128xf32>
    %399 = arith.addf %395, %398 : vector<8x128xf32>
    %400 = arith.addf %296, %399 : vector<8x128xf32>
    %c93 = arith.constant 93 : index
    %401 = memref.load %arg3[%c93] : memref<96xf32, #tpu.memory_space<smem>>
    %402 = vector.broadcast %401 : f32 to vector<8x128xf32>
    %403 = arith.mulf %402, %313 : vector<8x128xf32>
    %c94 = arith.constant 94 : index
    %404 = memref.load %arg3[%c94] : memref<96xf32, #tpu.memory_space<smem>>
    %405 = vector.broadcast %404 : f32 to vector<8x128xf32>
    %406 = arith.mulf %405, %310 : vector<8x128xf32>
    %407 = arith.addf %403, %406 : vector<8x128xf32>
    %c95 = arith.constant 95 : index
    %408 = memref.load %arg3[%c95] : memref<96xf32, #tpu.memory_space<smem>>
    %409 = vector.broadcast %408 : f32 to vector<8x128xf32>
    %410 = arith.mulf %409, %316 : vector<8x128xf32>
    %411 = arith.addf %407, %410 : vector<8x128xf32>
    %412 = arith.addf %308, %411 : vector<8x128xf32>
    %c0_26 = arith.constant 0 : index
    %c0_27 = arith.constant 0 : index
    %413 = vector.load %arg2[%c0_26, %c0_27] : memref<8x8xf32, #tpu.memory_space<vmem>>, vector<8x1xf32>
    %414 = vector.shape_cast %413 : vector<8x1xf32> to vector<8x1xf32>
    %415 = vector.broadcast %414 : vector<8x1xf32> to vector<8x128xf32>
    %416 = arith.addf %328, %415 : vector<8x128xf32>
    %417 = arith.negf %416 : vector<8x128xf32>
    %418 = math.exp %417 : vector<8x128xf32>
    %cst_28 = arith.constant 1.000000e+00 : f32
    %419 = vector.broadcast %cst_28 : f32 to vector<8x128xf32>
    %420 = arith.addf %419, %418 : vector<8x128xf32>
    %421 = arith.divf %419, %420 : vector<8x128xf32>
    %422 = arith.mulf %416, %421 : vector<8x128xf32>
    %c0_29 = arith.constant 0 : index
    %c1_30 = arith.constant 1 : index
    %423 = vector.load %arg2[%c0_29, %c1_30] : memref<8x8xf32, #tpu.memory_space<vmem>>, vector<8x1xf32>
    %424 = vector.shape_cast %423 : vector<8x1xf32> to vector<8x1xf32>
    %425 = vector.broadcast %424 : vector<8x1xf32> to vector<8x128xf32>
    %426 = arith.addf %340, %425 : vector<8x128xf32>
    %427 = arith.negf %426 : vector<8x128xf32>
    %428 = math.exp %427 : vector<8x128xf32>
    %cst_31 = arith.constant 1.000000e+00 : f32
    %429 = vector.broadcast %cst_31 : f32 to vector<8x128xf32>
    %430 = arith.addf %429, %428 : vector<8x128xf32>
    %431 = arith.divf %429, %430 : vector<8x128xf32>
    %432 = arith.mulf %426, %431 : vector<8x128xf32>
    %c0_32 = arith.constant 0 : index
    %c2_33 = arith.constant 2 : index
    %433 = vector.load %arg2[%c0_32, %c2_33] : memref<8x8xf32, #tpu.memory_space<vmem>>, vector<8x1xf32>
    %434 = vector.shape_cast %433 : vector<8x1xf32> to vector<8x1xf32>
    %435 = vector.broadcast %434 : vector<8x1xf32> to vector<8x128xf32>
    %436 = arith.addf %352, %435 : vector<8x128xf32>
    %437 = arith.negf %436 : vector<8x128xf32>
    %438 = math.exp %437 : vector<8x128xf32>
    %cst_34 = arith.constant 1.000000e+00 : f32
    %439 = vector.broadcast %cst_34 : f32 to vector<8x128xf32>
    %440 = arith.addf %439, %438 : vector<8x128xf32>
    %441 = arith.divf %439, %440 : vector<8x128xf32>
    %442 = arith.mulf %436, %441 : vector<8x128xf32>
    %c0_35 = arith.constant 0 : index
    %c3_36 = arith.constant 3 : index
    %443 = vector.load %arg2[%c0_35, %c3_36] : memref<8x8xf32, #tpu.memory_space<vmem>>, vector<8x1xf32>
    %444 = vector.shape_cast %443 : vector<8x1xf32> to vector<8x1xf32>
    %445 = vector.broadcast %444 : vector<8x1xf32> to vector<8x128xf32>
    %446 = arith.addf %364, %445 : vector<8x128xf32>
    %447 = arith.negf %446 : vector<8x128xf32>
    %448 = math.exp %447 : vector<8x128xf32>
    %cst_37 = arith.constant 1.000000e+00 : f32
    %449 = vector.broadcast %cst_37 : f32 to vector<8x128xf32>
    %450 = arith.addf %449, %448 : vector<8x128xf32>
    %451 = arith.divf %449, %450 : vector<8x128xf32>
    %452 = arith.mulf %446, %451 : vector<8x128xf32>
    %c0_38 = arith.constant 0 : index
    %c4_39 = arith.constant 4 : index
    %453 = vector.load %arg2[%c0_38, %c4_39] : memref<8x8xf32, #tpu.memory_space<vmem>>, vector<8x1xf32>
    %454 = vector.shape_cast %453 : vector<8x1xf32> to vector<8x1xf32>
    %455 = vector.broadcast %454 : vector<8x1xf32> to vector<8x128xf32>
    %456 = arith.addf %376, %455 : vector<8x128xf32>
    %457 = arith.negf %456 : vector<8x128xf32>
    %458 = math.exp %457 : vector<8x128xf32>
    %cst_40 = arith.constant 1.000000e+00 : f32
    %459 = vector.broadcast %cst_40 : f32 to vector<8x128xf32>
    %460 = arith.addf %459, %458 : vector<8x128xf32>
    %461 = arith.divf %459, %460 : vector<8x128xf32>
    %462 = arith.mulf %456, %461 : vector<8x128xf32>
    %c0_41 = arith.constant 0 : index
    %c5_42 = arith.constant 5 : index
    %463 = vector.load %arg2[%c0_41, %c5_42] : memref<8x8xf32, #tpu.memory_space<vmem>>, vector<8x1xf32>
    %464 = vector.shape_cast %463 : vector<8x1xf32> to vector<8x1xf32>
    %465 = vector.broadcast %464 : vector<8x1xf32> to vector<8x128xf32>
    %466 = arith.addf %388, %465 : vector<8x128xf32>
    %467 = arith.negf %466 : vector<8x128xf32>
    %468 = math.exp %467 : vector<8x128xf32>
    %cst_43 = arith.constant 1.000000e+00 : f32
    %469 = vector.broadcast %cst_43 : f32 to vector<8x128xf32>
    %470 = arith.addf %469, %468 : vector<8x128xf32>
    %471 = arith.divf %469, %470 : vector<8x128xf32>
    %472 = arith.mulf %466, %471 : vector<8x128xf32>
    %c0_44 = arith.constant 0 : index
    %c6_45 = arith.constant 6 : index
    %473 = vector.load %arg2[%c0_44, %c6_45] : memref<8x8xf32, #tpu.memory_space<vmem>>, vector<8x1xf32>
    %474 = vector.shape_cast %473 : vector<8x1xf32> to vector<8x1xf32>
    %475 = vector.broadcast %474 : vector<8x1xf32> to vector<8x128xf32>
    %476 = arith.addf %400, %475 : vector<8x128xf32>
    %477 = arith.negf %476 : vector<8x128xf32>
    %478 = math.exp %477 : vector<8x128xf32>
    %cst_46 = arith.constant 1.000000e+00 : f32
    %479 = vector.broadcast %cst_46 : f32 to vector<8x128xf32>
    %480 = arith.addf %479, %478 : vector<8x128xf32>
    %481 = arith.divf %479, %480 : vector<8x128xf32>
    %482 = arith.mulf %476, %481 : vector<8x128xf32>
    %c0_47 = arith.constant 0 : index
    %c7_48 = arith.constant 7 : index
    %483 = vector.load %arg2[%c0_47, %c7_48] : memref<8x8xf32, #tpu.memory_space<vmem>>, vector<8x1xf32>
    %484 = vector.shape_cast %483 : vector<8x1xf32> to vector<8x1xf32>
    %485 = vector.broadcast %484 : vector<8x1xf32> to vector<8x128xf32>
    %486 = arith.addf %412, %485 : vector<8x128xf32>
    %487 = arith.negf %486 : vector<8x128xf32>
    %488 = math.exp %487 : vector<8x128xf32>
    %cst_49 = arith.constant 1.000000e+00 : f32
    %489 = vector.broadcast %cst_49 : f32 to vector<8x128xf32>
    %490 = arith.addf %489, %488 : vector<8x128xf32>
    %491 = arith.divf %489, %490 : vector<8x128xf32>
    %492 = arith.mulf %486, %491 : vector<8x128xf32>
    %c1_i32_50 = arith.constant 1 : i32
    %493 = tpu.dynamic_rotate %422 by %c1_i32_50 dim 1 : vector<8x128xf32>, i32 -> vector<8x128xf32>
    %cst_51 = arith.constant 0.000000e+00 : f32
    %494 = vector.broadcast %cst_51 : f32 to vector<8x128xf32>
    %495 = arith.select %2, %493, %494 : vector<8x128xi1>, vector<8x128xf32>
    %c127_i32_52 = arith.constant 127 : i32
    %496 = tpu.dynamic_rotate %422 by %c127_i32_52 dim 1 : vector<8x128xf32>, i32 -> vector<8x128xf32>
    %cst_53 = arith.constant 0.000000e+00 : f32
    %497 = vector.broadcast %cst_53 : f32 to vector<8x128xf32>
    %498 = arith.select %4, %496, %497 : vector<8x128xi1>, vector<8x128xf32>
    %c0_54 = arith.constant 0 : index
    %499 = memref.load %arg4[%c0_54] : memref<96xf32, #tpu.memory_space<smem>>
    %500 = vector.broadcast %499 : f32 to vector<8x128xf32>
    %501 = arith.mulf %500, %495 : vector<8x128xf32>
    %c1_55 = arith.constant 1 : index
    %502 = memref.load %arg4[%c1_55] : memref<96xf32, #tpu.memory_space<smem>>
    %503 = vector.broadcast %502 : f32 to vector<8x128xf32>
    %504 = arith.mulf %503, %422 : vector<8x128xf32>
    %505 = arith.addf %501, %504 : vector<8x128xf32>
    %c2_56 = arith.constant 2 : index
    %506 = memref.load %arg4[%c2_56] : memref<96xf32, #tpu.memory_space<smem>>
    %507 = vector.broadcast %506 : f32 to vector<8x128xf32>
    %508 = arith.mulf %507, %498 : vector<8x128xf32>
    %509 = arith.addf %505, %508 : vector<8x128xf32>
    %c24_57 = arith.constant 24 : index
    %510 = memref.load %arg4[%c24_57] : memref<96xf32, #tpu.memory_space<smem>>
    %511 = vector.broadcast %510 : f32 to vector<8x128xf32>
    %512 = arith.mulf %511, %495 : vector<8x128xf32>
    %c25_58 = arith.constant 25 : index
    %513 = memref.load %arg4[%c25_58] : memref<96xf32, #tpu.memory_space<smem>>
    %514 = vector.broadcast %513 : f32 to vector<8x128xf32>
    %515 = arith.mulf %514, %422 : vector<8x128xf32>
    %516 = arith.addf %512, %515 : vector<8x128xf32>
    %c26_59 = arith.constant 26 : index
    %517 = memref.load %arg4[%c26_59] : memref<96xf32, #tpu.memory_space<smem>>
    %518 = vector.broadcast %517 : f32 to vector<8x128xf32>
    %519 = arith.mulf %518, %498 : vector<8x128xf32>
    %520 = arith.addf %516, %519 : vector<8x128xf32>
    %c48_60 = arith.constant 48 : index
    %521 = memref.load %arg4[%c48_60] : memref<96xf32, #tpu.memory_space<smem>>
    %522 = vector.broadcast %521 : f32 to vector<8x128xf32>
    %523 = arith.mulf %522, %495 : vector<8x128xf32>
    %c49_61 = arith.constant 49 : index
    %524 = memref.load %arg4[%c49_61] : memref<96xf32, #tpu.memory_space<smem>>
    %525 = vector.broadcast %524 : f32 to vector<8x128xf32>
    %526 = arith.mulf %525, %422 : vector<8x128xf32>
    %527 = arith.addf %523, %526 : vector<8x128xf32>
    %c50_62 = arith.constant 50 : index
    %528 = memref.load %arg4[%c50_62] : memref<96xf32, #tpu.memory_space<smem>>
    %529 = vector.broadcast %528 : f32 to vector<8x128xf32>
    %530 = arith.mulf %529, %498 : vector<8x128xf32>
    %531 = arith.addf %527, %530 : vector<8x128xf32>
    %c72_63 = arith.constant 72 : index
    %532 = memref.load %arg4[%c72_63] : memref<96xf32, #tpu.memory_space<smem>>
    %533 = vector.broadcast %532 : f32 to vector<8x128xf32>
    %534 = arith.mulf %533, %495 : vector<8x128xf32>
    %c73_64 = arith.constant 73 : index
    %535 = memref.load %arg4[%c73_64] : memref<96xf32, #tpu.memory_space<smem>>
    %536 = vector.broadcast %535 : f32 to vector<8x128xf32>
    %537 = arith.mulf %536, %422 : vector<8x128xf32>
    %538 = arith.addf %534, %537 : vector<8x128xf32>
    %c74_65 = arith.constant 74 : index
    %539 = memref.load %arg4[%c74_65] : memref<96xf32, #tpu.memory_space<smem>>
    %540 = vector.broadcast %539 : f32 to vector<8x128xf32>
    %541 = arith.mulf %540, %498 : vector<8x128xf32>
    %542 = arith.addf %538, %541 : vector<8x128xf32>
    %c1_i32_66 = arith.constant 1 : i32
    %543 = tpu.dynamic_rotate %432 by %c1_i32_66 dim 1 : vector<8x128xf32>, i32 -> vector<8x128xf32>
    %cst_67 = arith.constant 0.000000e+00 : f32
    %544 = vector.broadcast %cst_67 : f32 to vector<8x128xf32>
    %545 = arith.select %2, %543, %544 : vector<8x128xi1>, vector<8x128xf32>
    %c127_i32_68 = arith.constant 127 : i32
    %546 = tpu.dynamic_rotate %432 by %c127_i32_68 dim 1 : vector<8x128xf32>, i32 -> vector<8x128xf32>
    %cst_69 = arith.constant 0.000000e+00 : f32
    %547 = vector.broadcast %cst_69 : f32 to vector<8x128xf32>
    %548 = arith.select %4, %546, %547 : vector<8x128xi1>, vector<8x128xf32>
    %c3_70 = arith.constant 3 : index
    %549 = memref.load %arg4[%c3_70] : memref<96xf32, #tpu.memory_space<smem>>
    %550 = vector.broadcast %549 : f32 to vector<8x128xf32>
    %551 = arith.mulf %550, %545 : vector<8x128xf32>
    %c4_71 = arith.constant 4 : index
    %552 = memref.load %arg4[%c4_71] : memref<96xf32, #tpu.memory_space<smem>>
    %553 = vector.broadcast %552 : f32 to vector<8x128xf32>
    %554 = arith.mulf %553, %432 : vector<8x128xf32>
    %555 = arith.addf %551, %554 : vector<8x128xf32>
    %c5_72 = arith.constant 5 : index
    %556 = memref.load %arg4[%c5_72] : memref<96xf32, #tpu.memory_space<smem>>
    %557 = vector.broadcast %556 : f32 to vector<8x128xf32>
    %558 = arith.mulf %557, %548 : vector<8x128xf32>
    %559 = arith.addf %555, %558 : vector<8x128xf32>
    %560 = arith.addf %509, %559 : vector<8x128xf32>
    %c27_73 = arith.constant 27 : index
    %561 = memref.load %arg4[%c27_73] : memref<96xf32, #tpu.memory_space<smem>>
    %562 = vector.broadcast %561 : f32 to vector<8x128xf32>
    %563 = arith.mulf %562, %545 : vector<8x128xf32>
    %c28_74 = arith.constant 28 : index
    %564 = memref.load %arg4[%c28_74] : memref<96xf32, #tpu.memory_space<smem>>
    %565 = vector.broadcast %564 : f32 to vector<8x128xf32>
    %566 = arith.mulf %565, %432 : vector<8x128xf32>
    %567 = arith.addf %563, %566 : vector<8x128xf32>
    %c29_75 = arith.constant 29 : index
    %568 = memref.load %arg4[%c29_75] : memref<96xf32, #tpu.memory_space<smem>>
    %569 = vector.broadcast %568 : f32 to vector<8x128xf32>
    %570 = arith.mulf %569, %548 : vector<8x128xf32>
    %571 = arith.addf %567, %570 : vector<8x128xf32>
    %572 = arith.addf %520, %571 : vector<8x128xf32>
    %c51_76 = arith.constant 51 : index
    %573 = memref.load %arg4[%c51_76] : memref<96xf32, #tpu.memory_space<smem>>
    %574 = vector.broadcast %573 : f32 to vector<8x128xf32>
    %575 = arith.mulf %574, %545 : vector<8x128xf32>
    %c52_77 = arith.constant 52 : index
    %576 = memref.load %arg4[%c52_77] : memref<96xf32, #tpu.memory_space<smem>>
    %577 = vector.broadcast %576 : f32 to vector<8x128xf32>
    %578 = arith.mulf %577, %432 : vector<8x128xf32>
    %579 = arith.addf %575, %578 : vector<8x128xf32>
    %c53_78 = arith.constant 53 : index
    %580 = memref.load %arg4[%c53_78] : memref<96xf32, #tpu.memory_space<smem>>
    %581 = vector.broadcast %580 : f32 to vector<8x128xf32>
    %582 = arith.mulf %581, %548 : vector<8x128xf32>
    %583 = arith.addf %579, %582 : vector<8x128xf32>
    %584 = arith.addf %531, %583 : vector<8x128xf32>
    %c75_79 = arith.constant 75 : index
    %585 = memref.load %arg4[%c75_79] : memref<96xf32, #tpu.memory_space<smem>>
    %586 = vector.broadcast %585 : f32 to vector<8x128xf32>
    %587 = arith.mulf %586, %545 : vector<8x128xf32>
    %c76_80 = arith.constant 76 : index
    %588 = memref.load %arg4[%c76_80] : memref<96xf32, #tpu.memory_space<smem>>
    %589 = vector.broadcast %588 : f32 to vector<8x128xf32>
    %590 = arith.mulf %589, %432 : vector<8x128xf32>
    %591 = arith.addf %587, %590 : vector<8x128xf32>
    %c77_81 = arith.constant 77 : index
    %592 = memref.load %arg4[%c77_81] : memref<96xf32, #tpu.memory_space<smem>>
    %593 = vector.broadcast %592 : f32 to vector<8x128xf32>
    %594 = arith.mulf %593, %548 : vector<8x128xf32>
    %595 = arith.addf %591, %594 : vector<8x128xf32>
    %596 = arith.addf %542, %595 : vector<8x128xf32>
    %c1_i32_82 = arith.constant 1 : i32
    %597 = tpu.dynamic_rotate %442 by %c1_i32_82 dim 1 : vector<8x128xf32>, i32 -> vector<8x128xf32>
    %cst_83 = arith.constant 0.000000e+00 : f32
    %598 = vector.broadcast %cst_83 : f32 to vector<8x128xf32>
    %599 = arith.select %2, %597, %598 : vector<8x128xi1>, vector<8x128xf32>
    %c127_i32_84 = arith.constant 127 : i32
    %600 = tpu.dynamic_rotate %442 by %c127_i32_84 dim 1 : vector<8x128xf32>, i32 -> vector<8x128xf32>
    %cst_85 = arith.constant 0.000000e+00 : f32
    %601 = vector.broadcast %cst_85 : f32 to vector<8x128xf32>
    %602 = arith.select %4, %600, %601 : vector<8x128xi1>, vector<8x128xf32>
    %c6_86 = arith.constant 6 : index
    %603 = memref.load %arg4[%c6_86] : memref<96xf32, #tpu.memory_space<smem>>
    %604 = vector.broadcast %603 : f32 to vector<8x128xf32>
    %605 = arith.mulf %604, %599 : vector<8x128xf32>
    %c7_87 = arith.constant 7 : index
    %606 = memref.load %arg4[%c7_87] : memref<96xf32, #tpu.memory_space<smem>>
    %607 = vector.broadcast %606 : f32 to vector<8x128xf32>
    %608 = arith.mulf %607, %442 : vector<8x128xf32>
    %609 = arith.addf %605, %608 : vector<8x128xf32>
    %c8_88 = arith.constant 8 : index
    %610 = memref.load %arg4[%c8_88] : memref<96xf32, #tpu.memory_space<smem>>
    %611 = vector.broadcast %610 : f32 to vector<8x128xf32>
    %612 = arith.mulf %611, %602 : vector<8x128xf32>
    %613 = arith.addf %609, %612 : vector<8x128xf32>
    %614 = arith.addf %560, %613 : vector<8x128xf32>
    %c30_89 = arith.constant 30 : index
    %615 = memref.load %arg4[%c30_89] : memref<96xf32, #tpu.memory_space<smem>>
    %616 = vector.broadcast %615 : f32 to vector<8x128xf32>
    %617 = arith.mulf %616, %599 : vector<8x128xf32>
    %c31_90 = arith.constant 31 : index
    %618 = memref.load %arg4[%c31_90] : memref<96xf32, #tpu.memory_space<smem>>
    %619 = vector.broadcast %618 : f32 to vector<8x128xf32>
    %620 = arith.mulf %619, %442 : vector<8x128xf32>
    %621 = arith.addf %617, %620 : vector<8x128xf32>
    %c32_91 = arith.constant 32 : index
    %622 = memref.load %arg4[%c32_91] : memref<96xf32, #tpu.memory_space<smem>>
    %623 = vector.broadcast %622 : f32 to vector<8x128xf32>
    %624 = arith.mulf %623, %602 : vector<8x128xf32>
    %625 = arith.addf %621, %624 : vector<8x128xf32>
    %626 = arith.addf %572, %625 : vector<8x128xf32>
    %c54_92 = arith.constant 54 : index
    %627 = memref.load %arg4[%c54_92] : memref<96xf32, #tpu.memory_space<smem>>
    %628 = vector.broadcast %627 : f32 to vector<8x128xf32>
    %629 = arith.mulf %628, %599 : vector<8x128xf32>
    %c55_93 = arith.constant 55 : index
    %630 = memref.load %arg4[%c55_93] : memref<96xf32, #tpu.memory_space<smem>>
    %631 = vector.broadcast %630 : f32 to vector<8x128xf32>
    %632 = arith.mulf %631, %442 : vector<8x128xf32>
    %633 = arith.addf %629, %632 : vector<8x128xf32>
    %c56_94 = arith.constant 56 : index
    %634 = memref.load %arg4[%c56_94] : memref<96xf32, #tpu.memory_space<smem>>
    %635 = vector.broadcast %634 : f32 to vector<8x128xf32>
    %636 = arith.mulf %635, %602 : vector<8x128xf32>
    %637 = arith.addf %633, %636 : vector<8x128xf32>
    %638 = arith.addf %584, %637 : vector<8x128xf32>
    %c78_95 = arith.constant 78 : index
    %639 = memref.load %arg4[%c78_95] : memref<96xf32, #tpu.memory_space<smem>>
    %640 = vector.broadcast %639 : f32 to vector<8x128xf32>
    %641 = arith.mulf %640, %599 : vector<8x128xf32>
    %c79_96 = arith.constant 79 : index
    %642 = memref.load %arg4[%c79_96] : memref<96xf32, #tpu.memory_space<smem>>
    %643 = vector.broadcast %642 : f32 to vector<8x128xf32>
    %644 = arith.mulf %643, %442 : vector<8x128xf32>
    %645 = arith.addf %641, %644 : vector<8x128xf32>
    %c80_97 = arith.constant 80 : index
    %646 = memref.load %arg4[%c80_97] : memref<96xf32, #tpu.memory_space<smem>>
    %647 = vector.broadcast %646 : f32 to vector<8x128xf32>
    %648 = arith.mulf %647, %602 : vector<8x128xf32>
    %649 = arith.addf %645, %648 : vector<8x128xf32>
    %650 = arith.addf %596, %649 : vector<8x128xf32>
    %c1_i32_98 = arith.constant 1 : i32
    %651 = tpu.dynamic_rotate %452 by %c1_i32_98 dim 1 : vector<8x128xf32>, i32 -> vector<8x128xf32>
    %cst_99 = arith.constant 0.000000e+00 : f32
    %652 = vector.broadcast %cst_99 : f32 to vector<8x128xf32>
    %653 = arith.select %2, %651, %652 : vector<8x128xi1>, vector<8x128xf32>
    %c127_i32_100 = arith.constant 127 : i32
    %654 = tpu.dynamic_rotate %452 by %c127_i32_100 dim 1 : vector<8x128xf32>, i32 -> vector<8x128xf32>
    %cst_101 = arith.constant 0.000000e+00 : f32
    %655 = vector.broadcast %cst_101 : f32 to vector<8x128xf32>
    %656 = arith.select %4, %654, %655 : vector<8x128xi1>, vector<8x128xf32>
    %c9_102 = arith.constant 9 : index
    %657 = memref.load %arg4[%c9_102] : memref<96xf32, #tpu.memory_space<smem>>
    %658 = vector.broadcast %657 : f32 to vector<8x128xf32>
    %659 = arith.mulf %658, %653 : vector<8x128xf32>
    %c10_103 = arith.constant 10 : index
    %660 = memref.load %arg4[%c10_103] : memref<96xf32, #tpu.memory_space<smem>>
    %661 = vector.broadcast %660 : f32 to vector<8x128xf32>
    %662 = arith.mulf %661, %452 : vector<8x128xf32>
    %663 = arith.addf %659, %662 : vector<8x128xf32>
    %c11_104 = arith.constant 11 : index
    %664 = memref.load %arg4[%c11_104] : memref<96xf32, #tpu.memory_space<smem>>
    %665 = vector.broadcast %664 : f32 to vector<8x128xf32>
    %666 = arith.mulf %665, %656 : vector<8x128xf32>
    %667 = arith.addf %663, %666 : vector<8x128xf32>
    %668 = arith.addf %614, %667 : vector<8x128xf32>
    %c33_105 = arith.constant 33 : index
    %669 = memref.load %arg4[%c33_105] : memref<96xf32, #tpu.memory_space<smem>>
    %670 = vector.broadcast %669 : f32 to vector<8x128xf32>
    %671 = arith.mulf %670, %653 : vector<8x128xf32>
    %c34_106 = arith.constant 34 : index
    %672 = memref.load %arg4[%c34_106] : memref<96xf32, #tpu.memory_space<smem>>
    %673 = vector.broadcast %672 : f32 to vector<8x128xf32>
    %674 = arith.mulf %673, %452 : vector<8x128xf32>
    %675 = arith.addf %671, %674 : vector<8x128xf32>
    %c35_107 = arith.constant 35 : index
    %676 = memref.load %arg4[%c35_107] : memref<96xf32, #tpu.memory_space<smem>>
    %677 = vector.broadcast %676 : f32 to vector<8x128xf32>
    %678 = arith.mulf %677, %656 : vector<8x128xf32>
    %679 = arith.addf %675, %678 : vector<8x128xf32>
    %680 = arith.addf %626, %679 : vector<8x128xf32>
    %c57_108 = arith.constant 57 : index
    %681 = memref.load %arg4[%c57_108] : memref<96xf32, #tpu.memory_space<smem>>
    %682 = vector.broadcast %681 : f32 to vector<8x128xf32>
    %683 = arith.mulf %682, %653 : vector<8x128xf32>
    %c58_109 = arith.constant 58 : index
    %684 = memref.load %arg4[%c58_109] : memref<96xf32, #tpu.memory_space<smem>>
    %685 = vector.broadcast %684 : f32 to vector<8x128xf32>
    %686 = arith.mulf %685, %452 : vector<8x128xf32>
    %687 = arith.addf %683, %686 : vector<8x128xf32>
    %c59_110 = arith.constant 59 : index
    %688 = memref.load %arg4[%c59_110] : memref<96xf32, #tpu.memory_space<smem>>
    %689 = vector.broadcast %688 : f32 to vector<8x128xf32>
    %690 = arith.mulf %689, %656 : vector<8x128xf32>
    %691 = arith.addf %687, %690 : vector<8x128xf32>
    %692 = arith.addf %638, %691 : vector<8x128xf32>
    %c81_111 = arith.constant 81 : index
    %693 = memref.load %arg4[%c81_111] : memref<96xf32, #tpu.memory_space<smem>>
    %694 = vector.broadcast %693 : f32 to vector<8x128xf32>
    %695 = arith.mulf %694, %653 : vector<8x128xf32>
    %c82_112 = arith.constant 82 : index
    %696 = memref.load %arg4[%c82_112] : memref<96xf32, #tpu.memory_space<smem>>
    %697 = vector.broadcast %696 : f32 to vector<8x128xf32>
    %698 = arith.mulf %697, %452 : vector<8x128xf32>
    %699 = arith.addf %695, %698 : vector<8x128xf32>
    %c83_113 = arith.constant 83 : index
    %700 = memref.load %arg4[%c83_113] : memref<96xf32, #tpu.memory_space<smem>>
    %701 = vector.broadcast %700 : f32 to vector<8x128xf32>
    %702 = arith.mulf %701, %656 : vector<8x128xf32>
    %703 = arith.addf %699, %702 : vector<8x128xf32>
    %704 = arith.addf %650, %703 : vector<8x128xf32>
    %c1_i32_114 = arith.constant 1 : i32
    %705 = tpu.dynamic_rotate %462 by %c1_i32_114 dim 1 : vector<8x128xf32>, i32 -> vector<8x128xf32>
    %cst_115 = arith.constant 0.000000e+00 : f32
    %706 = vector.broadcast %cst_115 : f32 to vector<8x128xf32>
    %707 = arith.select %2, %705, %706 : vector<8x128xi1>, vector<8x128xf32>
    %c127_i32_116 = arith.constant 127 : i32
    %708 = tpu.dynamic_rotate %462 by %c127_i32_116 dim 1 : vector<8x128xf32>, i32 -> vector<8x128xf32>
    %cst_117 = arith.constant 0.000000e+00 : f32
    %709 = vector.broadcast %cst_117 : f32 to vector<8x128xf32>
    %710 = arith.select %4, %708, %709 : vector<8x128xi1>, vector<8x128xf32>
    %c12_118 = arith.constant 12 : index
    %711 = memref.load %arg4[%c12_118] : memref<96xf32, #tpu.memory_space<smem>>
    %712 = vector.broadcast %711 : f32 to vector<8x128xf32>
    %713 = arith.mulf %712, %707 : vector<8x128xf32>
    %c13_119 = arith.constant 13 : index
    %714 = memref.load %arg4[%c13_119] : memref<96xf32, #tpu.memory_space<smem>>
    %715 = vector.broadcast %714 : f32 to vector<8x128xf32>
    %716 = arith.mulf %715, %462 : vector<8x128xf32>
    %717 = arith.addf %713, %716 : vector<8x128xf32>
    %c14_120 = arith.constant 14 : index
    %718 = memref.load %arg4[%c14_120] : memref<96xf32, #tpu.memory_space<smem>>
    %719 = vector.broadcast %718 : f32 to vector<8x128xf32>
    %720 = arith.mulf %719, %710 : vector<8x128xf32>
    %721 = arith.addf %717, %720 : vector<8x128xf32>
    %722 = arith.addf %668, %721 : vector<8x128xf32>
    %c36_121 = arith.constant 36 : index
    %723 = memref.load %arg4[%c36_121] : memref<96xf32, #tpu.memory_space<smem>>
    %724 = vector.broadcast %723 : f32 to vector<8x128xf32>
    %725 = arith.mulf %724, %707 : vector<8x128xf32>
    %c37_122 = arith.constant 37 : index
    %726 = memref.load %arg4[%c37_122] : memref<96xf32, #tpu.memory_space<smem>>
    %727 = vector.broadcast %726 : f32 to vector<8x128xf32>
    %728 = arith.mulf %727, %462 : vector<8x128xf32>
    %729 = arith.addf %725, %728 : vector<8x128xf32>
    %c38_123 = arith.constant 38 : index
    %730 = memref.load %arg4[%c38_123] : memref<96xf32, #tpu.memory_space<smem>>
    %731 = vector.broadcast %730 : f32 to vector<8x128xf32>
    %732 = arith.mulf %731, %710 : vector<8x128xf32>
    %733 = arith.addf %729, %732 : vector<8x128xf32>
    %734 = arith.addf %680, %733 : vector<8x128xf32>
    %c60_124 = arith.constant 60 : index
    %735 = memref.load %arg4[%c60_124] : memref<96xf32, #tpu.memory_space<smem>>
    %736 = vector.broadcast %735 : f32 to vector<8x128xf32>
    %737 = arith.mulf %736, %707 : vector<8x128xf32>
    %c61_125 = arith.constant 61 : index
    %738 = memref.load %arg4[%c61_125] : memref<96xf32, #tpu.memory_space<smem>>
    %739 = vector.broadcast %738 : f32 to vector<8x128xf32>
    %740 = arith.mulf %739, %462 : vector<8x128xf32>
    %741 = arith.addf %737, %740 : vector<8x128xf32>
    %c62_126 = arith.constant 62 : index
    %742 = memref.load %arg4[%c62_126] : memref<96xf32, #tpu.memory_space<smem>>
    %743 = vector.broadcast %742 : f32 to vector<8x128xf32>
    %744 = arith.mulf %743, %710 : vector<8x128xf32>
    %745 = arith.addf %741, %744 : vector<8x128xf32>
    %746 = arith.addf %692, %745 : vector<8x128xf32>
    %c84_127 = arith.constant 84 : index
    %747 = memref.load %arg4[%c84_127] : memref<96xf32, #tpu.memory_space<smem>>
    %748 = vector.broadcast %747 : f32 to vector<8x128xf32>
    %749 = arith.mulf %748, %707 : vector<8x128xf32>
    %c85_128 = arith.constant 85 : index
    %750 = memref.load %arg4[%c85_128] : memref<96xf32, #tpu.memory_space<smem>>
    %751 = vector.broadcast %750 : f32 to vector<8x128xf32>
    %752 = arith.mulf %751, %462 : vector<8x128xf32>
    %753 = arith.addf %749, %752 : vector<8x128xf32>
    %c86_129 = arith.constant 86 : index
    %754 = memref.load %arg4[%c86_129] : memref<96xf32, #tpu.memory_space<smem>>
    %755 = vector.broadcast %754 : f32 to vector<8x128xf32>
    %756 = arith.mulf %755, %710 : vector<8x128xf32>
    %757 = arith.addf %753, %756 : vector<8x128xf32>
    %758 = arith.addf %704, %757 : vector<8x128xf32>
    %c1_i32_130 = arith.constant 1 : i32
    %759 = tpu.dynamic_rotate %472 by %c1_i32_130 dim 1 : vector<8x128xf32>, i32 -> vector<8x128xf32>
    %cst_131 = arith.constant 0.000000e+00 : f32
    %760 = vector.broadcast %cst_131 : f32 to vector<8x128xf32>
    %761 = arith.select %2, %759, %760 : vector<8x128xi1>, vector<8x128xf32>
    %c127_i32_132 = arith.constant 127 : i32
    %762 = tpu.dynamic_rotate %472 by %c127_i32_132 dim 1 : vector<8x128xf32>, i32 -> vector<8x128xf32>
    %cst_133 = arith.constant 0.000000e+00 : f32
    %763 = vector.broadcast %cst_133 : f32 to vector<8x128xf32>
    %764 = arith.select %4, %762, %763 : vector<8x128xi1>, vector<8x128xf32>
    %c15_134 = arith.constant 15 : index
    %765 = memref.load %arg4[%c15_134] : memref<96xf32, #tpu.memory_space<smem>>
    %766 = vector.broadcast %765 : f32 to vector<8x128xf32>
    %767 = arith.mulf %766, %761 : vector<8x128xf32>
    %c16_135 = arith.constant 16 : index
    %768 = memref.load %arg4[%c16_135] : memref<96xf32, #tpu.memory_space<smem>>
    %769 = vector.broadcast %768 : f32 to vector<8x128xf32>
    %770 = arith.mulf %769, %472 : vector<8x128xf32>
    %771 = arith.addf %767, %770 : vector<8x128xf32>
    %c17_136 = arith.constant 17 : index
    %772 = memref.load %arg4[%c17_136] : memref<96xf32, #tpu.memory_space<smem>>
    %773 = vector.broadcast %772 : f32 to vector<8x128xf32>
    %774 = arith.mulf %773, %764 : vector<8x128xf32>
    %775 = arith.addf %771, %774 : vector<8x128xf32>
    %776 = arith.addf %722, %775 : vector<8x128xf32>
    %c39_137 = arith.constant 39 : index
    %777 = memref.load %arg4[%c39_137] : memref<96xf32, #tpu.memory_space<smem>>
    %778 = vector.broadcast %777 : f32 to vector<8x128xf32>
    %779 = arith.mulf %778, %761 : vector<8x128xf32>
    %c40_138 = arith.constant 40 : index
    %780 = memref.load %arg4[%c40_138] : memref<96xf32, #tpu.memory_space<smem>>
    %781 = vector.broadcast %780 : f32 to vector<8x128xf32>
    %782 = arith.mulf %781, %472 : vector<8x128xf32>
    %783 = arith.addf %779, %782 : vector<8x128xf32>
    %c41_139 = arith.constant 41 : index
    %784 = memref.load %arg4[%c41_139] : memref<96xf32, #tpu.memory_space<smem>>
    %785 = vector.broadcast %784 : f32 to vector<8x128xf32>
    %786 = arith.mulf %785, %764 : vector<8x128xf32>
    %787 = arith.addf %783, %786 : vector<8x128xf32>
    %788 = arith.addf %734, %787 : vector<8x128xf32>
    %c63_140 = arith.constant 63 : index
    %789 = memref.load %arg4[%c63_140] : memref<96xf32, #tpu.memory_space<smem>>
    %790 = vector.broadcast %789 : f32 to vector<8x128xf32>
    %791 = arith.mulf %790, %761 : vector<8x128xf32>
    %c64_141 = arith.constant 64 : index
    %792 = memref.load %arg4[%c64_141] : memref<96xf32, #tpu.memory_space<smem>>
    %793 = vector.broadcast %792 : f32 to vector<8x128xf32>
    %794 = arith.mulf %793, %472 : vector<8x128xf32>
    %795 = arith.addf %791, %794 : vector<8x128xf32>
    %c65_142 = arith.constant 65 : index
    %796 = memref.load %arg4[%c65_142] : memref<96xf32, #tpu.memory_space<smem>>
    %797 = vector.broadcast %796 : f32 to vector<8x128xf32>
    %798 = arith.mulf %797, %764 : vector<8x128xf32>
    %799 = arith.addf %795, %798 : vector<8x128xf32>
    %800 = arith.addf %746, %799 : vector<8x128xf32>
    %c87_143 = arith.constant 87 : index
    %801 = memref.load %arg4[%c87_143] : memref<96xf32, #tpu.memory_space<smem>>
    %802 = vector.broadcast %801 : f32 to vector<8x128xf32>
    %803 = arith.mulf %802, %761 : vector<8x128xf32>
    %c88_144 = arith.constant 88 : index
    %804 = memref.load %arg4[%c88_144] : memref<96xf32, #tpu.memory_space<smem>>
    %805 = vector.broadcast %804 : f32 to vector<8x128xf32>
    %806 = arith.mulf %805, %472 : vector<8x128xf32>
    %807 = arith.addf %803, %806 : vector<8x128xf32>
    %c89_145 = arith.constant 89 : index
    %808 = memref.load %arg4[%c89_145] : memref<96xf32, #tpu.memory_space<smem>>
    %809 = vector.broadcast %808 : f32 to vector<8x128xf32>
    %810 = arith.mulf %809, %764 : vector<8x128xf32>
    %811 = arith.addf %807, %810 : vector<8x128xf32>
    %812 = arith.addf %758, %811 : vector<8x128xf32>
    %c1_i32_146 = arith.constant 1 : i32
    %813 = tpu.dynamic_rotate %482 by %c1_i32_146 dim 1 : vector<8x128xf32>, i32 -> vector<8x128xf32>
    %cst_147 = arith.constant 0.000000e+00 : f32
    %814 = vector.broadcast %cst_147 : f32 to vector<8x128xf32>
    %815 = arith.select %2, %813, %814 : vector<8x128xi1>, vector<8x128xf32>
    %c127_i32_148 = arith.constant 127 : i32
    %816 = tpu.dynamic_rotate %482 by %c127_i32_148 dim 1 : vector<8x128xf32>, i32 -> vector<8x128xf32>
    %cst_149 = arith.constant 0.000000e+00 : f32
    %817 = vector.broadcast %cst_149 : f32 to vector<8x128xf32>
    %818 = arith.select %4, %816, %817 : vector<8x128xi1>, vector<8x128xf32>
    %c18_150 = arith.constant 18 : index
    %819 = memref.load %arg4[%c18_150] : memref<96xf32, #tpu.memory_space<smem>>
    %820 = vector.broadcast %819 : f32 to vector<8x128xf32>
    %821 = arith.mulf %820, %815 : vector<8x128xf32>
    %c19_151 = arith.constant 19 : index
    %822 = memref.load %arg4[%c19_151] : memref<96xf32, #tpu.memory_space<smem>>
    %823 = vector.broadcast %822 : f32 to vector<8x128xf32>
    %824 = arith.mulf %823, %482 : vector<8x128xf32>
    %825 = arith.addf %821, %824 : vector<8x128xf32>
    %c20_152 = arith.constant 20 : index
    %826 = memref.load %arg4[%c20_152] : memref<96xf32, #tpu.memory_space<smem>>
    %827 = vector.broadcast %826 : f32 to vector<8x128xf32>
    %828 = arith.mulf %827, %818 : vector<8x128xf32>
    %829 = arith.addf %825, %828 : vector<8x128xf32>
    %830 = arith.addf %776, %829 : vector<8x128xf32>
    %c42_153 = arith.constant 42 : index
    %831 = memref.load %arg4[%c42_153] : memref<96xf32, #tpu.memory_space<smem>>
    %832 = vector.broadcast %831 : f32 to vector<8x128xf32>
    %833 = arith.mulf %832, %815 : vector<8x128xf32>
    %c43_154 = arith.constant 43 : index
    %834 = memref.load %arg4[%c43_154] : memref<96xf32, #tpu.memory_space<smem>>
    %835 = vector.broadcast %834 : f32 to vector<8x128xf32>
    %836 = arith.mulf %835, %482 : vector<8x128xf32>
    %837 = arith.addf %833, %836 : vector<8x128xf32>
    %c44_155 = arith.constant 44 : index
    %838 = memref.load %arg4[%c44_155] : memref<96xf32, #tpu.memory_space<smem>>
    %839 = vector.broadcast %838 : f32 to vector<8x128xf32>
    %840 = arith.mulf %839, %818 : vector<8x128xf32>
    %841 = arith.addf %837, %840 : vector<8x128xf32>
    %842 = arith.addf %788, %841 : vector<8x128xf32>
    %c66_156 = arith.constant 66 : index
    %843 = memref.load %arg4[%c66_156] : memref<96xf32, #tpu.memory_space<smem>>
    %844 = vector.broadcast %843 : f32 to vector<8x128xf32>
    %845 = arith.mulf %844, %815 : vector<8x128xf32>
    %c67_157 = arith.constant 67 : index
    %846 = memref.load %arg4[%c67_157] : memref<96xf32, #tpu.memory_space<smem>>
    %847 = vector.broadcast %846 : f32 to vector<8x128xf32>
    %848 = arith.mulf %847, %482 : vector<8x128xf32>
    %849 = arith.addf %845, %848 : vector<8x128xf32>
    %c68_158 = arith.constant 68 : index
    %850 = memref.load %arg4[%c68_158] : memref<96xf32, #tpu.memory_space<smem>>
    %851 = vector.broadcast %850 : f32 to vector<8x128xf32>
    %852 = arith.mulf %851, %818 : vector<8x128xf32>
    %853 = arith.addf %849, %852 : vector<8x128xf32>
    %854 = arith.addf %800, %853 : vector<8x128xf32>
    %c90_159 = arith.constant 90 : index
    %855 = memref.load %arg4[%c90_159] : memref<96xf32, #tpu.memory_space<smem>>
    %856 = vector.broadcast %855 : f32 to vector<8x128xf32>
    %857 = arith.mulf %856, %815 : vector<8x128xf32>
    %c91_160 = arith.constant 91 : index
    %858 = memref.load %arg4[%c91_160] : memref<96xf32, #tpu.memory_space<smem>>
    %859 = vector.broadcast %858 : f32 to vector<8x128xf32>
    %860 = arith.mulf %859, %482 : vector<8x128xf32>
    %861 = arith.addf %857, %860 : vector<8x128xf32>
    %c92_161 = arith.constant 92 : index
    %862 = memref.load %arg4[%c92_161] : memref<96xf32, #tpu.memory_space<smem>>
    %863 = vector.broadcast %862 : f32 to vector<8x128xf32>
    %864 = arith.mulf %863, %818 : vector<8x128xf32>
    %865 = arith.addf %861, %864 : vector<8x128xf32>
    %866 = arith.addf %812, %865 : vector<8x128xf32>
    %c1_i32_162 = arith.constant 1 : i32
    %867 = tpu.dynamic_rotate %492 by %c1_i32_162 dim 1 : vector<8x128xf32>, i32 -> vector<8x128xf32>
    %cst_163 = arith.constant 0.000000e+00 : f32
    %868 = vector.broadcast %cst_163 : f32 to vector<8x128xf32>
    %869 = arith.select %2, %867, %868 : vector<8x128xi1>, vector<8x128xf32>
    %c127_i32_164 = arith.constant 127 : i32
    %870 = tpu.dynamic_rotate %492 by %c127_i32_164 dim 1 : vector<8x128xf32>, i32 -> vector<8x128xf32>
    %cst_165 = arith.constant 0.000000e+00 : f32
    %871 = vector.broadcast %cst_165 : f32 to vector<8x128xf32>
    %872 = arith.select %4, %870, %871 : vector<8x128xi1>, vector<8x128xf32>
    %c21_166 = arith.constant 21 : index
    %873 = memref.load %arg4[%c21_166] : memref<96xf32, #tpu.memory_space<smem>>
    %874 = vector.broadcast %873 : f32 to vector<8x128xf32>
    %875 = arith.mulf %874, %869 : vector<8x128xf32>
    %c22_167 = arith.constant 22 : index
    %876 = memref.load %arg4[%c22_167] : memref<96xf32, #tpu.memory_space<smem>>
    %877 = vector.broadcast %876 : f32 to vector<8x128xf32>
    %878 = arith.mulf %877, %492 : vector<8x128xf32>
    %879 = arith.addf %875, %878 : vector<8x128xf32>
    %c23_168 = arith.constant 23 : index
    %880 = memref.load %arg4[%c23_168] : memref<96xf32, #tpu.memory_space<smem>>
    %881 = vector.broadcast %880 : f32 to vector<8x128xf32>
    %882 = arith.mulf %881, %872 : vector<8x128xf32>
    %883 = arith.addf %879, %882 : vector<8x128xf32>
    %884 = arith.addf %830, %883 : vector<8x128xf32>
    %c45_169 = arith.constant 45 : index
    %885 = memref.load %arg4[%c45_169] : memref<96xf32, #tpu.memory_space<smem>>
    %886 = vector.broadcast %885 : f32 to vector<8x128xf32>
    %887 = arith.mulf %886, %869 : vector<8x128xf32>
    %c46_170 = arith.constant 46 : index
    %888 = memref.load %arg4[%c46_170] : memref<96xf32, #tpu.memory_space<smem>>
    %889 = vector.broadcast %888 : f32 to vector<8x128xf32>
    %890 = arith.mulf %889, %492 : vector<8x128xf32>
    %891 = arith.addf %887, %890 : vector<8x128xf32>
    %c47_171 = arith.constant 47 : index
    %892 = memref.load %arg4[%c47_171] : memref<96xf32, #tpu.memory_space<smem>>
    %893 = vector.broadcast %892 : f32 to vector<8x128xf32>
    %894 = arith.mulf %893, %872 : vector<8x128xf32>
    %895 = arith.addf %891, %894 : vector<8x128xf32>
    %896 = arith.addf %842, %895 : vector<8x128xf32>
    %c69_172 = arith.constant 69 : index
    %897 = memref.load %arg4[%c69_172] : memref<96xf32, #tpu.memory_space<smem>>
    %898 = vector.broadcast %897 : f32 to vector<8x128xf32>
    %899 = arith.mulf %898, %869 : vector<8x128xf32>
    %c70_173 = arith.constant 70 : index
    %900 = memref.load %arg4[%c70_173] : memref<96xf32, #tpu.memory_space<smem>>
    %901 = vector.broadcast %900 : f32 to vector<8x128xf32>
    %902 = arith.mulf %901, %492 : vector<8x128xf32>
    %903 = arith.addf %899, %902 : vector<8x128xf32>
    %c71_174 = arith.constant 71 : index
    %904 = memref.load %arg4[%c71_174] : memref<96xf32, #tpu.memory_space<smem>>
    %905 = vector.broadcast %904 : f32 to vector<8x128xf32>
    %906 = arith.mulf %905, %872 : vector<8x128xf32>
    %907 = arith.addf %903, %906 : vector<8x128xf32>
    %908 = arith.addf %854, %907 : vector<8x128xf32>
    %c93_175 = arith.constant 93 : index
    %909 = memref.load %arg4[%c93_175] : memref<96xf32, #tpu.memory_space<smem>>
    %910 = vector.broadcast %909 : f32 to vector<8x128xf32>
    %911 = arith.mulf %910, %869 : vector<8x128xf32>
    %c94_176 = arith.constant 94 : index
    %912 = memref.load %arg4[%c94_176] : memref<96xf32, #tpu.memory_space<smem>>
    %913 = vector.broadcast %912 : f32 to vector<8x128xf32>
    %914 = arith.mulf %913, %492 : vector<8x128xf32>
    %915 = arith.addf %911, %914 : vector<8x128xf32>
    %c95_177 = arith.constant 95 : index
    %916 = memref.load %arg4[%c95_177] : memref<96xf32, #tpu.memory_space<smem>>
    %917 = vector.broadcast %916 : f32 to vector<8x128xf32>
    %918 = arith.mulf %917, %872 : vector<8x128xf32>
    %919 = arith.addf %915, %918 : vector<8x128xf32>
    %920 = arith.addf %866, %919 : vector<8x128xf32>
    %c0_178 = arith.constant 0 : index
    %c0_179 = arith.constant 0 : index
    %c0_180 = arith.constant 0 : index
    %921 = vector.load %arg1[%c0_178, %c0_179, %c0_180] : memref<4x8x128xf32, #tpu.memory_space<vmem>>, vector<1x8x128xf32>
    %922 = vector.shape_cast %921 : vector<1x8x128xf32> to vector<8x128xf32>
    %923 = arith.addf %922, %884 : vector<8x128xf32>
    %c0_181 = arith.constant 0 : index
    %924 = memref.load %arg5[%c0_181] : memref<4xf32, #tpu.memory_space<smem>>
    %925 = vector.broadcast %924 : f32 to vector<8x128xf32>
    %926 = arith.addf %923, %925 : vector<8x128xf32>
    %c0_182 = arith.constant 0 : index
    %c0_183 = arith.constant 0 : index
    %c0_184 = arith.constant 0 : index
    %927 = vector.load %arg6[%c0_182, %c0_183, %c0_184] : memref<4x8x128xf32, #tpu.memory_space<vmem>>, vector<1x8x128xf32>
    %928 = vector.shape_cast %927 : vector<1x8x128xf32> to vector<8x128xf32>
    %929 = vector.shape_cast %926 : vector<8x128xf32> to vector<1x8x128xf32>
    tpu.vector_store %arg6[%c0_182, %c0_183, %c0_184], %929 {strides = array<i32>} : memref<4x8x128xf32, #tpu.memory_space<vmem>>, vector<1x8x128xf32>,
    %c1_185 = arith.constant 1 : index
    %c0_186 = arith.constant 0 : index
    %c0_187 = arith.constant 0 : index
    %930 = vector.load %arg1[%c1_185, %c0_186, %c0_187] : memref<4x8x128xf32, #tpu.memory_space<vmem>>, vector<1x8x128xf32>
    %931 = vector.shape_cast %930 : vector<1x8x128xf32> to vector<8x128xf32>
    %932 = arith.addf %931, %896 : vector<8x128xf32>
    %c1_188 = arith.constant 1 : index
    %933 = memref.load %arg5[%c1_188] : memref<4xf32, #tpu.memory_space<smem>>
    %934 = vector.broadcast %933 : f32 to vector<8x128xf32>
    %935 = arith.addf %932, %934 : vector<8x128xf32>
    %c1_189 = arith.constant 1 : index
    %c0_190 = arith.constant 0 : index
    %c0_191 = arith.constant 0 : index
    %936 = vector.load %arg6[%c1_189, %c0_190, %c0_191] : memref<4x8x128xf32, #tpu.memory_space<vmem>>, vector<1x8x128xf32>
    %937 = vector.shape_cast %936 : vector<1x8x128xf32> to vector<8x128xf32>
    %938 = vector.shape_cast %935 : vector<8x128xf32> to vector<1x8x128xf32>
    tpu.vector_store %arg6[%c1_189, %c0_190, %c0_191], %938 {strides = array<i32>} : memref<4x8x128xf32, #tpu.memory_space<vmem>>, vector<1x8x128xf32>,
    %c2_192 = arith.constant 2 : index
    %c0_193 = arith.constant 0 : index
    %c0_194 = arith.constant 0 : index
    %939 = vector.load %arg1[%c2_192, %c0_193, %c0_194] : memref<4x8x128xf32, #tpu.memory_space<vmem>>, vector<1x8x128xf32>
    %940 = vector.shape_cast %939 : vector<1x8x128xf32> to vector<8x128xf32>
    %941 = arith.addf %940, %908 : vector<8x128xf32>
    %c2_195 = arith.constant 2 : index
    %942 = memref.load %arg5[%c2_195] : memref<4xf32, #tpu.memory_space<smem>>
    %943 = vector.broadcast %942 : f32 to vector<8x128xf32>
    %944 = arith.addf %941, %943 : vector<8x128xf32>
    %c2_196 = arith.constant 2 : index
    %c0_197 = arith.constant 0 : index
    %c0_198 = arith.constant 0 : index
    %945 = vector.load %arg6[%c2_196, %c0_197, %c0_198] : memref<4x8x128xf32, #tpu.memory_space<vmem>>, vector<1x8x128xf32>
    %946 = vector.shape_cast %945 : vector<1x8x128xf32> to vector<8x128xf32>
    %947 = vector.shape_cast %944 : vector<8x128xf32> to vector<1x8x128xf32>
    tpu.vector_store %arg6[%c2_196, %c0_197, %c0_198], %947 {strides = array<i32>} : memref<4x8x128xf32, #tpu.memory_space<vmem>>, vector<1x8x128xf32>,
    %c3_199 = arith.constant 3 : index
    %c0_200 = arith.constant 0 : index
    %c0_201 = arith.constant 0 : index
    %948 = vector.load %arg1[%c3_199, %c0_200, %c0_201] : memref<4x8x128xf32, #tpu.memory_space<vmem>>, vector<1x8x128xf32>
    %949 = vector.shape_cast %948 : vector<1x8x128xf32> to vector<8x128xf32>
    %950 = arith.addf %949, %920 : vector<8x128xf32>
    %c3_202 = arith.constant 3 : index
    %951 = memref.load %arg5[%c3_202] : memref<4xf32, #tpu.memory_space<smem>>
    %952 = vector.broadcast %951 : f32 to vector<8x128xf32>
    %953 = arith.addf %950, %952 : vector<8x128xf32>
    %c3_203 = arith.constant 3 : index
    %c0_204 = arith.constant 0 : index
    %c0_205 = arith.constant 0 : index
    %954 = vector.load %arg6[%c3_203, %c0_204, %c0_205] : memref<4x8x128xf32, #tpu.memory_space<vmem>>, vector<1x8x128xf32>
    %955 = vector.shape_cast %954 : vector<1x8x128xf32> to vector<8x128xf32>
    %956 = vector.shape_cast %953 : vector<8x128xf32> to vector<1x8x128xf32>
    tpu.vector_store %arg6[%c3_203, %c0_204, %c0_205], %956 {strides = array<i32>} : memref<4x8x128xf32, #tpu.memory_space<vmem>>, vector<1x8x128xf32>,
    return
  }
  func.func @transform_0(%arg0: i32) -> (i32, i32, i32) {
    %c0_i32 = arith.constant 0 : i32
    %c0_i32_0 = arith.constant 0 : i32
    %c0_i32_1 = arith.constant 0 : i32
    return %c0_i32, %arg0, %c0_i32_0 : i32, i32, i32
  }
  func.func @transform_1(%arg0: i32) -> (i32, i32) {
    %c0_i32 = arith.constant 0 : i32
    %c0_i32_0 = arith.constant 0 : i32
    return %arg0, %c0_i32 : i32, i32
  }
  func.func @transform_2(%arg0: i32) -> i32 {
    %c0_i32 = arith.constant 0 : i32
    %c0_i32_0 = arith.constant 0 : i32
    return %c0_i32 : i32
  }
  func.func @transform_3(%arg0: i32) -> i32 {
    %c0_i32 = arith.constant 0 : i32
    %c0_i32_0 = arith.constant 0 : i32
    return %c0_i32 : i32
  }
  func.func @transform_4(%arg0: i32) -> i32 {
    %c0_i32 = arith.constant 0 : i32
    %c0_i32_0 = arith.constant 0 : i32
    return %c0_i32 : i32
  }
  func.func @transform_5(%arg0: i32) -> (i32, i32, i32) {
    %c0_i32 = arith.constant 0 : i32
    %c0_i32_0 = arith.constant 0 : i32
    %c0_i32_1 = arith.constant 0 : i32
    return %c0_i32, %arg0, %c0_i32_0 : i32, i32, i32
  }
}

</mosaic_0001>

<bundles_post_ra>
// kernel: unet_forward.1
= control target key start
LH: loop header
LB: loop body
LE: loop exit
PB: predicated region body
PF: predicated region fallthrough
CT: control target
= control target key end

     0   :  { %s2839_s0 = inlined_call_operand.vmem [shape: f32[4,8,128], index: 0, kind: input, shape index: {}]   ;;  %s2840_s1 = inlined_call_operand.vmem [shape: f32[8,8], index: 1, kind: input, shape index: {}]   ;;  %s2841_s2 = inlined_call_operand.vmem [shape: f32[96], index: 2, kind: input, shape index: {}]   ;;  %s2842_s3 = inlined_call_operand.vmem [shape: f32[96], index: 3, kind: input, shape index: {}]   ;;  %s2843_s4 = inlined_call_operand.vmem [shape: f32[4], index: 4, kind: input, shape index: {}]   ;;  %s2844_s5 = inlined_call_operand.vmem [shape: f32[4,8,128], index: 5, kind: output, shape index: {}]  }
   0x1   :  { %2887 = sst [smem:[#allocation52_spill]] %s2839_s0 }
   0x2   :  { %2888 = sst [smem:[#allocation53_spill]] %s2844_s5 }
   0x3   :  { %10 = vsyncpa [#allocation3], 0 }
   0x4   :  { %11 = vsyncpa [#allocation5], 0  ;;  %s30_s20 = sshll.u32 %s2842_s3, 4  ;;  %s21_s23 = sshll.u32 %s2841_s2, 4  ;;  %s31_s20 = int_to_ptr.vmem [resolvable:$true] %s30_s20  ;;  %s22_s23 = int_to_ptr.vmem [resolvable:$true] %s21_s23 }
   0x5   :  { %s1434_s24 = smov [#allocation4]   ;;  %s1435_s25 = smov [#allocation2]  }
   0x6   :  { %33 = dma.vmem_to_smem %s31_s20, 16, %s1434_s24, [#allocation5]  }
   0x7   :  { %24 = dma.vmem_to_smem %s22_s23, 16, %s1435_s25, [#allocation3]  }
   0x8   :  { %s39_s28 = sshll.u32 %s2843_s4, 4  ;;  %s1436_s29 = smov [#allocation6]   ;;  %s40_s28 = int_to_ptr.vmem [resolvable:$true] %s39_s28 }
   0x9   :  { %42 = dma.vmem_to_smem %s40_s28, 16, %s1436_s29, [#allocation5]  }
   0xa   :  { %1430 = dma.done.wait [#allocation3], 16  }
   0xb   :  { %1431 = vsyncadd [#allocation3], 4294967280 }
   0xc   :  { %1432 = dma.done.wait [#allocation5], 32  }
   0xd   :  { %1433 = vsyncadd [#allocation5], 4294967264 }
   0xe   :  { %55 = sfence }
   0xf   :  { %v1489_v0 = vld [vmem:[%s2839_s0] sm:$0xff]  ;;  %v1494_v1 = vld [vmem:[%s2839_s0 + $0x10] sm:$0xff]  ;;  %s2847_s7 = smov 127   ;;  %s2845_s4 = smov 1   ;;  %v1439_v2 = vmov 2   ;;  %v1440_v3 = vmov 1   ;;  %v56_v13 = vlaneseq }
  0x10   :  { %64 = vrot.lane.b32.xlu1 %v1489_v0, %s2847_s7  ;;  %61 = vrot.lane.b32.xlu0 %v1489_v0, %s2845_s4  ;;  %v1441_v4 = vmov 0   ;;  %v1505_v5 = vld [vmem:[%s2839_s0 + $0x8] sm:$0xff]  ;;  %v1516_v6 = vld [vmem:[%s2839_s0 + $0x18] sm:$0xff]  ;;  %v1442_v8 = vmov 3   ;;  %v1443_v9 = vmov 4   ;;  %v1444_v10 = vmov 6  }
  0x11   :  { %261 = vrot.lane.b32.xlu2 %v1494_v1, %s2845_s4  ;;  %1354 = vset.pattern.permute.xlu1 %v1439_v2  ;;  %v467_v7 = vld [vmem:[%s2840_s1] sm:$0xff]  ;;  %v1445_v11 = vmov 5   ;;  %s1525_s14 = sld [smem:[#allocation2 + $0x6]]  ;;  %v1446_v12 = vmov 7   ;;  %v1635_v16 = vand.u32 127, %v56_v13 }
  0x12   :  { %1353 = vset.pattern.permute.xlu0 %v1440_v3  ;;  %1352 = vset.pattern.permute.xlu2 %v1441_v4  ;;  %s1527_s15 = sld [smem:[#allocation2 + $0x7]] }
  0x13   :  { %s1529_s1 = sld [smem:[#allocation2 + $0x2a]]  ;;  %2927 = vst [vmem:[#allocation47_spill] sm:$0xff] %v1635_v16  ;;  %vm58_vm0 = vcmp.ne.s32.totalorder %v1635_v16, 0  ;;  %vm59_vm1 = vcmp.ne.s32.totalorder %v1635_v16, 127 }
  0x14   :  { %s1531_s16 = sld [smem:[#allocation2 + $0x2b]] }
  0x15   :  { %s1533_s17 = sld [smem:[#allocation2]] }
  0x16   :  { %s1535_s18 = sld [smem:[#allocation2 + $0x1]] }
  0x17   :  { %s1537_s19 = sld [smem:[#allocation2 + $0x24]]  ;;  %v268_v19 = vstv %s1525_s14 }
  0x18   :  { %160 = vrot.lane.b32.xlu1 %v1505_v5, %s2847_s7  ;;  %157 = vrot.lane.b32.xlu0 %v1505_v5, %s2845_s4  ;;  %s1539_s20 = sld [smem:[#allocation2 + $0x25]]  ;;  %v271_v14 = vstv %s1527_s15 }
  0x19   :  { %264 = vrot.lane.b32.xlu2 %v1494_v1, %s2847_s7  ;;  %s1541_s21 = sld [smem:[#allocation2 + $0x8]]  ;;  %v1647_v20 = vmul.f32 %v1494_v1, %v271_v14  ;;  %v304_v21 = vstv %s1529_s1 }
  0x1a   :  { %s1543_s22 = sld [smem:[#allocation2 + $0x2c]]  ;;  %v307_v15 = vstv %s1531_s16 }
  0x1b   :  { %2889 = sst [smem:[#allocation9_spill]] %s1533_s17  ;;  %v1651_v22 = vmul.f32 %v1494_v1, %v307_v15  ;;  %v68_v23 = vstv %s1533_s17 }
  0x1c   :  { %s1545_s23 = sld [smem:[#allocation2 + $0x2]]  ;;  %v71_v17 = vstv %s1535_s18 }
  0x1d   :  { %2890 = sst [smem:[#allocation10_spill]] %s1537_s19  ;;  %v101_v24 = vstv %s1537_s19  ;;  %v1662_v26 = vmul.f32 %v71_v17, %v1489_v0 }
  0x1e   :  { %s1547_s24 = sld [smem:[#allocation2 + $0x26]]  ;;  %v104_v18 = vstv %s1539_s20 }
  0x1f   :  { %s1549_s25 = sld [smem:[#allocation2 + $0x3]]  ;;  %v1665_v27 = vmul.f32 %v104_v18, %v1489_v0  ;;  %v275_v35 = vstv %s1541_s21 }
  0x20   :  { %368 = vrot.lane.b32.xlu1 %v1516_v6, %s2847_s7  ;;  %365 = vrot.lane.b32.xlu0 %v1516_v6, %s2845_s4  ;;  %s1551_s26 = sld [smem:[#allocation2 + $0x4]]  ;;  %v311_v39 = vstv %s1543_s22 }
  0x21   :  { %470 = vperm.xlu2 %1352, %v467_v7   ;;  %s1553_s27 = sld [smem:[#allocation2 + $0x27]] }
  0x22   :  { %2891 = sst [smem:[#allocation11_spill]] %s1545_s23  ;;  %v75_v30 = vstv %s1545_s23 }
  0x23   :  { %s1555_s28 = sld [smem:[#allocation2 + $0x28]] }
  0x24   :  { %2892 = sst [smem:[#allocation12_spill]] %s1547_s24  ;;  %v108_v31 = vstv %s1547_s24 }
  0x25   :  { %2893 = sst [smem:[#allocation13_spill]] %s1549_s25 }
  0x26   :  { %s1557_s29 = sld [smem:[#allocation2 + $0x5]]  ;;  %v167_v36 = vstv %s1551_s26 }
  0x27   :  { %2894 = sst [smem:[#allocation14_spill]] %s1553_s27  ;;  %v1704_v47 = vmul.f32 %v1505_v5, %v167_v36 }
  0x28   :  { %520 = vperm.xlu1 %1354, %v467_v7   ;;  %495 = vperm.xlu0 %1353, %v467_v7   ;;  %s1559_s3 = sld [smem:[#allocation2 + $0x29]] }
  0x29   :  { %1355 = vset.pattern.permute.xlu2 %v1442_v8  ;;  %s1561_s30 = sld [smem:[#allocation2 + $0x9]]  ;;  %v203_v37 = vstv %s1555_s28 }
  0x2a   :  { %545 = vperm.xlu2 %1355, %v467_v7   ;;  %s1563_s2 = sld [smem:[#allocation2 + $0xa]]  ;;  %v1707_v48 = vmul.f32 %v1505_v5, %v203_v37 }
  0x2b   :  { %s1565_s6 = sld [smem:[#allocation2 + $0x2d]] }
  0x2c   :  { %2895 = sst [smem:[#allocation15_spill]] %s1557_s29 }
  0x2d   :  { %s1567_s8 = sld [smem:[#allocation2 + $0x2e]] }
  0x2e   :  { %2896 = sst [smem:[#allocation16_spill]] %s1559_s3 }
  0x2f   :  { %2897 = sst [smem:[#allocation17_spill]] %s1561_s30 }
  0x30   :  { %1356 = vset.pattern.permute.xlu1 %v1443_v9  ;;  %1358 = vset.pattern.permute.xlu0 %v1444_v10  ;;  %2898 = sst [smem:[#allocation18_spill]] %s1563_s2 }
  0x31   :  { %570 = vperm.xlu1 %1356, %v467_v7   ;;  %620 = vperm.xlu0 %1358, %v467_v7   ;;  %2899 = sst [smem:[#allocation19_spill]] %s1565_s6 }
  0x32   :  { %1357 = vset.pattern.permute.xlu2 %v1445_v11  ;;  %s1569_s9 = sld [smem:[#allocation2 + $0xb]] }
  0x33   :  { %595 = vperm.xlu2 %1357, %v467_v7   ;;  %2900 = sst [smem:[#allocation20_spill]] %s1567_s8 }
  0x34   :  { %s1571_s10 = sld [smem:[#allocation2 + $0x2f]] }
  0x35   :  { %s1573_s11 = sld [smem:[#allocation2 + $0x3c]] }
  0x36   :  { %s1575_s12 = sld [smem:[#allocation2 + $0x3d]] }
  0x37   :  { %s1577_s13 = sld [smem:[#allocation2 + $0x3e]] }
  0x38   :  { %2901 = sst [smem:[#allocation21_spill]] %s1569_s9 }
  0x39   :  { %1359 = vset.pattern.permute.xlu1 %v1446_v12  ;;  %1360 = vset.pattern.permute.xlu0 %v1446_v12  ;;  %s1579_s4 = sld [smem:[#allocation2 + $0x3f]] }
  0x3a   :  { %645 = vperm.xlu1 %1359, %v467_v7   ;;  %2902 = sst [smem:[#allocation22_spill]] %s1571_s10 }
  0x3b   :  { %2903 = sst [smem:[#allocation23_spill]] %s1573_s11  ;;  %v123_v28 = vstv %s1573_s11 }
  0x3c   :  { %s1581_s7 = sld [smem:[#allocation2 + $0x40]]  ;;  %v126_v25 = vstv %s1575_s12 }
  0x3d   :  { %2904 = sst [smem:[#allocation24_spill]] %s1577_s13  ;;  %v130_v32 = vstv %s1577_s13  ;;  %v1681_v38 = vmul.f32 %v126_v25, %v1489_v0 }
  0x3e   :  { %s1583_s5 = sld [smem:[#allocation2 + $0x41]] }
  0x3f   :  { %2905 = sst [smem:[#allocation25_spill]] %s1579_s4 }
  0x40   :  { %s1585_s0 = sld [smem:[#allocation2 + $0x42]] }
  0x41   :  { %s1587_s6 = sld [smem:[#allocation2 + $0x43]] }
  0x42   :  { %2906 = sst [smem:[#allocation26_spill]] %s1581_s7 }
  0x43   :  { %s1589_s30 = sld [smem:[#allocation2 + $0x44]] }
  0x44   :  { %2907 = sst [smem:[#allocation27_spill]] %s1583_s5 }
  0x45   :  { %s1591_s9 = sld [smem:[#allocation2 + $0x45]] }
  0x46   :  { %2908 = sst [smem:[#allocation28_spill]] %s1585_s0 }
  0x47   :  { %2909 = sst [smem:[#allocation29_spill]] %s1587_s6 }
  0x48   :  { %s1593_s10 = sld [smem:[#allocation2 + $0x46]] }
  0x49   :  { %2910 = sst [smem:[#allocation30_spill]] %s1589_s30 }
  0x4a   :  { %s1595_s8 = sld [smem:[#allocation2 + $0x47]] }
  0x4b   :  { %2911 = sst [smem:[#allocation31_spill]] %s1591_s9 }
  0x4c   :  { %s1597_s2 = sld [smem:[#allocation2 + $0x18]] }
  0x4d   :  { %s1599_s3 = sld [smem:[#allocation2 + $0x19]] }
  0x4e   :  { %2912 = sst [smem:[#allocation32_spill]] %s1593_s10 }
  0x4f   :  { %s1601_s29 = sld [smem:[#allocation2 + $0x1a]] }
  0x50   :  { %2913 = sst [smem:[#allocation33_spill]] %s1595_s8 }
  0x51   :  { %s1603_s4 = sld [smem:[#allocation2 + $0x1b]] }
  0x52   :  { %2914 = sst [smem:[#allocation34_spill]] %s1597_s2  ;;  %v90_v33 = vstv %s1597_s2 }
  0x53   :  { %s1605_s5 = sld [smem:[#allocation2 + $0x1c]]  ;;  %v93_v29 = vstv %s1599_s3 }
  0x54   :  { %s1607_s7 = sld [smem:[#allocation2 + $0x1d]]  ;;  %v1688_v41 = vmul.f32 %v93_v29, %v1489_v0 }
  0x55   :  { %2915 = sst [smem:[#allocation35_spill]] %s1601_s29  ;;  %v97_v40 = vstv %s1601_s29 }
  0x56   :  { %s1609_s30 = sld [smem:[#allocation2 + $0x1e]] }
  0x57   :  { %2916 = sst [smem:[#allocation36_spill]] %s1603_s4 }
  0x58   :  { %s1611_s9 = sld [smem:[#allocation2 + $0x1f]] }
  0x59   :  { %2917 = sst [smem:[#allocation37_spill]] %s1605_s5 }
  0x5a   :  { %2918 = sst [smem:[#allocation38_spill]] %s1607_s7 }
  0x5b   :  { %s1613_s10 = sld [smem:[#allocation2 + $0x20]] }
  0x5c   :  { %s1615_s8 = sld [smem:[#allocation2 + $0x21]]  ;;  %v292_v9 = vstv %s1609_s30 }
  0x5d   :  { %s1617_s6 = sld [smem:[#allocation2 + $0x22]] }
  0x5e   :  { %2919 = sst [smem:[#allocation39_spill]] %s1611_s9 }
  0x5f   :  { %s1619_s0 = sld [smem:[#allocation2 + $0x23]] }
  0x60   :  { %s1621_s4 = sld [smem:[#allocation2 + $0xc]] }
  0x61   :  { %2920 = sst [smem:[#allocation40_spill]] %s1613_s10 }
  0x62   :  { %2921 = sst [smem:[#allocation41_spill]] %s1615_s8 }
  0x63   :  { %2922 = sst [smem:[#allocation42_spill]] %s1617_s6 }
  0x64   :  { %s1623_s5 = sld [smem:[#allocation2 + $0xd]] }
  0x65   :  { %2923 = sst [smem:[#allocation43_spill]] %s1619_s0 }
  0x66   :  { %2924 = sst [smem:[#allocation44_spill]] %s1621_s4  ;;  %v79_v46 = vstv %s1621_s4 }
  0x67   :  { %s1625_s7 = sld [smem:[#allocation2 + $0xe]] }
  0x68   :  { %s1627_s9 = sld [smem:[#allocation2 + $0xf]] }
  0x69   :  { %s1629_s10 = sld [smem:[#allocation2 + $0x10]] }
  0x6a   :  { %s1631_s8 = sld [smem:[#allocation2 + $0x11]]  ;;  %v82_v42 = vstv %s1623_s5 }
  0x6b   :  { %s1637_s0 = sld [smem:[#allocation2 + $0x12]]  ;;  %v262_v34 = vpop.permute.xlu2 %261  ;;  %v1716_v53 = vmul.f32 %v82_v42, %v1489_v0 }
  0x6c   :  { %s1639_s6 = sld [smem:[#allocation2 + $0x13]]  ;;  %v1695_v43 = vsel %vm58_vm0, %v262_v34, 0.0 }
  0x6d   :  { %2925 = sst [smem:[#allocation45_spill]] %s1625_s7  ;;  %v86_v52 = vstv %s1625_s7  ;;  %v269_v55 = vmul.f32 %v268_v19, %v1695_v43  ;;  %v305_v56 = vmul.f32 %v304_v21, %v1695_v43  ;;  %v293_v25 = vmul.f32 %v292_v9, %v1695_v43 }
  0x6e   :  { %2926 = sst [smem:[#allocation46_spill]] %s1627_s9 }
  0x6f   :  { %s1643_s9 = sld [smem:[#allocation2 + $0x30]]  ;;  %v273_v11 = vadd.f32 %v1647_v20, %v269_v55  ;;  %v309_v12 = vadd.f32 %v1651_v22, %v305_v56  ;;  %v179_v42 = vstv %s1629_s10 }
  0x70   :  { %s1653_s15 = sld [smem:[#allocation2 + $0x31]] }
  0x71   :  { %s1659_s14 = sld [smem:[#allocation2 + $0x32]] }
  0x72   :  { %s1669_s1 = sld [smem:[#allocation2 + $0x14]]  ;;  %v283_v55 = vstv %s1639_s6 }
  0x73   :  { %s1675_s16 = sld [smem:[#allocation2 + $0x15]]  ;;  %v265_v15 = vpop.permute.xlu2 %264  ;;  %v284_v36 = vmul.f32 %v1494_v1, %v283_v55 }
  0x74   :  { %s2931_s18 = sld [smem:[#allocation28_spill]]  ;;  %v1762_v20 = vsel %vm59_vm1, %v265_v15, 0.0 }
  0x75   :  { %2928 = sst [smem:[#allocation48_spill]] %s1643_s9  ;;  %v112_v54 = vstv %s1643_s9  ;;  %v276_v56 = vmul.f32 %v275_v35, %v1762_v20 }
  0x76   :  { %2929 = sst [smem:[#allocation49_spill]] %s1653_s15  ;;  %v115_v57 = vstv %s1653_s15 }
  0x77   :  { %2930 = sst [smem:[#allocation50_spill]] %s1659_s14  ;;  %v1816_v55 = vadd.f32 %v276_v56, %v273_v11  ;;  %v183_v11 = vstv %s1631_s8 }
  0x78   :  { %s2932_s20 = sld [smem:[#allocation29_spill]]  ;;  %v287_v34 = vstv %s1669_s1 }
  0x79   :  { %s1683_s3 = sld [smem:[#allocation2 + $0x16]] }
  0x7a   :  { %s2933_s12 = sld [smem:[#allocation26_spill]]  ;;  %v328_v49 = vstv %s2931_s18 }
  0x7b   :  { %s1691_s13 = sld [smem:[#allocation2 + $0x17]]  ;;  %v329_v61 = vmul.f32 %v328_v49, %v1695_v43  ;;  %v1905_v58 = vpop.permute.xlu2 %470 }
  0x7c   :  { %s1701_s26 = sld [smem:[#allocation2 + $0x33]] }
  0x7d   :  { %s2934_s28 = sld [smem:[#allocation25_spill]] }
  0x7e   :  { %s2935_s5 = sld [smem:[#allocation37_spill]]  ;;  %v331_v50 = vstv %s2932_s20 }
  0x7f   :  { %s1711_s29 = sld [smem:[#allocation2 + $0x34]]  ;;  %v332_v60 = vmul.f32 %v1494_v1, %v331_v50 }
  0x80   :  { %v227_v51 = vstv %s2933_s12  ;;  %s2938_s27 = sld [smem:[#allocation36_spill]] }
  0x81   :  { %s1719_s23 = sld [smem:[#allocation2 + $0x35]]  ;;  %v1736_v3 = vmul.f32 %v1505_v5, %v227_v51  ;;  %v333_v19 = vadd.f32 %v332_v60, %v329_v61  ;;  %v280_v51 = vstv %s1637_s0  ;;  %v312_v60 = vmul.f32 %v311_v39, %v1762_v20 }
  0x82   :  { %s2939_s19 = sld [smem:[#allocation27_spill]]  ;;  %v281_v39 = vmul.f32 %v280_v51, %v1695_v43  ;;  %v65_v51 = vpop.permute.xlu1 %64 }
  0x83   :  { %s2940_s18 = sld [smem:[#allocation30_spill]]  ;;  %v224_v59 = vstv %s2934_s28  ;;  %v1818_v2 = vadd.f32 %v312_v60, %v309_v12 }
  0x84   :  { %s2941_s20 = sld [smem:[#allocation39_spill]]  ;;  %v191_v62 = vstv %s2935_s5  ;;  %v285_v12 = vadd.f32 %v284_v36, %v281_v39 }
  0x85   :  { %s1725_s12 = sld [smem:[#allocation2 + $0x36]]  ;;  %v1750_v13 = vmul.f32 %v1505_v5, %v191_v62  ;;  %v215_v56 = vstv %s1711_s29 }
  0x86   :  { %s2942_s9 = sld [smem:[#allocation38_spill]]  ;;  %v188_v4 = vstv %s2938_s27 }
  0x87   :  { %s1731_s7 = sld [smem:[#allocation2 + $0x37]] }
  0x88   :  { %s2943_s17 = sld [smem:[#allocation18_spill]]  ;;  %v231_v7 = vstv %s2939_s19 }
  0x89   :  { %s2944_s4 = sld [smem:[#allocation20_spill]]  ;;  %v335_v8 = vstv %s2940_s18 }
  0x8a   :  { %s2945_s14 = sld [smem:[#allocation40_spill]]  ;;  %v295_v10 = vstv %s2941_s20  ;;  %v336_v61 = vmul.f32 %v335_v8, %v1762_v20 }
  0x8b   :  { %s1739_s11 = sld [smem:[#allocation2 + $0x38]]  ;;  %v296_v22 = vmul.f32 %v1494_v1, %v295_v10 }
  0x8c   :  { %s2946_s28 = sld [smem:[#allocation46_spill]]  ;;  %v195_v14 = vstv %s2942_s9  ;;  %v1820_v63 = vadd.f32 %v336_v61, %v333_v19  ;;  %v288_v19 = vmul.f32 %v287_v34, %v1762_v20 }
  0x8d   :  { %s1745_s2 = sld [smem:[#allocation2 + $0x39]]  ;;  %v319_v45 = vstv %s1731_s7 }
  0x8e   :  { %s2949_s24 = sld [smem:[#allocation32_spill]]  ;;  %v375_v17 = vstv %s2943_s17  ;;  %v320_v34 = vmul.f32 %v1494_v1, %v319_v45 }
  0x8f   :  { %s1753_s27 = sld [smem:[#allocation2 + $0x3a]]  ;;  %v411_v18 = vstv %s2944_s4  ;;  %v1776_v49 = vmul.f32 %v1516_v6, %v375_v17 }
  0x90   :  { %v299_v21 = vstv %s2945_s14  ;;  %s1758_s30 = sld [smem:[#allocation2 + $0x3b]]  ;;  %v1779_v50 = vmul.f32 %v1516_v6, %v411_v18  ;;  %v62_v18 = vpop.permute.xlu0 %61 }
  0x91   :  { %s2950_s18 = sld [smem:[#allocation42_spill]]  ;;  %v300_v9 = vmul.f32 %v299_v21, %v1762_v20  ;;  %v180_v21 = vmul.f32 %v1505_v5, %v179_v42  ;;  %v323_v39 = vstv %s1739_s11  ;;  %v1855_v42 = vadd.f32 %v288_v19, %v285_v12  ;;  %v161_v19 = vpop.permute.xlu1 %160  ;;  %s3014_s11 = smov 127  }
  0x92   :  { %v176_v29 = vstv %s2946_s28  ;;  %s1767_s17 = sld [smem:[#allocation2 + $0x48]]  ;;  %v1872_v12 = vsel %vm58_vm0, %v62_v18, 0.0 }
  0x93   :  { %s2952_s20 = sld [smem:[#allocation31_spill]] }
  0x94   :  { %v435_v37 = vstv %s2949_s24  ;;  %s2953_s14 = sld [smem:[#allocation41_spill]] }
  0x95   :  { %s1773_s19 = sld [smem:[#allocation2 + $0x49]]  ;;  %v1798_v15 = vmul.f32 %v1516_v6, %v435_v37  ;;  %v297_v37 = vadd.f32 %v296_v22, %v293_v25  ;;  %v387_v22 = vstv %s1683_s3  ;;  %v316_v25 = vstv %s1725_s12  ;;  %s3015_s12 = smov 1  }
  0x96   :  { %s2955_s15 = sld [smem:[#allocation33_spill]]  ;;  %v423_v44 = vstv %s1753_s27  ;;  %v1844_v36 = vmul.f32 %v1516_v6, %v387_v22  ;;  %v317_v35 = vmul.f32 %v316_v25, %v1695_v43  ;;  %v116_v25 = vmul.f32 %v115_v57, %v1489_v0 }
  0x97   :  { %s1783_s28 = sld [smem:[#allocation2 + $0x4a]]  ;;  %v399_v62 = vstv %s2950_s18  ;;  %v1836_v60 = vadd.f32 %v300_v9, %v297_v37  ;;  %v1851_v9 = vmul.f32 %v1505_v5, %v215_v56  ;;  %v1858_v17 = vmul.f32 %v1516_v6, %v423_v44 }
  0x98   :  { %s1793_s24 = sld [smem:[#allocation2 + $0x4b]]  ;;  %v1810_v8 = vmul.f32 %v1516_v6, %v399_v62  ;;  %v1866_v56 = vmul.f32 %v323_v39, %v1762_v20  ;;  %v158_v44 = vpop.permute.xlu0 %157  ;;  %v1874_v22 = vadd.f32 %v320_v34, %v317_v35  ;;  %v1889_v35 = vsel %vm59_vm1, %v161_v19, 0.0 }
  0x99   :  { %s1801_s0 = sld [smem:[#allocation2 + $0x4c]]  ;;  %v1880_v39 = vsel %vm58_vm0, %v158_v44, 0.0  ;;  %v1896_v44 = vsel %vm59_vm1, %v65_v51, 0.0  ;;  %v124_v62 = vmul.f32 %v123_v28, %v1872_v12  ;;  %v80_v57 = vmul.f32 %v79_v46, %v1872_v12 }
  0x9a   :  { %s2956_s6 = sld [smem:[#allocation43_spill]]  ;;  %v189_v18 = vmul.f32 %v188_v4, %v1880_v39  ;;  %v177_v51 = vmul.f32 %v176_v29, %v1880_v39  ;;  %v69_v4 = vmul.f32 %v68_v23, %v1872_v12  ;;  %v225_v34 = vmul.f32 %v224_v59, %v1880_v39 }
  0x9b   :  { %s1807_s21 = sld [smem:[#allocation2 + $0x4d]]  ;;  %v196_v28 = vmul.f32 %v195_v14, %v1889_v35  ;;  %v102_v46 = vmul.f32 %v101_v24, %v1872_v12  ;;  %v1935_v29 = vmul.f32 %v75_v30, %v1896_v44  ;;  %v184_v23 = vmul.f32 %v183_v11, %v1889_v35  ;;  %v369_v30 = vpop.permute.xlu1 %368 }
  0x9c   :  { %s1814_s22 = sld [smem:[#allocation2 + $0x4e]]  ;;  %v193_v10 = vadd.f32 %v1750_v13, %v189_v18  ;;  %v1941_v59 = vmul.f32 %v108_v31, %v1896_v44  ;;  %v131_v13 = vmul.f32 %v130_v32, %v1896_v44  ;;  %v98_v24 = vmul.f32 %v97_v40, %v1896_v44 }
  0x9d   :  { %s1823_s10 = sld [smem:[#allocation2 + $0x4f]]  ;;  %v84_v11 = vadd.f32 %v1716_v53, %v80_v57  ;;  %v87_v31 = vmul.f32 %v86_v52, %v1896_v44  ;;  %v229_v40 = vadd.f32 %v1736_v3, %v225_v34  ;;  %v1967_v53 = vadd.f32 %v1662_v26, %v69_v4 }
  0x9e   :  { %s1829_s1 = sld [smem:[#allocation2 + $0x50]]  ;;  %v1970_v52 = vadd.f32 %v1665_v27, %v102_v46  ;;  %v2976_v3 = vstv %s2952_s20 }
  0x9f   :  { %s1834_s18 = sld [smem:[#allocation2 + $0x51]]  ;;  %v239_v45 = vstv %s1801_s0 }
  0xa0   :  { %s1841_s7 = sld [smem:[#allocation2 + $0x52]]  ;;  %v1883_v61 = vmul.f32 %v1505_v5, %v239_v45  ;;  %v91_v45 = vmul.f32 %v90_v33, %v1872_v12  ;;  %v366_v18 = vpop.permute.xlu0 %365 }
  0xa1   :  { %s2975_s25 = sld [smem:[#allocation50_spill]]  ;;  %v1960_v32 = vsel %vm58_vm0, %v366_v18, 0.0  ;;  %v2982_v18 = vstv %s2956_s6 }
  0xa2   :  { %v95_v14 = vadd.f32 %v1688_v41, %v91_v45  ;;  %v232_v41 = vmul.f32 %v231_v7, %v1889_v35  ;;  %v433_v57 = vmul.f32 %v2976_v3, %v1960_v32  ;;  %v88_v45 = vadd.f32 %v87_v31, %v84_v11  ;;  %s2978_s9 = sld [smem:[#allocation13_spill]] }
  0xa3   :  { %v343_v37 = vstv %s1823_s10  ;;  %s2980_s5 = sld [smem:[#allocation14_spill]] }
  0xa4   :  { %2957 = sst [smem:[#allocation28_spill]] %s1829_s1  ;;  %v1917_v33 = vmul.f32 %v1494_v1, %v343_v37  ;;  %v181_v37 = vadd.f32 %v180_v21, %v177_v51  ;;  %v128_v21 = vadd.f32 %v1681_v38, %v124_v62  ;;  %v113_v51 = vmul.f32 %v112_v54, %v1872_v12 }
  0xa5   :  { %v197_v38 = vadd.f32 %v196_v28, %v193_v10  ;;  %v1974_v54 = vsel %vm59_vm1, %v369_v30, 0.0  ;;  %v99_v7 = vadd.f32 %v98_v24, %v95_v14  ;;  %v2979_v28 = vstv %s1701_s26  ;;  %s2073_s26 = sld [smem:[#allocation2 + $0x55]] }
  0xa6   :  { %v447_v19 = vstv %s1841_s7  ;;  %v185_v62 = vadd.f32 %v184_v23, %v181_v37  ;;  %v132_v27 = vadd.f32 %v131_v13, %v128_v21  ;;  %v117_v4 = vadd.f32 %v116_v25, %v113_v51  ;;  %s2081_s4 = sld [smem:[#allocation2 + $0x5a]] }
  0xa7   :  { %v2977_v10 = vstv %s2975_s25  ;;  %v1983_v26 = vmul.f32 %v1516_v6, %v447_v19  ;;  %v213_v46 = vmul.f32 %v2979_v28, %v1880_v39  ;;  %v233_v37 = vadd.f32 %v232_v41, %v229_v40  ;;  %v1994_v19 = vpop.permute.xlu2 %545  ;;  %s3005_s20 = sld [smem:[#allocation19_spill]] }
  0xa8   :  { %v120_v34 = vmul.f32 %v2977_v10, %v1896_v44  ;;  %v198_v23 = vadd.f32 %v197_v38, %v99_v7  ;;  %v2981_v14 = vstv %s2953_s14  ;;  %v404_v30 = vmul.f32 %v2982_v18, %v1974_v54  ;;  %2983 = vst [vmem:[#allocation51_spill] sm:$0xff] %v1994_v19  ;;  %s2087_s14 = sld [smem:[#allocation2 + $0x5b]] }
  0xa9   :  { %v397_v24 = vmul.f32 %v2981_v14, %v1960_v32  ;;  %v186_v13 = vadd.f32 %v185_v62, %v88_v45  ;;  %v2984_v21 = vstv %s1675_s16  ;;  %v2985_v25 = vstv %s1691_s13  ;;  %s2023_s13 = sld [smem:[#allocation2 + $0x53]] }
  0xaa   :  { %v385_v11 = vmul.f32 %v2984_v21, %v1960_v32  ;;  %v392_v31 = vmul.f32 %v2985_v25, %v1974_v54  ;;  %v2986_v51 = vstv %s1767_s17  ;;  %v437_v41 = vadd.f32 %v1798_v15, %v433_v57  ;;  %s2993_s16 = sld [smem:[#allocation16_spill]] }
  0xab   :  { %v135_v40 = vmul.f32 %v2986_v51, %v1872_v12  ;;  %v2987_v38 = vstv %s2955_s15  ;;  %v401_v7 = vadd.f32 %v1810_v8, %v397_v24  ;;  %v2988_v62 = vstv %s1773_s19  ;;  %s2992_s15 = sld [smem:[#allocation15_spill]] }
  0xac   :  { %v440_v3 = vmul.f32 %v2987_v38, %v1974_v54  ;;  %v138_v10 = vmul.f32 %v2988_v62, %v1489_v0  ;;  %v2989_v45 = vstv %s2978_s9  ;;  %v2990_v14 = vstv %s2980_s5  ;;  %v521_v38 = vpop.permute.xlu1 %520  ;;  %s2048_s19 = sld [smem:[#allocation2 + $0x57]] }
  0xad   :  { %v165_v28 = vmul.f32 %v2989_v45, %v1880_v39  ;;  %v201_v18 = vmul.f32 %v2990_v14, %v1880_v39  ;;  %v389_v21 = vadd.f32 %v1844_v36, %v385_v11  ;;  %v2991_v15 = vstv %s1719_s23  ;;  %s2056_s23 = sld [smem:[#allocation2 + $0x58]] }
  0xae   :  { %v220_v57 = vmul.f32 %v2991_v15, %v1889_v35  ;;  %v234_v25 = vadd.f32 %v233_v37, %v132_v27  ;;  %v302_v8 = vadd.f32 %v1836_v60, %v198_v23  ;;  %v405_v24 = vadd.f32 %v404_v30, %v401_v7  ;;  %v496_v27 = vpop.permute.xlu0 %495  ;;  %s3004_s17 = sld [smem:[#allocation17_spill]] }
  0xaf   :  { %v217_v51 = vadd.f32 %v1851_v9, %v213_v46  ;;  %v290_v62 = vadd.f32 %v1855_v42, %v186_v13  ;;  %v393_v45 = vadd.f32 %v392_v31, %v389_v21  ;;  %v2994_v36 = vstv %s1783_s28  ;;  %s3003_s28 = sld [smem:[#allocation28_spill]] }
  0xb0   :  { %v142_v11 = vmul.f32 %v2994_v36, %v1896_v44  ;;  %v2995_v14 = vstv %s1793_s24  ;;  %v441_v16 = vadd.f32 %v440_v3, %v437_v41  ;;  %v406_v19 = vadd.f32 %v405_v24, %v302_v8  ;;  %s3007_s24 = sld [smem:[#allocation21_spill]] }
  0xb1   :  { %v237_v15 = vmul.f32 %v2995_v14, %v1880_v39  ;;  %v121_v37 = vadd.f32 %v120_v34, %v117_v4  ;;  %v2996_v60 = vstv %s1745_s2  ;;  %v169_v9 = vadd.f32 %v1704_v47, %v165_v28  ;;  %s2063_s2 = sld [smem:[#allocation2 + $0x54]] }
  0xb2   :  { %v421_v23 = vmul.f32 %v2996_v60, %v1960_v32  ;;  %v2997_v46 = vstv %s2992_s15  ;;  %v2998_v30 = vstv %s2993_s16  ;;  %v394_v31 = vadd.f32 %v393_v45, %v290_v62  ;;  %s3008_s6 = sld [smem:[#allocation22_spill]] }
  0xb3   :  { %v172_v42 = vmul.f32 %v2997_v46, %v1889_v35  ;;  %v208_v13 = vmul.f32 %v2998_v30, %v1889_v35  ;;  %v205_v7 = vadd.f32 %v1707_v48, %v201_v18  ;;  %v338_v41 = vadd.f32 %v1820_v63, %v234_v25  ;;  %v596_v25 = vpop.permute.xlu2 %595  ;;  %s2107_s1 = sld [smem:[#allocation2 + $0x5e]] }
  0xb4   :  { %v2046_v3 = vadd.f32 %v521_v38, %v406_v19  ;;  %v221_v34 = vadd.f32 %v220_v57, %v217_v51  ;;  %v2050_v47 = vadd.f32 %v496_v27, %v394_v31  ;;  %v139_v4 = vadd.f32 %v138_v10, %v135_v40  ;;  %s2120_s8 = sld [smem:[#allocation2 + $0x5f]] }
  0xb5   :  { %v241_v28 = vadd.f32 %v1883_v61, %v237_v15  ;;  %v2999_v21 = vstv %s1807_s21  ;;  %v442_v48 = vadd.f32 %v441_v16, %v338_v41  ;;  %v425_v19 = vadd.f32 %v1858_v17, %v421_v23  ;;  %s2095_s21 = sld [smem:[#allocation2 + $0x56]] }
  0xb6   :  { %v244_v8 = vmul.f32 %v2999_v21, %v1889_v35  ;;  %v1229_v63 = vmul.f32 -1.442695, %v2046_v3  ;;  %v3000_v18 = vstv %s1758_s30  ;;  %v1228_v40 = vmul.f32 -1.442695, %v2050_v47  ;;  %s2075_s30 = sld [smem:[#allocation2 + $0x59]]  ;;  %v571_v21 = vpop.permute.xlu1 %570 }
  0xb7   :  { %v428_v57 = vmul.f32 %v3000_v18, %v1974_v54  ;;  %v451_v10 = vstv %s2023_s13  ;;  %v3001_v61 = vstv %s1814_s22  ;;  %v3002_v51 = vstv %s1834_s18  ;;  %s2100_s22 = sld [smem:[#allocation2 + $0x5d]] }
  0xb8   :  { %v341_v24 = vmul.f32 %v3001_v61, %v1695_v43  ;;  %v445_v38 = vmul.f32 %v3002_v51, %v1960_v32  ;;  %v173_v16 = vadd.f32 %v172_v42, %v169_v9  ;;  %v209_v17 = vadd.f32 %v208_v13, %v205_v7  ;;  %s2116_s18 = sld [smem:[#allocation2 + $0x5c]] }
  0xb9   :  { %1361 = vpow2.f32 %v1229_v63  ;;  %v222_v62 = vadd.f32 %v221_v34, %v121_v37  ;;  %v77_v45 = vadd.f32 %v1935_v29, %v1967_v53  ;;  %v325_v36 = vadd.f32 %v1866_v56, %v1874_v22  ;;  %s2292_s0 = sld [smem:[#allocation4 + $0x1]] }
  0xba   :  { %1363 = vpow2.f32 %v1228_v40  ;;  %v245_v14 = vadd.f32 %v244_v8, %v241_v28  ;;  %v110_v15 = vadd.f32 %v1941_v59, %v1970_v52  ;;  %v2085_v27 = vadd.f32 %v596_v25, %v442_v48  ;;  %s2294_s3 = sld [smem:[#allocation4 + $0x19]] }
  0xbb   :  { %v429_v37 = vadd.f32 %v428_v57, %v425_v19  ;;  %v143_v60 = vadd.f32 %v142_v11, %v139_v4  ;;  %v345_v29 = vadd.f32 %v1917_v33, %v341_v24  ;;  %v3006_v53 = vstv %s3003_s28  ;;  %s2296_s10 = sld [smem:[#allocation4 + $0x31]] }
  0xbc   :  { %v348_v22 = vmul.f32 %v3006_v53, %v1762_v20  ;;  %v449_v56 = vadd.f32 %v1983_v26, %v445_v38  ;;  %v452_v23 = vmul.f32 %v451_v10, %v1974_v54  ;;  %v174_v59 = vadd.f32 %v173_v16, %v77_v45  ;;  %s2300_s7 = sld [smem:[#allocation4 + $0x49]] }
  0xbd   :  { %v210_v52 = vadd.f32 %v209_v17, %v110_v15  ;;  %v3009_v9 = vstv %s3004_s17  ;;  %v326_v46 = vadd.f32 %v325_v36, %v222_v62  ;;  %v3010_v33 = vstv %s3005_s20  ;;  %s2305_s27 = sld [smem:[#allocation4 + $0x4]] }
  0xbe   :  { %v373_v11 = vmul.f32 %v3009_v9, %v1960_v32  ;;  %v409_v42 = vmul.f32 %v3010_v33, %v1960_v32  ;;  %v246_v30 = vadd.f32 %v245_v14, %v143_v60  ;;  %v248_v13 = vstv %s2048_s19  ;;  %v621_v14 = vpop.permute.xlu0 %620  ;;  %s2307_s29 = sld [smem:[#allocation4 + $0x1c]] }
  0xbf   :  { %v251_v26 = vstv %s2056_s23  ;;  %v1362_v31 = vpop.eup %1361  ;;  %v3011_v7 = vstv %s3007_s24  ;;  %v3012_v34 = vstv %s3008_s6  ;;  %v1232_v28 = vmul.f32 -1.442695, %v2085_v27  ;;  %s2311_s25 = sld [smem:[#allocation4 + $0x34]] }
  0xc0   :  { %v380_v41 = vmul.f32 %v3011_v7, %v1974_v54  ;;  %v416_v4 = vmul.f32 %v3012_v34, %v1974_v54  ;;  %v430_v8 = vadd.f32 %v429_v37, %v326_v46  ;;  %v1364_v48 = vpop.eup %1363  ;;  %v349_v63 = vadd.f32 %v348_v22, %v345_v29  ;;  %s2313_s9 = sld [smem:[#allocation4 + $0x4c]] }
  0xc1   :  { %v453_v19 = vadd.f32 %v452_v23, %v449_v56  ;;  %v145_v18 = vstv %s2063_s2  ;;  %v148_v57 = vstv %s2073_s26  ;;  %v2122_v25 = vadd.f32 1.0, %v1362_v31  ;;  %s2315_s5 = sld [smem:[#allocation4 + $0xd]] }
  0xc2   :  { %v2124_v40 = vadd.f32 1.0, %v1364_v48  ;;  %v252_v10 = vmul.f32 %v1505_v5, %v251_v26  ;;  %v249_v61 = vmul.f32 %v248_v13, %v1880_v39  ;;  %v2128_v24 = vadd.f32 %v571_v21, %v430_v8  ;;  %s2317_s13 = sld [smem:[#allocation4 + $0x25]] }
  0xc3   :  { %v350_v51 = vadd.f32 %v349_v63, %v246_v30  ;;  %v255_v38 = vstv %s2075_s30  ;;  %v352_v16 = vstv %s2081_s4  ;;  %1365 = vrcp.f32 %v2122_v25  ;;  %s2319_s15 = sld [smem:[#allocation4 + $0x3d]] }
  0xc4   :  { %v355_v17 = vstv %s2087_s14  ;;  %v146_v62 = vmul.f32 %v145_v18, %v1872_v12  ;;  %v149_v45 = vmul.f32 %v148_v57, %v1489_v0  ;;  %v377_v36 = vadd.f32 %v1776_v49, %v373_v11  ;;  %s2323_s16 = sld [smem:[#allocation4 + $0x55]] }
  0xc5   :  { %v413_v5 = vadd.f32 %v1779_v50, %v409_v42  ;;  %1367 = vrcp.f32 %v2124_v40  ;;  %v152_v39 = vstv %s2095_s21  ;;  %v454_v15 = vadd.f32 %v453_v19, %v350_v51  ;;  %v3013_v51 = vld [vmem:[#allocation51_spill] sm:$0xff]  ;;  %s2325_s19 = sld [smem:[#allocation4 + $0xa]] }
  0xc6   :  { %1369 = vpow2.f32 %v1232_v28  ;;  %v253_v37 = vadd.f32 %v252_v10, %v249_v61  ;;  %v256_v60 = vmul.f32 %v255_v38, %v1889_v35  ;;  %v356_v29 = vmul.f32 %v1494_v1, %v355_v17  ;;  %v646_v17 = vpop.permute.xlu1 %645  ;;  %s2327_s23 = sld [smem:[#allocation4 + $0x22]] }
  0xc7   :  { %v456_v12 = vstv %s2100_s22  ;;  %v459_v53 = vstv %s2107_s1  ;;  %v353_v0 = vmul.f32 %v352_v16, %v1695_v43  ;;  %v1231_v49 = vmul.f32 -1.442695, %v2128_v24  ;;  %s2329_s2 = sld [smem:[#allocation4 + $0x3a]] }
  0xc8   :  { %v359_v22 = vstv %s2116_s18  ;;  %v150_v50 = vadd.f32 %v149_v45, %v146_v62  ;;  %v153_v56 = vmul.f32 %v152_v39, %v1896_v44  ;;  %v278_v23 = vadd.f32 %v1816_v55, %v174_v59  ;;  %s2331_s26 = sld [smem:[#allocation4 + $0x52]] }
  0xc9   :  { %v381_v9 = vadd.f32 %v380_v41, %v377_v36  ;;  %v2149_v11 = vadd.f32 %v621_v14, %v454_v15  ;;  %v463_v46 = vstv %s2120_s8  ;;  %v2152_v33 = vpop.eup %1365  ;;  %v417_v35 = vadd.f32 %v416_v4, %v413_v5  ;;  %s2333_s28 = sld [smem:[#allocation4 + $0x7]] }
  0xca   :  { %v460_v1 = vmul.f32 %v1516_v6, %v459_v53  ;;  %v257_v42 = vadd.f32 %v256_v60, %v253_v37  ;;  %v457_v43 = vmul.f32 %v456_v12, %v1960_v32  ;;  %v314_v13 = vadd.f32 %v1818_v2, %v210_v52  ;;  %s2335_s30 = sld [smem:[#allocation4 + $0x1f]] }
  0xcb   :  { %v1368_v30 = vpop.eup %1367  ;;  %v529_v44 = vmul.f32 %v2152_v33, %v2122_v25  ;;  %v357_v26 = vadd.f32 %v356_v29, %v353_v0  ;;  %v360_v55 = vmul.f32 %v359_v22, %v1762_v20  ;;  %1371 = vpow2.f32 %v1231_v49  ;;  %s2337_s17 = sld [smem:[#allocation4]] }
  0xcc   :  { %v1370_v59 = vpop.eup %1369  ;;  %v504_v31 = vmul.f32 %v1368_v30, %v2124_v40  ;;  %v154_v7 = vadd.f32 %v153_v56, %v150_v50  ;;  %v464_v41 = vmul.f32 %v463_v46, %v1974_v54  ;;  %v382_v6 = vadd.f32 %v381_v9, %v278_v23  ;;  %s2341_s4 = sld [smem:[#allocation4 + $0x18]] }
  0xcd   :  { %v530_v34 = vsub.f32 1.0, %v529_v44  ;;  %v1233_v32 = vmul.f32 -1.442695, %v2149_v11  ;;  %v418_v4 = vadd.f32 %v417_v35, %v314_v13  ;;  %v461_v52 = vadd.f32 %v460_v1, %v457_v43  ;;  %s2343_s20 = sld [smem:[#allocation4 + $0x30]] }
  0xce   :  { %v505_v28 = vsub.f32 1.0, %v504_v31  ;;  %v258_v2 = vadd.f32 %v257_v42, %v154_v7  ;;  %v512_v21 = vand.u32 2147483647, %v2124_v40  ;;  %v514_v8 = vand.u32 2147483648, %v2124_v40  ;;  %s2345_s14 = sld [smem:[#allocation4 + $0x48]] }
  0xcf   :  { %v361_v20 = vadd.f32 %v360_v55, %v357_v26  ;;  %v531_v48 = vmul.f32 %v2152_v33, %v530_v34  ;;  %vm509_vm2 = vweird.f32 %v1368_v30  ;;  %v465_v19 = vadd.f32 %v464_v41, %v461_v52  ;;  %s2347_s24 = sld [smem:[#allocation4 + $0x37]] }
  0xd0   :  { %v506_v63 = vmul.f32 %v1368_v30, %v505_v28  ;;  %v2166_v18 = vadd.f32 1.0, %v1370_v59  ;;  %1373 = vpow2.f32 %v1233_v32  ;;  %v2169_v54 = vadd.f32 %v1905_v58, %v382_v6  ;;  %s2349_s6 = sld [smem:[#allocation4 + $0x4f]] }
  0xd1   :  { %v1372_v57 = vpop.eup %1371  ;;  %vm508_vm3 = vweird.f32 %v2124_v40  ;;  %v362_v61 = vadd.f32 %v361_v20, %v258_v2  ;;  %v2173_v38 = vadd.f32 %v3013_v51, %v418_v4  ;;  %vm533_vm4 = vweird.f32 %v2122_v25  ;;  %3018 = sst [smem:[#allocation29_spill]] %s2337_s17 }
  0xd2   :  { %v507_v10 = vadd.f32 %v1368_v30, %v506_v63  ;;  %vm534_vm5 = vweird.f32 %v2152_v33  ;;  %vm510_vm6 = vmor %vm508_vm3, %vm509_vm2  ;;  %vm513_vm7 = vcmp.eq.f32.partialorder %v512_v21, 8.507059e+37  ;;  %v515_v16 = vor.u32 1.1754944e-38, %v514_v8  ;;  %3019 = sst [smem:[#allocation26_spill]] %s2341_s4 }
  0xd3   :  { %v532_v62 = vadd.f32 %v2152_v33, %v531_v48  ;;  %v466_v45 = vadd.f32 %v465_v19, %v362_v61  ;;  %v1227_v36 = vmul.f32 -1.442695, %v2169_v54  ;;  %v537_v40 = vand.u32 2147483647, %v2122_v25  ;;  %vm535_vm8 = vmor %vm533_vm4, %vm534_vm5  ;;  %3020 = sst [smem:[#allocation37_spill]] %s2343_s20 }
  0xd4   :  { %v511_v58 = vsel %vm510_vm6, %v1368_v30, %v507_v10  ;;  %v539_v5 = vand.u32 2147483648, %v2122_v25  ;;  %v2181_v14 = vadd.f32 1.0, %v1372_v57  ;;  %v1230_v60 = vmul.f32 -1.442695, %v2173_v38  ;;  %3021 = sst [smem:[#allocation30_spill]] %s2345_s14 }
  0xd5   :  { %v516_v39 = vsel %vm513_vm7, %v515_v16, %v511_v58  ;;  %v2186_v37 = vadd.f32 %v646_v17, %v466_v45  ;;  %1375 = vpow2.f32 %v1227_v36  ;;  %v536_v12 = vsel %vm535_vm8, %v2152_v33, %v532_v62  ;;  %s2351_s21 = sld [smem:[#allocation4 + $0x16]] }
  0xd6   :  { %v2184_v15 = vmul.f32 %v516_v39, %v2050_v47  ;;  %v1374_v29 = vpop.eup %1373  ;;  %1377 = vrcp.f32 %v2166_v18  ;;  %v540_v47 = vor.u32 1.1754944e-38, %v539_v5  ;;  %vm538_vm9 = vcmp.eq.f32.partialorder %v537_v40, 8.507059e+37  ;;  %s2353_s22 = sld [smem:[#allocation4 + $0x2e]] }
  0xd7   :  { %1379 = vpow2.f32 %v1230_v60  ;;  %v1234_v53 = vmul.f32 -1.442695, %v2186_v37  ;;  %v2201_v49 = vadd.f32 1.0, %v1374_v29  ;;  %vm608_vm6 = vweird.f32 %v2166_v18  ;;  %s2355_s1 = sld [smem:[#allocation4 + $0x46]] }
  0xd8   :  { %722 = vrot.lane.b32.xlu0 %v2184_v15, %s3014_s11  ;;  %719 = vrot.lane.b32.xlu1 %v2184_v15, %s3015_s12  ;;  %1381 = vrcp.f32 %v2181_v14  ;;  %v541_v0 = vsel %vm538_vm9, %v540_v47, %v536_v12  ;;  %v614_v62 = vand.u32 2147483648, %v2166_v18  ;;  %v589_v58 = vand.u32 2147483648, %v2181_v14  ;;  %s2357_s18 = sld [smem:[#allocation4 + $0x5e]] }
  0xd9   :  { %v2206_v56 = vmul.f32 %v541_v0, %v2046_v3  ;;  %1383 = vpow2.f32 %v1234_v53  ;;  %v612_v36 = vand.u32 2147483647, %v2166_v18  ;;  %vm583_vm8 = vweird.f32 %v2181_v14  ;;  %s2359_s8 = sld [smem:[#allocation4 + $0x13]] }
  0xda   :  { %v587_v40 = vand.u32 2147483647, %v2181_v14  ;;  %s2365_s20 = sld [smem:[#allocation4 + $0x5b]] }
  0xdb   :  { %v1376_v25 = vpop.eup %1375  ;;  %3022 = sst [smem:[#allocation39_spill]] %s2351_s21 }
  0xdc   :  { %v477_v22 = vadd.f32 1.0, %v1376_v25  ;;  %v2203_v50 = vpop.eup %1377  ;;  %v639_v25 = vand.u32 2147483648, %v2201_v49  ;;  %3023 = sst [smem:[#allocation18_spill]] %s2353_s22 }
  0xdd   :  { %v1380_v23 = vpop.eup %1379  ;;  %v604_v33 = vmul.f32 %v2203_v50, %v2166_v18  ;;  %vm609_vm15 = vweird.f32 %v2203_v50  ;;  %3024 = sst [smem:[#allocation20_spill]] %s2355_s1 }
  0xde   :  { %1385 = vrcp.f32 %v477_v22  ;;  %v2208_v9 = vpop.eup %1381  ;;  %v552_v46 = vadd.f32 1.0, %v1380_v23  ;;  %v489_v59 = vand.u32 2147483648, %v477_v22  ;;  %v487_v41 = vand.u32 2147483647, %v477_v22  ;;  %vm2240_vm7 = vmor %vm608_vm6, %vm609_vm15  ;;  %3025 = sst [smem:[#allocation40_spill]] %s2357_s18 }
  0xdf   :  { %1387 = vrcp.f32 %v2201_v49  ;;  %v579_v35 = vmul.f32 %v2208_v9, %v2181_v14  ;;  %v1384_v3 = vpop.eup %1383  ;;  %v605_v30 = vsub.f32 1.0, %v604_v33  ;;  %vm483_vm11 = vweird.f32 %v477_v22  ;;  %s2367_s14 = sld [smem:[#allocation4 + $0x10]] }
  0xe0   :  { %773 = vrot.lane.b32.xlu1 %v2206_v56, %s3015_s12  ;;  %1389 = vrcp.f32 %v552_v46  ;;  %v2219_v26 = vadd.f32 1.0, %v1384_v3  ;;  %v564_v2 = vand.u32 2147483648, %v552_v46  ;;  %v490_v52 = vor.u32 1.1754944e-38, %v489_v59  ;;  %3027 = sst [smem:[#allocation42_spill]] %s2365_s20 }
  0xe1   :  { %v580_v13 = vsub.f32 1.0, %v579_v35  ;;  %v606_v6 = vmul.f32 %v2203_v50, %v605_v30  ;;  %v562_v8 = vand.u32 2147483647, %v552_v46  ;;  %vm488_vm14 = vcmp.eq.f32.partialorder %v487_v41, 8.507059e+37  ;;  %s2369_s4 = sld [smem:[#allocation4 + $0x28]] }
  0xe2   :  { %1391 = vrcp.f32 %v2219_v26  ;;  %vm558_vm2 = vweird.f32 %v552_v46  ;;  %vm584_vm3 = vweird.f32 %v2208_v9  ;;  %v565_v10 = vor.u32 1.1754944e-38, %v564_v2  ;;  %s2371_s17 = sld [smem:[#allocation4 + $0x40]] }
  0xe3   :  { %v581_v34 = vmul.f32 %v2208_v9, %v580_v13  ;;  %v607_v19 = vadd.f32 %v2203_v50, %v606_v6  ;;  %vm563_vm5 = vcmp.eq.f32.partialorder %v562_v8, 8.507059e+37  ;;  %vm585_vm9 = vmor %vm583_vm8, %vm584_vm3  ;;  %v590_v14 = vor.u32 1.1754944e-38, %v589_v58  ;;  %s2373_s22 = sld [smem:[#allocation4 + $0x58]] }
  0xe4   :  { %v1386_v1 = vpop.eup %1385  ;;  %v637_v23 = vand.u32 2147483647, %v2201_v49  ;;  %v640_v33 = vor.u32 1.1754944e-38, %v639_v25  ;;  %vm658_vm3 = vweird.f32 %v2219_v26  ;;  %v662_v3 = vand.u32 2147483647, %v2219_v26  ;;  %s2375_s1 = sld [smem:[#allocation4 + $0x2]] }
  0xe5   :  { %v479_v42 = vmul.f32 %v1386_v1, %v477_v22  ;;  %v2217_v43 = vpop.eup %1387  ;;  %vm484_vm10 = vweird.f32 %v1386_v1  ;;  %v582_v61 = vadd.f32 %v2208_v9, %v581_v34  ;;  %v611_v39 = vsel %vm2240_vm7, %v2203_v50, %v607_v19  ;;  %3028 = sst [smem:[#allocation31_spill]] %s2367_s14 }
  0xe6   :  { %v1390_v44 = vpop.eup %1389  ;;  %v629_v32 = vmul.f32 %v2217_v43, %v2201_v49  ;;  %vm485_vm12 = vmor %vm483_vm11, %vm484_vm10  ;;  %vm613_vm10 = vcmp.eq.f32.partialorder %v612_v36, 8.507059e+37  ;;  %vm588_vm11 = vcmp.eq.f32.partialorder %v587_v40, 8.507059e+37  ;;  %vm638_vm15 = vcmp.eq.f32.partialorder %v637_v23, 8.507059e+37  ;;  %s2377_s18 = sld [smem:[#allocation4 + $0x1a]] }
  0xe7   :  { %v480_v55 = vsub.f32 1.0, %v479_v42  ;;  %v554_v31 = vmul.f32 %v1390_v44, %v552_v46  ;;  %vm559_vm13 = vweird.f32 %v1390_v44  ;;  %v586_v60 = vsel %vm585_vm9, %v2208_v9, %v582_v61  ;;  %3029 = sst [smem:[#allocation41_spill]] %s2369_s4 }
  0xe8   :  { %vm560_vm4 = vmor %vm558_vm2, %vm559_vm13  ;;  %v630_v51 = vsub.f32 1.0, %v629_v32  ;;  %v1392_v17 = vpop.eup %1391  ;;  %v591_v47 = vsel %vm588_vm11, %v590_v14, %v586_v60  ;;  %vm633_vm13 = vweird.f32 %v2201_v49  ;;  %3030 = sst [smem:[#allocation33_spill]] %s2371_s17  ;;  %v741_v30 = vstv %s2307_s29 }
  0xe9   :  { %v481_v7 = vmul.f32 %v1386_v1, %v480_v55  ;;  %v555_v4 = vsub.f32 1.0, %v554_v31  ;;  %v654_v18 = vmul.f32 %v1392_v17, %v2219_v26  ;;  %v2271_v50 = vmul.f32 %v591_v47, %v2128_v24  ;;  %3031 = sst [smem:[#allocation43_spill]] %s2373_s22 }
  0xea   :  { %v631_v29 = vmul.f32 %v2217_v43, %v630_v51  ;;  %vm659_vm2 = vweird.f32 %v1392_v17  ;;  %v664_v24 = vand.u32 2147483648, %v2219_v26  ;;  %3032 = sst [smem:[#allocation49_spill]] %s2375_s1  ;;  %v753_v13 = vstv %s2311_s25 }
  0xeb   :  { %v482_v28 = vadd.f32 %v1386_v1, %v481_v7  ;;  %v556_v21 = vmul.f32 %v1390_v44, %v555_v4  ;;  %v655_v0 = vsub.f32 1.0, %v654_v18  ;;  %s2379_s21 = sld [smem:[#allocation4 + $0x32]]  ;;  %v679_v26 = vstv %s2292_s0 }
  0xec   :  { %v632_v53 = vadd.f32 %v2217_v43, %v631_v29  ;;  %v665_v42 = vor.u32 1.1754944e-38, %v664_v24  ;;  %3033 = sst [smem:[#allocation34_spill]] %s2377_s18  ;;  %v690_v55 = vstv %s2294_s3  ;;  %v701_v59 = vstv %s2296_s10 }
  0xed   :  { %v486_v20 = vsel %vm485_vm12, %v1386_v1, %v482_v28  ;;  %v557_v63 = vadd.f32 %v1390_v44, %v556_v21  ;;  %vm634_vm12 = vweird.f32 %v2217_v43  ;;  %v656_v46 = vmul.f32 %v1392_v17, %v655_v0  ;;  %s2383_s20 = sld [smem:[#allocation4 + $0x8]] }
  0xee   :  { %v491_v48 = vsel %vm488_vm14, %v490_v52, %v486_v20  ;;  %vm635_vm14 = vmor %vm633_vm13, %vm634_vm12  ;;  %s2385_s4 = sld [smem:[#allocation4 + $0x20]]  ;;  %v712_v31 = vstv %s2300_s7  ;;  %v2421_v41 = vmul.f32 %v741_v30, %v2184_v15  ;;  %v2424_v6 = vmul.f32 %v753_v13, %v2184_v15 }
  0xef   :  { %v2230_v57 = vmul.f32 %v491_v48, %v2169_v54  ;;  %v561_v16 = vsel %vm560_vm4, %v1390_v44, %v557_v63  ;;  %v636_v9 = vsel %vm635_vm14, %v2217_v43, %v632_v53  ;;  %v657_v35 = vadd.f32 %v1392_v17, %v656_v46  ;;  %vm660_vm4 = vmor %vm658_vm3, %vm659_vm2  ;;  %s2387_s17 = sld [smem:[#allocation4 + $0x38]] }
  0xf0   :  { %v566_v45 = vsel %vm563_vm5, %v565_v10, %v561_v16  ;;  %vm663_vm5 = vcmp.eq.f32.partialorder %v662_v3, 8.507059e+37  ;;  %s2389_s22 = sld [smem:[#allocation4 + $0x50]]  ;;  %v765_v44 = vstv %s2313_s9  ;;  %v891_v32 = vstv %s2315_s5 }
  0xf1   :  { %669 = vrot.lane.b32.xlu2 %v2230_v57, %s3015_s12  ;;  %v2248_v5 = vmul.f32 %v566_v45, %v2173_v38  ;;  %v615_v38 = vor.u32 1.1754944e-38, %v614_v62  ;;  %v661_v1 = vsel %vm660_vm4, %v1392_v17, %v657_v35  ;;  %3034 = sst [smem:[#allocation36_spill]] %s2379_s21  ;;  %v2429_v34 = vmul.f32 %v765_v44, %v2184_v15 }
  0xf2   :  { %v666_v43 = vsel %vm663_vm5, %v665_v42, %v661_v1  ;;  %s2391_s1 = sld [smem:[#allocation4 + $0x5]]  ;;  %v903_v4 = vstv %s2317_s13  ;;  %v783_v28 = vstv %s2333_s28  ;;  %v915_v2 = vstv %s2319_s15 }
  0xf3   :  { %827 = vrot.lane.b32.xlu0 %v2248_v5, %s3015_s12  ;;  %830 = vrot.lane.b32.xlu1 %v2248_v5, %s3014_s11  ;;  %v616_v12 = vsel %vm613_vm10, %v615_v38, %v611_v39  ;;  %3036 = sst [smem:[#allocation44_spill]] %s2383_s20  ;;  %v927_v52 = vstv %s2323_s16  ;;  %v837_v21 = vstv %s2325_s19  ;;  %v2449_v19 = vmul.f32 %v891_v32, %v2271_v50 }
  0xf4   :  { %v2268_v22 = vmul.f32 %v616_v12, %v2085_v27  ;;  %v641_v27 = vsel %vm638_vm15, %v640_v33, %v636_v9  ;;  %3037 = sst [smem:[#allocation46_spill]] %s2385_s4  ;;  %v795_v8 = vstv %s2335_s30  ;;  %v849_v20 = vstv %s2327_s23 }
  0xf5   :  { %v2284_v49 = vmul.f32 %v641_v27, %v2149_v11  ;;  %v2303_v11 = vmul.f32 %v666_v43, %v2186_v37  ;;  %3038 = sst [smem:[#allocation9_spill]] %s2387_s17  ;;  %v729_v37 = vstv %s2305_s27  ;;  %v861_v48 = vstv %s2329_s2 }
  0xf6   :  { %3039 = sst [smem:[#allocation25_spill]] %s2389_s22  ;;  %v2418_v7 = vmul.f32 %v729_v37, %v2184_v15  ;;  %v807_v15 = vstv %s2347_s24  ;;  %v819_v63 = vstv %s2349_s6  ;;  %v2452_v10 = vmul.f32 %v903_v4, %v2271_v50 }
  0xf7   :  { %s2393_s18 = sld [smem:[#allocation4 + $0x1d]]  ;;  %v873_v61 = vstv %s2331_s26  ;;  %v2458_v51 = vmul.f32 %v783_v28, %v2206_v56  ;;  %v2461_v16 = vmul.f32 %v915_v2, %v2271_v50  ;;  %v2464_v17 = vmul.f32 %v927_v52, %v2271_v50 }
  0xf8   :  { %s2395_s21 = sld [smem:[#allocation4 + $0x35]]  ;;  %v2469_v62 = vmul.f32 %v795_v8, %v2206_v56  ;;  %v999_v58 = vstv %s2359_s8  ;;  %v2475_v45 = vmul.f32 %v807_v15, %v2206_v56  ;;  %v2478_v54 = vmul.f32 %v819_v63, %v2206_v56 }
  0xf9   :  { %672 = vrot.lane.b32.xlu2 %v2230_v57, %s3014_s11  ;;  %s2399_s14 = sld [smem:[#allocation4 + $0x3]]  ;;  %v2494_v47 = vmul.f32 %v999_v58, %v2284_v49  ;;  %v680_v33 = vmul.f32 %v679_v26, %v2230_v57  ;;  %v691_v27 = vmul.f32 %v690_v55, %v2230_v57  ;;  %v702_v35 = vmul.f32 %v701_v59, %v2230_v57 }
  0xfa   :  { %s2401_s20 = sld [smem:[#allocation4 + $0x1b]]  ;;  %v713_v24 = vmul.f32 %v712_v31, %v2230_v57  ;;  %v2542_v43 = vmul.f32 %v837_v21, %v2248_v5  ;;  %v2545_v37 = vmul.f32 %v849_v20, %v2248_v5  ;;  %v733_v52 = vstv %s2391_s1 }
  0xfb   :  { %884 = vrot.lane.b32.xlu0 %v2271_v50, %s3014_s11  ;;  %935 = vrot.lane.b32.xlu1 %v2268_v22, %s3015_s12  ;;  %s2405_s17 = sld [smem:[#allocation4 + $0x33]] }
  0xfc   :  { %s2408_s22 = sld [smem:[#allocation4 + $0x4b]] }
  0xfd   :  { %s2414_s4 = sld [smem:[#allocation4 + $0xc]]  ;;  %v745_v21 = vstv %s2393_s18 }
  0xfe   :  { %s2426_s0 = sld [smem:[#allocation4 + $0x24]] }
  0xff   :  { %s2433_s3 = sld [smem:[#allocation4 + $0x3c]]  ;;  %v726_v26 = vstv %s2399_s14 }
 0x100   :  { %s2437_s10 = sld [smem:[#allocation4 + $0x54]] }
 0x101   :  { %776 = vrot.lane.b32.xlu2 %v2206_v56, %s3014_s11  ;;  %s2442_s7 = sld [smem:[#allocation4 + $0x9]]  ;;  %v750_v55 = vstv %s2405_s17 }
 0x102   :  { %s3041_s29 = sld [smem:[#allocation42_spill]]  ;;  %v762_v20 = vstv %s2408_s22 }
 0x103   :  { %989 = vrot.lane.b32.xlu0 %v2284_v49, %s3015_s12  ;;  %992 = vrot.lane.b32.xlu1 %v2284_v49, %s3014_s11  ;;  %s3042_s25 = sld [smem:[#allocation31_spill]] }
 0x104   :  { %s2454_s9 = sld [smem:[#allocation4 + $0x21]] }
 0x105   :  { %s3043_s5 = sld [smem:[#allocation41_spill]] }
 0x106   :  { %s3044_s13 = sld [smem:[#allocation33_spill]] }
 0x107   :  { %s3045_s15 = sld [smem:[#allocation39_spill]] }
 0x108   :  { %s3046_s16 = sld [smem:[#allocation18_spill]]  ;;  %v1035_v39 = vstv %s3041_s29 }
 0x109   :  { %881 = vrot.lane.b32.xlu2 %v2271_v50, %s3015_s12  ;;  %s2466_s19 = sld [smem:[#allocation4 + $0x39]]  ;;  %v945_v60 = vstv %s3042_s25  ;;  %v2509_v50 = vmul.f32 %v1035_v39, %v2284_v49 }
 0x10a   :  { %s3048_s23 = sld [smem:[#allocation20_spill]]  ;;  %v2512_v23 = vmul.f32 %v945_v60, %v2268_v22  ;;  %v757_v60 = vstv %s2395_s21 }
 0x10b   :  { %1046 = vrot.lane.b32.xlu0 %v2303_v11, %s3014_s11  ;;  %s2472_s28 = sld [smem:[#allocation4 + $0x51]]  ;;  %v957_v29 = vstv %s3043_s5 }
 0x10c   :  { %s3049_s30 = sld [smem:[#allocation40_spill]]  ;;  %v969_v18 = vstv %s3044_s13  ;;  %v2515_v9 = vmul.f32 %v957_v29, %v2268_v22 }
 0x10d   :  { %s3050_s24 = sld [smem:[#allocation43_spill]]  ;;  %v1053_v38 = vstv %s3045_s15  ;;  %v2518_v46 = vmul.f32 %v969_v18, %v2268_v22 }
 0x10e   :  { %s2482_s6 = sld [smem:[#allocation4 + $0x6]]  ;;  %v1065_v14 = vstv %s3046_s16 }
 0x10f   :  { %3047 = sst [smem:[#allocation38_spill]] %s2466_s19  ;;  %v2532_v3 = vmul.f32 %v1065_v14, %v2303_v11 }
 0x110   :  { %s2488_s19 = sld [smem:[#allocation4 + $0x1e]]  ;;  %v1077_v12 = vstv %s3048_s23 }
 0x111   :  { %938 = vrot.lane.b32.xlu2 %v2268_v22, %s3014_s11  ;;  %s2361_s11 = sld [smem:[#allocation4 + $0x2b]]  ;;  %v2535_v1 = vmul.f32 %v1077_v12, %v2303_v11 }
 0x112   :  { %s2496_s8 = sld [smem:[#allocation4 + $0x36]]  ;;  %v1089_v56 = vstv %s3049_s30 }
 0x113   :  { %v981_v25 = vstv %s3050_s24  ;;  %s3052_s29 = sld [smem:[#allocation26_spill]]  ;;  %v2550_v30 = vmul.f32 %v1089_v56, %v2303_v11 }
 0x114   :  { %s2524_s25 = sld [smem:[#allocation4 + $0x11]]  ;;  %v2538_v42 = vmul.f32 %v981_v25, %v2268_v22  ;;  %v738_v22 = vstv %s2401_s20 }
 0x115   :  { %s2526_s5 = sld [smem:[#allocation4 + $0x29]] }
 0x116   :  { %s3053_s13 = sld [smem:[#allocation37_spill]] }
 0x117   :  { %v1011_v36 = vstv %s2361_s11  ;;  %s3051_s11 = sld [smem:[#allocation29_spill]] }
 0x118   :  { %v2500_v53 = vmul.f32 %v1011_v36, %v2284_v49  ;;  %s3054_s15 = sld [smem:[#allocation30_spill]] }
 0x119   :  { %1043 = vrot.lane.b32.xlu2 %v2303_v11, %s3015_s12  ;;  %s2363_s12 = sld [smem:[#allocation4 + $0x43]]  ;;  %v687_v13 = vstv %s3052_s29 }
 0x11a   :  { %s3055_s16 = sld [smem:[#allocation49_spill]] }
 0x11b   :  { %s2547_s23 = sld [smem:[#allocation4 + $0x41]] }
 0x11c   :  { %s2556_s30 = sld [smem:[#allocation4 + $0x59]]  ;;  %v698_v31 = vstv %s3053_s13 }
 0x11d   :  { %v676_v57 = vstv %s3051_s11  ;;  %s2563_s24 = sld [smem:[#allocation4 + $0xe]] }
 0x11e   :  { %v709_v32 = vstv %s3054_s15  ;;  %s2570_s17 = sld [smem:[#allocation4 + $0x26]] }
 0x11f   :  { %3026 = sst [smem:[#allocation32_spill]] %s2363_s12 }
 0x120   :  { %s2381_s12 = sld [smem:[#allocation4 + $0x4a]]  ;;  %v683_v4 = vstv %s3055_s16 }
 0x121   :  { %s3040_s27 = sld [smem:[#allocation32_spill]] }
 0x122   :  { %s3057_s20 = sld [smem:[#allocation34_spill]] }
 0x123   :  { %s3058_s14 = sld [smem:[#allocation36_spill]] }
 0x124   :  { %s2574_s29 = sld [smem:[#allocation4 + $0x3e]] }
 0x125   :  { %s2578_s1 = sld [smem:[#allocation4 + $0x56]] }
 0x126   :  { %3035 = sst [smem:[#allocation23_spill]] %s2381_s12 }
 0x127   :  { %s2397_s12 = sld [smem:[#allocation4 + $0x4d]]  ;;  %v1023_v40 = vstv %s3040_s27 }
 0x128   :  { %v2503_v0 = vmul.f32 %v1023_v40, %v2284_v49  ;;  %s2506_s27 = sld [smem:[#allocation4 + $0x4e]]  ;;  %v2529_v49 = vmul.f32 %v1053_v38, %v2303_v11  ;;  %v694_v56 = vstv %s3057_s20 }
 0x129   :  { %s3059_s11 = sld [smem:[#allocation23_spill]]  ;;  %v705_v25 = vstv %s3058_s14 }
 0x12a   :  { %s2581_s22 = sld [smem:[#allocation4 + $0xb]] }
 0x12b   :  { %s2586_s18 = sld [smem:[#allocation4 + $0x23]] }
 0x12c   :  { %s2591_s21 = sld [smem:[#allocation4 + $0x3b]] }
 0x12d   :  { %v769_v29 = vstv %s2397_s12  ;;  %s2593_s12 = sld [smem:[#allocation4 + $0x53]] }
 0x12e   :  { %s2596_s13 = sld [smem:[#allocation4 + $0x15]] }
 0x12f   :  { %s2603_s15 = sld [smem:[#allocation4 + $0x2d]] }
 0x130   :  { %s2607_s16 = sld [smem:[#allocation4 + $0x45]] }
 0x131   :  { %s3061_s20 = sld [smem:[#allocation46_spill]] }
 0x132   :  { %s3064_s14 = sld [smem:[#allocation25_spill]] }
 0x133   :  { %s2635_s2 = sld [smem:[#allocation4 + $0xf]] }
 0x134   :  { %s3066_s26 = sld [smem:[#allocation38_spill]] }
 0x14a   :  { %v723_v44 = vpop.permute.xlu0 %722  ;;  %v720_v59 = vpop.permute.xlu1 %719 }
 0x14b   :  { %v721_v2 = vsel %vm58_vm0, %v720_v59, 0.0  ;;  %v670_v11 = vpop.permute.xlu2 %669  ;;  %v724_v8 = vsel %vm59_vm1, %v723_v44, 0.0  ;;  %v716_v44 = vstv %s3059_s11  ;;  %s2613_s11 = sld [smem:[#allocation4 + $0x2a]] }
 0x14c   :  { %v671_v15 = vsel %vm58_vm0, %v670_v11, 0.0  ;;  %v727_v63 = vmul.f32 %v726_v26, %v721_v2  ;;  %v739_v58 = vmul.f32 %v738_v22, %v721_v2  ;;  %v751_v36 = vmul.f32 %v750_v55, %v721_v2 }
 0x14d   :  { %v677_v40 = vmul.f32 %v676_v57, %v671_v15  ;;  %v688_v39 = vmul.f32 %v687_v13, %v671_v15  ;;  %v699_v18 = vmul.f32 %v698_v31, %v671_v15  ;;  %v710_v38 = vmul.f32 %v709_v32, %v671_v15 }
 0x14e   :  { %v731_v14 = vadd.f32 %v2418_v7, %v727_v63  ;;  %v763_v12 = vmul.f32 %v762_v20, %v721_v2  ;;  %v734_v26 = vmul.f32 %v733_v52, %v724_v8  ;;  %v746_v57 = vmul.f32 %v745_v21, %v724_v8 }
 0x14f   :  { %v743_v13 = vadd.f32 %v2421_v41, %v739_v58  ;;  %v755_v22 = vadd.f32 %v2424_v6, %v751_v36  ;;  %v681_v7 = vadd.f32 %v680_v33, %v677_v40  ;;  %v692_v59 = vadd.f32 %v691_v27, %v688_v39 }
 0x150   :  { %v767_v55 = vadd.f32 %v2429_v34, %v763_v12  ;;  %v758_v31 = vmul.f32 %v757_v60, %v724_v8  ;;  %v770_v32 = vmul.f32 %v769_v29, %v724_v8  ;;  %v703_v11 = vadd.f32 %v702_v35, %v699_v18 }
 0x151   :  { %v714_v52 = vadd.f32 %v713_v24, %v710_v38  ;;  %v735_v21 = vadd.f32 %v734_v26, %v731_v14  ;;  %v780_v41 = vstv %s2482_s6  ;;  %v792_v20 = vstv %s2488_s19  ;;  %s3060_s6 = sld [smem:[#allocation44_spill]] }
 0x152   :  { %v774_v2 = vpop.permute.xlu1 %773  ;;  %v804_v15 = vstv %s2496_s8  ;;  %v816_v34 = vstv %s2506_s27  ;;  %v747_v27 = vadd.f32 %v746_v57, %v743_v13  ;;  %v759_v8 = vadd.f32 %v758_v31, %v755_v22  ;;  %s2609_s19 = sld [smem:[#allocation4 + $0x5d]] }
 0x153   :  { %v673_v6 = vpop.permute.xlu2 %672  ;;  %v775_v63 = vsel %vm58_vm0, %v774_v2, 0.0  ;;  %v771_v35 = vadd.f32 %v770_v32, %v767_v55  ;;  %s2611_s8 = sld [smem:[#allocation4 + $0x12]]  ;;  %v2625_v26 = vmul.f32 %v873_v61, %v2248_v5  ;;  %v888_v31 = vstv %s2414_s4 }
 0x154   :  { %v674_v33 = vsel %vm59_vm1, %v673_v6, 0.0  ;;  %v781_v39 = vmul.f32 %v780_v41, %v775_v63  ;;  %v793_v60 = vmul.f32 %v792_v20, %v775_v63  ;;  %v805_v29 = vmul.f32 %v804_v15, %v775_v63  ;;  %s3063_s27 = sld [smem:[#allocation9_spill]] }
 0x155   :  { %v684_v24 = vmul.f32 %v683_v4, %v674_v33  ;;  %v695_v58 = vmul.f32 %v694_v56, %v674_v33  ;;  %v706_v36 = vmul.f32 %v705_v25, %v674_v33  ;;  %v717_v40 = vmul.f32 %v716_v44, %v674_v33  ;;  %3065 = sst [smem:[#allocation11_spill]] %s2613_s11 }
 0x156   :  { %v817_v18 = vmul.f32 %v816_v34, %v775_v63  ;;  %v799_v25 = vstv %s3061_s20  ;;  %v2620_v44 = vmul.f32 %v861_v48, %v2248_v5  ;;  %s2629_s11 = sld [smem:[#allocation4 + $0x5a]]  ;;  %v900_v48 = vstv %s2426_s0 }
 0x157   :  { %v685_v38 = vadd.f32 %v684_v24, %v681_v7  ;;  %v696_v14 = vadd.f32 %v695_v58, %v692_v59  ;;  %v707_v4 = vadd.f32 %v706_v36, %v703_v11  ;;  %v718_v12 = vadd.f32 %v717_v40, %v714_v52  ;;  %s2648_s20 = sld [smem:[#allocation4 + $0x3f]] }
 0x158   :  { %v787_v56 = vstv %s3060_s6  ;;  %v823_v59 = vstv %s3064_s14  ;;  %v785_v5 = vadd.f32 %v2458_v51, %v781_v39  ;;  %v797_v61 = vadd.f32 %v2469_v62, %v793_v60  ;;  %s2641_s6 = sld [smem:[#allocation4 + $0x27]] }
 0x159   :  { %3062 = sst [smem:[#allocation10_spill]] %s2611_s8  ;;  %v736_v57 = vadd.f32 %v735_v21, %v685_v38  ;;  %v748_v13 = vadd.f32 %v747_v27, %v696_v14  ;;  %v760_v22 = vadd.f32 %v759_v8, %v707_v4  ;;  %v772_v55 = vadd.f32 %v771_v35, %v718_v12 }
 0x15a   :  { %s2627_s8 = sld [smem:[#allocation4 + $0x42]]  ;;  %v811_v7 = vstv %s3063_s27  ;;  %v809_v2 = vadd.f32 %v2475_v45, %v805_v29  ;;  %v821_v11 = vadd.f32 %v2478_v54, %v817_v18  ;;  %v912_v21 = vstv %s2433_s3 }
 0x15b   :  { %v777_v32 = vpop.permute.xlu2 %776  ;;  %v924_v41 = vstv %s2437_s10  ;;  %v834_v6 = vstv %s2442_s7  ;;  %s2650_s27 = sld [smem:[#allocation4 + $0x57]]  ;;  %v846_v54 = vstv %s2454_s9  ;;  %v858_v15 = vstv %s3066_s26 }
 0x15c   :  { %v778_v52 = vsel %vm59_vm1, %v777_v32, 0.0  ;;  %v870_v34 = vstv %s2472_s28  ;;  %v949_v63 = vstv %s2524_s25  ;;  %s2656_s3 = sld [smem:[#allocation4 + $0x17]]  ;;  %v961_v24 = vstv %s2526_s5 }
 0x15d   :  { %v788_v51 = vmul.f32 %v787_v56, %v778_v52  ;;  %v800_v62 = vmul.f32 %v799_v25, %v778_v52  ;;  %v812_v20 = vmul.f32 %v811_v7, %v778_v52  ;;  %v824_v45 = vmul.f32 %v823_v59, %v778_v52  ;;  %s2658_s10 = sld [smem:[#allocation4 + $0x2f]] }
 0x15e   :  { %v895_v40 = vstv %s2563_s24  ;;  %s2672_s7 = sld [smem:[#allocation4 + $0x47]]  ;;  %v907_v38 = vstv %s2570_s17  ;;  %v919_v14 = vstv %s2574_s29  ;;  %v931_v4 = vstv %s2578_s1 }
 0x15f   :  { %v789_v33 = vadd.f32 %v788_v51, %v785_v5  ;;  %v801_v27 = vadd.f32 %v800_v62, %v797_v61  ;;  %v813_v8 = vadd.f32 %v812_v20, %v809_v2  ;;  %v825_v35 = vadd.f32 %v824_v45, %v821_v11  ;;  %s3067_s9 = sld [smem:[#allocation10_spill]] }
 0x160   :  { %s3068_s28 = sld [smem:[#allocation11_spill]]  ;;  %v841_v12 = vstv %s2581_s22  ;;  %v853_v25 = vstv %s2586_s18  ;;  %v942_v62 = vstv %s2635_s2  ;;  %v954_v20 = vstv %s2641_s6 }
 0x161   :  { %v2664_v39 = vadd.f32 %v789_v33, %v736_v57  ;;  %v2666_v60 = vadd.f32 %v801_v27, %v748_v13  ;;  %v2668_v29 = vadd.f32 %v813_v8, %v760_v22  ;;  %v2670_v18 = vadd.f32 %v825_v35, %v772_v55  ;;  %s2678_s14 = sld [smem:[#allocation4 + $0x14]] }
 0x162   :  { %v865_v57 = vstv %s2591_s21  ;;  %v877_v13 = vstv %s2593_s12  ;;  %s2684_s26 = sld [smem:[#allocation4 + $0x2c]]  ;;  %v966_v45 = vstv %s2648_s20 }
 0x163   :  { %v882_v56 = vpop.permute.xlu2 %881  ;;  %s2722_s4 = sld [smem:[#allocation4 + $0x44]] }
 0x164   :  { %v883_v55 = vsel %vm58_vm0, %v882_v56, 0.0  ;;  %s2740_s0 = sld [smem:[#allocation4 + $0x5c]] }
 0x165   :  { %v828_v52 = vpop.permute.xlu0 %827  ;;  %v831_v51 = vpop.permute.xlu1 %830  ;;  %v889_v27 = vmul.f32 %v888_v31, %v883_v55  ;;  %v901_v8 = vmul.f32 %v900_v48, %v883_v55  ;;  %v913_v59 = vmul.f32 %v912_v21, %v883_v55  ;;  %v925_v5 = vmul.f32 %v924_v41, %v883_v55  ;;  %s2748_s25 = sld [smem:[#allocation4 + $0x5f]] }
 0x166   :  { %v829_v11 = vsel %vm58_vm0, %v828_v52, 0.0  ;;  %v832_v2 = vsel %vm59_vm1, %v831_v51, 0.0  ;;  %v1081_v21 = vstv %s2672_s7  ;;  %s2784_s5 = sld [smem:[#allocation6]] }
 0x167   :  { %v835_v61 = vmul.f32 %v834_v6, %v829_v11  ;;  %v847_v32 = vmul.f32 %v846_v54, %v829_v11  ;;  %v859_v36 = vmul.f32 %v858_v15, %v829_v11  ;;  %v871_v33 = vmul.f32 %v870_v34, %v829_v11  ;;  %s2801_s24 = sld [smem:[#allocation6 + $0x3]] }
 0x168   :  { %v842_v31 = vmul.f32 %v841_v12, %v832_v2  ;;  %v854_v7 = vmul.f32 %v853_v25, %v832_v2  ;;  %v866_v48 = vmul.f32 %v865_v57, %v832_v2  ;;  %v878_v35 = vmul.f32 %v877_v13, %v832_v2  ;;  %s3082_s1 = sld [smem:[#allocation52_spill]] }
 0x169   :  { %v839_v56 = vadd.f32 %v2542_v43, %v835_v61  ;;  %v1003_v58 = vstv %s2678_s14  ;;  %v1015_v41 = vstv %s2684_s26  ;;  %v851_v55 = vadd.f32 %v2545_v37, %v847_v32 }
 0x16a   :  { %v863_v52 = vadd.f32 %v2620_v44, %v859_v36  ;;  %v875_v6 = vadd.f32 %v2625_v26, %v871_v33  ;;  %v893_v15 = vadd.f32 %v2449_v19, %v889_v27  ;;  %v905_v43 = vadd.f32 %v2452_v10, %v901_v8 }
 0x16b   :  { %v939_v22 = vpop.permute.xlu2 %938  ;;  %v917_v34 = vadd.f32 %v2461_v16, %v913_v59  ;;  %v929_v37 = vadd.f32 %v2464_v17, %v925_v5  ;;  %v843_v25 = vadd.f32 %v842_v31, %v839_v56  ;;  %v855_v44 = vadd.f32 %v854_v7, %v851_v55 }
 0x16c   :  { %v940_v54 = vsel %vm59_vm1, %v939_v22, 0.0  ;;  %v867_v36 = vadd.f32 %v866_v48, %v863_v52  ;;  %v879_v26 = vadd.f32 %v878_v35, %v875_v6  ;;  %v3071_v31 = vstv %s2603_s15 }
 0x16d   :  { %v885_v12 = vpop.permute.xlu0 %884  ;;  %v936_v57 = vpop.permute.xlu1 %935  ;;  %v950_v13 = vmul.f32 %v949_v63, %v940_v54  ;;  %v962_v19 = vmul.f32 %v961_v24, %v940_v54  ;;  %v844_v63 = vadd.f32 %v843_v25, %v2664_v39  ;;  %v856_v24 = vadd.f32 %v855_v44, %v2666_v60 }
 0x16e   :  { %v886_v10 = vsel %vm59_vm1, %v885_v12, 0.0  ;;  %v937_v16 = vsel %vm58_vm0, %v936_v57, 0.0  ;;  %v868_v32 = vadd.f32 %v867_v36, %v2668_v29  ;;  %v880_v5 = vadd.f32 %v879_v26, %v2670_v18 }
 0x16f   :  { %v896_v17 = vmul.f32 %v895_v40, %v886_v10  ;;  %v908_v22 = vmul.f32 %v907_v38, %v886_v10  ;;  %v920_v7 = vmul.f32 %v919_v14, %v886_v10  ;;  %v932_v59 = vmul.f32 %v931_v4, %v886_v10 }
 0x170   :  { %v3069_v38 = vstv %s2547_s23  ;;  %v943_v4 = vmul.f32 %v942_v62, %v937_v16  ;;  %v955_v33 = vmul.f32 %v954_v20, %v937_v16  ;;  %v967_v39 = vmul.f32 %v966_v45, %v937_v16  ;;  %s2788_s23 = sld [smem:[#allocation6 + $0x1]] }
 0x171   :  { %v897_v61 = vadd.f32 %v896_v17, %v893_v15  ;;  %v909_v2 = vadd.f32 %v908_v22, %v905_v43  ;;  %v921_v11 = vadd.f32 %v920_v7, %v917_v34  ;;  %v933_v40 = vadd.f32 %v932_v59, %v929_v37 }
 0x172   :  { %v974_v14 = vmul.f32 %v3069_v38, %v940_v54  ;;  %v947_v35 = vadd.f32 %v2512_v23, %v943_v4  ;;  %v959_v62 = vadd.f32 %v2515_v9, %v955_v33  ;;  %v971_v20 = vadd.f32 %v2518_v46, %v967_v39 }
 0x173   :  { %v1044_v51 = vpop.permute.xlu2 %1043  ;;  %v898_v60 = vadd.f32 %v897_v61, %v844_v63  ;;  %v910_v29 = vadd.f32 %v909_v2, %v856_v24  ;;  %v922_v18 = vadd.f32 %v921_v11, %v868_v32  ;;  %v934_v27 = vadd.f32 %v933_v40, %v880_v5 }
 0x174   :  { %v1045_v8 = vsel %vm58_vm0, %v1044_v51, 0.0  ;;  %v3070_v45 = vstv %s2596_s13  ;;  %v3072_v52 = vstv %s2650_s27  ;;  %v1027_v15 = vstv %s2722_s4 }
 0x175   :  { %v1051_v56 = vmul.f32 %v3070_v45, %v1045_v8  ;;  %v1063_v48 = vmul.f32 %v3071_v31, %v1045_v8  ;;  %v990_v55 = vpop.permute.xlu0 %989  ;;  %v979_v6 = vmul.f32 %v3072_v52, %v937_v16  ;;  %v951_v23 = vadd.f32 %v950_v13, %v947_v35  ;;  %v993_v24 = vpop.permute.xlu1 %992 }
 0x176   :  { %v991_v43 = vsel %vm58_vm0, %v990_v55, 0.0  ;;  %v963_v34 = vadd.f32 %v962_v19, %v959_v62  ;;  %v975_v37 = vadd.f32 %v974_v14, %v971_v20  ;;  %v3073_v9 = vstv %s2556_s30  ;;  %s2792_s30 = sld [smem:[#allocation6 + $0x2]]  ;;  %v1330_v55 = vld [vmem:[%s3082_s1 + $0x8] sm:$0xff] }
 0x177   :  { %v986_v12 = vmul.f32 %v3073_v9, %v940_v54  ;;  %v3074_v25 = vstv %s2607_s16  ;;  %v3075_v44 = vstv %s2609_s19  ;;  %v1039_v26 = vstv %s2740_s0 }
 0x178   :  { %v1075_v46 = vmul.f32 %v3074_v25, %v1045_v8  ;;  %v1087_v36 = vmul.f32 %v3075_v44, %v1045_v8  ;;  %v3076_v57 = vstv %s3067_s9  ;;  %v3077_v17 = vstv %s3068_s28 }
 0x179   :  { %v997_v10 = vmul.f32 %v3076_v57, %v991_v43  ;;  %v1009_v22 = vmul.f32 %v3077_v17, %v991_v43  ;;  %v3078_v16 = vstv %s2627_s8  ;;  %v3079_v59 = vstv %s2629_s11  ;;  %s3083_s8 = sld [smem:[#allocation53_spill]] }
 0x17a   :  { %v1021_v7 = vmul.f32 %v3078_v16, %v991_v43  ;;  %v1033_v63 = vmul.f32 %v3079_v59, %v991_v43  ;;  %v983_v13 = vadd.f32 %v2538_v42, %v979_v6  ;;  %v952_v54 = vadd.f32 %v951_v23, %v898_v60  ;;  %v1336_v6 = vld [vmem:[%s3082_s1 + $0x18] sm:$0xff] }
 0x17b   :  { %v964_v19 = vadd.f32 %v963_v34, %v910_v29  ;;  %v976_v32 = vadd.f32 %v975_v37, %v922_v18  ;;  %v1055_v5 = vadd.f32 %v2529_v49, %v1051_v56  ;;  %v1067_v61 = vadd.f32 %v2532_v3, %v1063_v48 }
 0x17c   :  { %v1001_v2 = vadd.f32 %v2494_v47, %v997_v10  ;;  %v1093_v11 = vstv %s2748_s25  ;;  %v1013_v40 = vadd.f32 %v2500_v53, %v1009_v22  ;;  %v1025_v38 = vadd.f32 %v2503_v0, %v1021_v7 }
 0x17d   :  { %v987_v14 = vadd.f32 %v986_v12, %v983_v13  ;;  %v994_v42 = vsel %vm59_vm1, %v993_v24, 0.0  ;;  %v1079_v53 = vadd.f32 %v2535_v1, %v1075_v46  ;;  %v1091_v0 = vadd.f32 %v2550_v30, %v1087_v36  ;;  %v1047_v33 = vpop.permute.xlu0 %1046  ;;  %v1393_v46 = vld [vmem:[%s3082_s1] sm:$0xff] }
 0x17e   :  { %v1004_v49 = vmul.f32 %v1003_v58, %v994_v42  ;;  %v1016_v47 = vmul.f32 %v1015_v41, %v994_v42  ;;  %v1028_v3 = vmul.f32 %v1027_v15, %v994_v42  ;;  %v1040_v51 = vmul.f32 %v1039_v26, %v994_v42 }
 0x17f   :  { %v1037_v4 = vadd.f32 %v2509_v50, %v1033_v63  ;;  %v988_v39 = vadd.f32 %v987_v14, %v934_v27  ;;  %v1048_v60 = vsel %vm59_vm1, %v1047_v33, 0.0  ;;  %v3080_v8 = vstv %s2656_s3 }
 0x180   :  { %v1005_v29 = vadd.f32 %v1004_v49, %v1001_v2  ;;  %v1017_v58 = vadd.f32 %v1016_v47, %v1013_v40  ;;  %v1029_v18 = vadd.f32 %v1028_v3, %v1025_v38  ;;  %v1058_v41 = vmul.f32 %v3080_v8, %v1048_v60 }
 0x181   :  { %v3081_v35 = vstv %s2658_s10  ;;  %v1082_v1 = vmul.f32 %v1081_v21, %v1048_v60  ;;  %v1094_v20 = vmul.f32 %v1093_v11, %v1048_v60  ;;  %v1041_v27 = vadd.f32 %v1040_v51, %v1037_v4  ;;  %v1333_v21 = vld [vmem:[%s3082_s1 + $0x10] sm:$0xff] }
 0x182   :  { %v1070_v62 = vmul.f32 %v3081_v35, %v1048_v60  ;;  %v1006_v30 = vadd.f32 %v1005_v29, %v952_v54  ;;  %v1018_v50 = vadd.f32 %v1017_v58, %v964_v19  ;;  %v1030_v45 = vadd.f32 %v1029_v18, %v976_v32 }
 0x183   :  { %v1059_v28 = vadd.f32 %v1058_v41, %v1055_v5  ;;  %v1083_v31 = vadd.f32 %v1082_v1, %v1079_v53  ;;  %v1095_v48 = vadd.f32 %v1094_v20, %v1091_v0  ;;  %v1042_v52 = vadd.f32 %v1041_v27, %v988_v39 }
 0x184   :  { %v1071_v56 = vadd.f32 %v1070_v62, %v1067_v61  ;;  %v1099_v34 = vstv %s2784_s5  ;;  %v1105_v37 = vstv %s2788_s23  ;;  %v1112_v9 = vstv %s2792_s30 }
 0x185   :  { %v1060_v15 = vadd.f32 %v1059_v28, %v1006_v30  ;;  %v1084_v23 = vadd.f32 %v1083_v31, %v1030_v45  ;;  %v1096_v12 = vadd.f32 %v1095_v48, %v1042_v52  ;;  %v1119_v25 = vstv %s2801_s24 }
 0x186   :  { %v1072_v43 = vadd.f32 %v1071_v56, %v1018_v50 }
 0x187   :  { %v1097_v44 = vadd.f32 %v1393_v46, %v1060_v15  ;;  %v1110_v26 = vadd.f32 %v1333_v21, %v1084_v23  ;;  %v1117_v57 = vadd.f32 %v1336_v6, %v1096_v12 }
 0x188   :  { %v1103_v36 = vadd.f32 %v1330_v55, %v1072_v43 }
 0x189   :  { %v1100_v10 = vadd.f32 %v1099_v34, %v1097_v44  ;;  %v1113_v22 = vadd.f32 %v1112_v9, %v1110_v26  ;;  %v1120_v16 = vadd.f32 %v1119_v25, %v1117_v57 }
 0x18a   :  { %v1106_v17 = vadd.f32 %v1105_v37, %v1103_v36 }
 0x18b   :  { %1101 = vst [vmem:[%s3083_s8] sm:$0xff] %v1100_v10 }
 0x18c   :  { %1332 = vst [vmem:[%s3083_s8 + $0x8] sm:$0xff] %v1106_v17 }
 0x18d   :  { %1335 = vst [vmem:[%s3083_s8 + $0x10] sm:$0xff] %v1113_v22 }
 0x18e   :  { %1338 = vst [vmem:[%s3083_s8 + $0x18] sm:$0xff] %v1120_v16 }
 0x18f   :  { %1127 = vsyncpa [#allocation3], 1 }
 0x190   :  { %1128 = vsyncpa [#allocation5], 1 }

</bundles_post_ra>
